<compile_context>
chip_gen: v7x
topology: tpu7x:2x2x1
jax: 0.10.0
libtpu: 0.0.40
codegen_flags: <defaults>
</compile_context>

<pallas_src>
import math
import functools

import numpy as np
import jax
import jax.numpy as jnp
from jax.experimental import pallas as pl
from jax.experimental.pallas import tpu as pltpu


# ----------------------------- in-kernel helpers -----------------------------

def _layer_norm(z, g, b, eps):
    mu = jnp.mean(z, axis=-1, keepdims=True)
    d = z - mu
    var = jnp.mean(d * d, axis=-1, keepdims=True)      # biased var (torch LayerNorm)
    return d * jax.lax.rsqrt(var + eps) * g + b


def _gelu(x):
    # exact (erf) GELU == torch nn.GELU() default
    return 0.5 * x * (1.0 + jax.lax.erf(x * (1.0 / math.sqrt(2.0))))


def _heads_attention(q, k, v, valid, num_head):
    """q: (Sq, D), k/v: (Sk, D); valid broadcastable to (Sq, Sk) bool."""
    _, D = q.shape
    Dh = D // num_head
    scale = 1.0 / math.sqrt(Dh)
    outs = []
    for h in range(num_head):
        qh = q[:, h * Dh:(h + 1) * Dh]
        kh = k[:, h * Dh:(h + 1) * Dh]
        vh = v[:, h * Dh:(h + 1) * Dh]
        s = jnp.dot(qh, kh.T, preferred_element_type=jnp.float32) * scale
        s = jnp.where(valid, s, -1e30)                  # finite -> no NaN on all-pad rows
        m = jnp.max(s, axis=-1, keepdims=True)
        p = jnp.exp(s - m)
        p = p * pl.reciprocal(jnp.sum(p, axis=-1, keepdims=True), approx=True)
        outs.append(jnp.dot(p, vh, preferred_element_type=jnp.float32))
    return jnp.concatenate(outs, axis=-1)               # (Sq, D)


def _self_attn(x, wqkv, bqkv, wo, bo, valid, num_head):
    D = x.shape[1]
    qkv = jnp.dot(x, wqkv, preferred_element_type=jnp.float32) + bqkv     # (S, 3D)
    ao = _heads_attention(qkv[:, :D], qkv[:, D:2 * D], qkv[:, 2 * D:], valid, num_head)
    return jnp.dot(ao, wo, preferred_element_type=jnp.float32) + bo


def _cross_attn(xq, xkv, wq, bq, wkv, bkv, wo, bo, valid, num_head):
    D = xq.shape[1]
    q = jnp.dot(xq, wq, preferred_element_type=jnp.float32) + bq          # (Sq, D)
    kv = jnp.dot(xkv, wkv, preferred_element_type=jnp.float32) + bkv      # (Sk, 2D)
    ao = _heads_attention(q, kv[:, :D], kv[:, D:], valid, num_head)
    return jnp.dot(ao, wo, preferred_element_type=jnp.float32) + bo


# ------------------------------ fused kernel ------------------------------

def _transformer_kernel(
    # per-batch inputs (grid over batch)
    src_kpad_ref, trg_kpad_ref, src_emb_ref, trg_emb_ref,
    # encoder weights, stacked over layers (leading dim = n_enc)
    e_wqkv_ref, e_bqkv_ref, e_wo_ref, e_bo_ref,
    e_w1_ref, e_b1_ref, e_w2_ref, e_b2_ref, e_lng_ref, e_lnb_ref,
    # decoder weights, stacked over layers (leading dim = n_dec)
    d_wqkv_ref, d_bqkv_ref, d_wo_ref, d_bo_ref,
    d_cwq_ref, d_cbq_ref, d_cwkv_ref, d_cbkv_ref, d_cwo_ref, d_cbo_ref,
    d_w1_ref, d_b1_ref, d_w2_ref, d_b2_ref, d_lng_ref, d_lnb_ref,
    # final projection
    fc_w_ref, fc_b_ref,
    # output
    out_ref,
    *, num_head, eps, n_enc, n_dec):

    src_valid = src_kpad_ref[0] != 0        # (1, Ss) bool (key-pad mask)
    trg_valid = trg_kpad_ref[0] != 0        # (1, St) bool

    x = src_emb_ref[0]                      # (Ss, D) f32, encoder activation
    y = trg_emb_ref[0]                      # (St, D) f32, decoder activation
    St = y.shape[0]

    # decoder self-attention validity: causal AND key-not-pad (matches torch mask)
    row = jax.lax.broadcasted_iota(jnp.int32, (St, St), 0)
    col = jax.lax.broadcasted_iota(jnp.int32, (St, St), 1)
    dec_valid = jnp.logical_and(row >= col, trg_valid)  # (St, St) bool

    # ---------------- encoder stack ----------------
    for l in range(n_enc):
        g, b = e_lng_ref[l], e_lnb_ref[l]
        attn = _self_attn(x, e_wqkv_ref[l], e_bqkv_ref[l], e_wo_ref[l], e_bo_ref[l],
                          src_valid, num_head)
        x = _layer_norm(x + attn, g, b, eps)
        h1 = _gelu(jnp.dot(x, e_w1_ref[l], preferred_element_type=jnp.float32) + e_b1_ref[l])
        ffn = jnp.dot(h1, e_w2_ref[l], preferred_element_type=jnp.float32) + e_b2_ref[l]
        x = _layer_norm(x + ffn, g, b, eps)

    # ---------------- decoder stack ----------------
    for l in range(n_dec):
        g, b = d_lng_ref[l], d_lnb_ref[l]
        attn = _self_attn(y, d_wqkv_ref[l], d_bqkv_ref[l], d_wo_ref[l], d_bo_ref[l],
                          dec_valid, num_head)
        y = _layer_norm(y + attn, g, b, eps)
        cross = _cross_attn(y, x, d_cwq_ref[l], d_cbq_ref[l], d_cwkv_ref[l], d_cbkv_ref[l],
                            d_cwo_ref[l], d_cbo_ref[l], src_valid, num_head)
        y = _layer_norm(y + cross, g, b, eps)
        h1 = _gelu(jnp.dot(y, d_w1_ref[l], preferred_element_type=jnp.float32) + d_b1_ref[l])
        ffn = jnp.dot(h1, d_w2_ref[l], preferred_element_type=jnp.float32) + d_b2_ref[l]
        y = _layer_norm(y + ffn, g, b, eps)

    # ---------------- final projection ----------------
    out_ref[0] = jnp.dot(y, fc_w_ref[...], preferred_element_type=jnp.float32) + fc_b_ref[...]


# ------------------------------- model wrapper -------------------------------

def transformer_forward(params, src, trg, cfg):
    B, Ss = src.shape
    St = trg.shape[1]
    V = cfg["trg_vocab"]

    # token embedding (single XLA gather) + positional encoding, done outside
    # the kernel; everything else is the single fused Pallas kernel.
    src_emb = jnp.take(params["enc_emb"], src, axis=0) + params["pe"][:, :Ss, :]
    trg_emb = jnp.take(params["dec_emb"], trg, axis=0) + params["pe"][:, :St, :]
    src_kpad = (src != cfg["src_pad_id"]).astype(jnp.int32).reshape(B, 1, Ss)
    trg_kpad = (trg != cfg["trg_pad_id"]).astype(jnp.int32).reshape(B, 1, St)

    enc, dec = params["enc"], params["dec"]
    batched_inputs = [src_kpad, trg_kpad, src_emb, trg_emb]
    weight_inputs = [
        enc["wqkv"], enc["bqkv"], enc["wo"], enc["bo"],
        enc["w1"], enc["b1"], enc["w2"], enc["b2"], enc["ln_g"], enc["ln_b"],
        dec["wqkv"], dec["bqkv"], dec["wo"], dec["bo"],
        dec["cwq"], dec["cbq"], dec["cwkv"], dec["cbkv"], dec["cwo"], dec["cbo"],
        dec["w1"], dec["b1"], dec["w2"], dec["b2"], dec["ln_g"], dec["ln_b"],
        params["fc_w"], params["fc_b"],
    ]

    def batched_spec(a):
        nd = a.ndim
        return pl.BlockSpec((1,) + a.shape[1:], lambda i, _nd=nd: (i,) + (0,) * (_nd - 1))

    def full_spec(a):
        nd = a.ndim
        return pl.BlockSpec(a.shape, lambda i, _nd=nd: (0,) * _nd)

    in_specs = ([batched_spec(a) for a in batched_inputs] +
                [full_spec(a) for a in weight_inputs])

    kernel = functools.partial(
        _transformer_kernel,
        num_head=cfg["num_head"], eps=cfg["layernorm_eps"],
        n_enc=cfg["enc_num_layers"], n_dec=cfg["dec_num_layers"])

    logits = pl.pallas_call(
        kernel,
        grid=(B,),
        out_shape=jax.ShapeDtypeStruct((B, St, V), jnp.float32),
        in_specs=in_specs,
        out_specs=pl.BlockSpec((1, St, V), lambda i: (i, 0, 0)),
        compiler_params=pltpu.CompilerParams(dimension_semantics=("parallel",)),
    )(*batched_inputs, *weight_inputs)

    return [], logits   # matches PyTorch return (all_cross_attn_wts == [], output)


# ------------------------------ param init ------------------------------

def _normal(key, shape, std=0.02):
    return (std * jax.random.normal(key, shape)).astype(jnp.float32)


def init_self_attn(key, D):
    ks = jax.random.split(key, 8)
    wqkv = jnp.concatenate([_normal(ks[0], (D, D)), _normal(ks[2], (D, D)),
                            _normal(ks[4], (D, D))], axis=1)               # (D, 3D)
    bqkv = jnp.concatenate([_normal(ks[1], (D,)), _normal(ks[3], (D,)),
                            _normal(ks[5], (D,))]).reshape(1, 3 * D)
    return {"wqkv": wqkv, "bqkv": bqkv,
            "wo": _normal(ks[6], (D, D)), "bo": _normal(ks[7], (D,)).reshape(1, D)}


def init_cross_attn(key, D):
    ks = jax.random.split(key, 8)
    return {"cwq": _normal(ks[0], (D, D)), "cbq": _normal(ks[1], (D,)).reshape(1, D),
            "cwkv": jnp.concatenate([_normal(ks[2], (D, D)), _normal(ks[4], (D, D))], axis=1),
            "cbkv": jnp.concatenate([_normal(ks[3], (D,)), _normal(ks[5], (D,))]).reshape(1, 2 * D),
            "cwo": _normal(ks[6], (D, D)), "cbo": _normal(ks[7], (D,)).reshape(1, D)}


def init_ffn(key, D, F):
    ks = jax.random.split(key, 4)
    return {"w1": _normal(ks[0], (D, F)), "b1": _normal(ks[1], (F,)).reshape(1, F),
            "w2": _normal(ks[2], (F, D)), "b2": _normal(ks[3], (D,)).reshape(1, D)}


def init_encoder_layer(key, D, F):
    k_attn, k_ffn = jax.random.split(key, 2)
    p = {}
    p.update(init_self_attn(k_attn, D))
    p.update(init_ffn(k_ffn, D, F))
    p["ln_g"] = jnp.ones((1, D), jnp.float32)
    p["ln_b"] = jnp.zeros((1, D), jnp.float32)
    return p


def init_decoder_layer(key, D, F):
    k_self, k_cross, k_ffn = jax.random.split(key, 3)
    p = {}
    p.update(init_self_attn(k_self, D))
    p.update(init_cross_attn(k_cross, D))
    p.update(init_ffn(k_ffn, D, F))
    p["ln_g"] = jnp.ones((1, D), jnp.float32)
    p["ln_b"] = jnp.zeros((1, D), jnp.float32)
    return p


def sinusoidal_pe(max_len, D):
    # matches the PyTorch PositionalEncoding loop (same exponent for sin/cos pair)
    pos = np.arange(0, max_len, dtype=np.float64)
    pe = np.zeros((max_len, D), dtype=np.float64)
    for i in range(0, D, 2):
        pe[:, i] = np.sin(pos / 10000 ** (i / D))
        if i + 1 < D:
            pe[:, i + 1] = np.cos(pos / 10000 ** (i / D))
    return jnp.asarray(pe[None], dtype=jnp.float32)     # (1, max_len, D)


def init_params(key, cfg):
    D, F = cfg["hidden_dim"], cfg["ffn_dim"]
    Le, Ld = cfg["enc_num_layers"], cfg["dec_num_layers"]
    keys = jax.random.split(key, 4 + Le + Ld)
    enc_emb = _normal(keys[0], (cfg["src_vocab"], D)).at[cfg["src_pad_id"]].set(0.0)
    dec_emb = _normal(keys[1], (cfg["trg_vocab"], D)).at[cfg["trg_pad_id"]].set(0.0)
    fc_w = _normal(keys[2], (D, cfg["trg_vocab"]))
    fc_b = _normal(keys[3], (cfg["trg_vocab"],)).reshape(1, cfg["trg_vocab"])
    enc_layers = [init_encoder_layer(keys[4 + i], D, F) for i in range(Le)]
    dec_layers = [init_decoder_layer(keys[4 + Le + i], D, F) for i in range(Ld)]

    def stack(layers):
        return {name: jnp.stack([lp[name] for lp in layers], axis=0) for name in layers[0]}

    return {"enc_emb": enc_emb, "dec_emb": dec_emb,
            "pe": sinusoidal_pe(cfg["max_len"], D),
            "enc": stack(enc_layers), "dec": stack(dec_layers),
            "fc_w": fc_w, "fc_b": fc_b}


# --------------------------------- main ---------------------------------

if __name__ == "__main__":
    cfg = {
        "hidden_dim": 32,
        "ffn_dim": 64,
        "num_head": 4,
        "enc_num_layers": 2,
        "dec_num_layers": 2,
        "max_len": 16,
        "layernorm_eps": 1e-5,
        "src_vocab": 50,
        "trg_vocab": 48,
        "src_pad_id": 0,
        "trg_pad_id": 0,
        # dropout == 0.0 (inference): nn.Dropout becomes identity
    }

    key = jax.random.PRNGKey(0)
    kp, ks, kt = jax.random.split(key, 3)
    params = init_params(kp, cfg)

    B, S_src, S_trg = 2, 8, 8
    # tokens in [1, vocab) so no fully-masked rows (pad_token_id == 0)
    src = jax.random.randint(ks, (B, S_src), 1, cfg["src_vocab"], dtype=jnp.int32)
    trg = jax.random.randint(kt, (B, S_trg), 1, cfg["trg_vocab"], dtype=jnp.int32)

    fwd = jax.jit(lambda s, t: transformer_forward(params, s, t, cfg)[1])
    logits = jax.block_until_ready(fwd(src, trg))

    assert logits.shape == (B, S_trg, cfg["trg_vocab"])
    assert bool(jnp.all(jnp.isfinite(logits)))
    print("KERNEL_OK")
</pallas_src>

<mosaic_0001>
module attributes {stable_mosaic.version = 11 : i64} {
  func.func @_transformer_kernel(%arg0: i32, %arg1: memref<1x1x8xi32, #tpu.memory_space<vmem>>, %arg2: memref<1x1x8xi32, #tpu.memory_space<vmem>>, %arg3: memref<1x8x32xf32, #tpu.memory_space<vmem>>, %arg4: memref<1x8x32xf32, #tpu.memory_space<vmem>>, %arg5: memref<2x32x96xf32, #tpu.memory_space<vmem>>, %arg6: memref<2x1x96xf32, #tpu.memory_space<vmem>>, %arg7: memref<2x32x32xf32, #tpu.memory_space<vmem>>, %arg8: memref<2x1x32xf32, #tpu.memory_space<vmem>>, %arg9: memref<2x32x64xf32, #tpu.memory_space<vmem>>, %arg10: memref<2x1x64xf32, #tpu.memory_space<vmem>>, %arg11: memref<2x64x32xf32, #tpu.memory_space<vmem>>, %arg12: memref<2x1x32xf32, #tpu.memory_space<vmem>>, %arg13: memref<2x1x32xf32, #tpu.memory_space<vmem>>, %arg14: memref<2x1x32xf32, #tpu.memory_space<vmem>>, %arg15: memref<2x32x96xf32, #tpu.memory_space<vmem>>, %arg16: memref<2x1x96xf32, #tpu.memory_space<vmem>>, %arg17: memref<2x32x32xf32, #tpu.memory_space<vmem>>, %arg18: memref<2x1x32xf32, #tpu.memory_space<vmem>>, %arg19: memref<2x32x32xf32, #tpu.memory_space<vmem>>, %arg20: memref<2x1x32xf32, #tpu.memory_space<vmem>>, %arg21: memref<2x32x64xf32, #tpu.memory_space<vmem>>, %arg22: memref<2x1x64xf32, #tpu.memory_space<vmem>>, %arg23: memref<2x32x32xf32, #tpu.memory_space<vmem>>, %arg24: memref<2x1x32xf32, #tpu.memory_space<vmem>>, %arg25: memref<2x32x64xf32, #tpu.memory_space<vmem>>, %arg26: memref<2x1x64xf32, #tpu.memory_space<vmem>>, %arg27: memref<2x64x32xf32, #tpu.memory_space<vmem>>, %arg28: memref<2x1x32xf32, #tpu.memory_space<vmem>>, %arg29: memref<2x1x32xf32, #tpu.memory_space<vmem>>, %arg30: memref<2x1x32xf32, #tpu.memory_space<vmem>>, %arg31: memref<32x48xf32, #tpu.memory_space<vmem>>, %arg32: memref<1x48xf32, #tpu.memory_space<vmem>>, %arg33: memref<1x8x48xf32, #tpu.memory_space<vmem>>) attributes {dimension_semantics = [#tpu.dimension_semantics<parallel>], iteration_bounds = array<i64: 2>, scalar_prefetch = 0 : i64, scratch_operands = 0 : i64, tpu.core_type = #tpu.core_type<tc>, window_params = [{transform_indices = @transform_0, window_bounds = array<i64: 1, 1, 8>}, {transform_indices = @transform_1, window_bounds = array<i64: 1, 1, 8>}, {transform_indices = @transform_2, window_bounds = array<i64: 1, 8, 32>}, {transform_indices = @transform_3, window_bounds = array<i64: 1, 8, 32>}, {pipeline_mode = #tpu.pipeline_mode<synchronous>, transform_indices = @transform_4, window_bounds = array<i64: 2, 32, 96>}, {pipeline_mode = #tpu.pipeline_mode<synchronous>, transform_indices = @transform_5, window_bounds = array<i64: 2, 1, 96>}, {pipeline_mode = #tpu.pipeline_mode<synchronous>, transform_indices = @transform_6, window_bounds = array<i64: 2, 32, 32>}, {pipeline_mode = #tpu.pipeline_mode<synchronous>, transform_indices = @transform_7, window_bounds = array<i64: 2, 1, 32>}, {pipeline_mode = #tpu.pipeline_mode<synchronous>, transform_indices = @transform_8, window_bounds = array<i64: 2, 32, 64>}, {pipeline_mode = #tpu.pipeline_mode<synchronous>, transform_indices = @transform_9, window_bounds = array<i64: 2, 1, 64>}, {pipeline_mode = #tpu.pipeline_mode<synchronous>, transform_indices = @transform_10, window_bounds = array<i64: 2, 64, 32>}, {pipeline_mode = #tpu.pipeline_mode<synchronous>, transform_indices = @transform_11, window_bounds = array<i64: 2, 1, 32>}, {pipeline_mode = #tpu.pipeline_mode<synchronous>, transform_indices = @transform_12, window_bounds = array<i64: 2, 1, 32>}, {pipeline_mode = #tpu.pipeline_mode<synchronous>, transform_indices = @transform_13, window_bounds = array<i64: 2, 1, 32>}, {pipeline_mode = #tpu.pipeline_mode<synchronous>, transform_indices = @transform_14, window_bounds = array<i64: 2, 32, 96>}, {pipeline_mode = #tpu.pipeline_mode<synchronous>, transform_indices = @transform_15, window_bounds = array<i64: 2, 1, 96>}, {pipeline_mode = #tpu.pipeline_mode<synchronous>, transform_indices = @transform_16, window_bounds = array<i64: 2, 32, 32>}, {pipeline_mode = #tpu.pipeline_mode<synchronous>, transform_indices = @transform_17, window_bounds = array<i64: 2, 1, 32>}, {pipeline_mode = #tpu.pipeline_mode<synchronous>, transform_indices = @transform_18, window_bounds = array<i64: 2, 32, 32>}, {pipeline_mode = #tpu.pipeline_mode<synchronous>, transform_indices = @transform_19, window_bounds = array<i64: 2, 1, 32>}, {pipeline_mode = #tpu.pipeline_mode<synchronous>, transform_indices = @transform_20, window_bounds = array<i64: 2, 32, 64>}, {pipeline_mode = #tpu.pipeline_mode<synchronous>, transform_indices = @transform_21, window_bounds = array<i64: 2, 1, 64>}, {pipeline_mode = #tpu.pipeline_mode<synchronous>, transform_indices = @transform_22, window_bounds = array<i64: 2, 32, 32>}, {pipeline_mode = #tpu.pipeline_mode<synchronous>, transform_indices = @transform_23, window_bounds = array<i64: 2, 1, 32>}, {pipeline_mode = #tpu.pipeline_mode<synchronous>, transform_indices = @transform_24, window_bounds = array<i64: 2, 32, 64>}, {pipeline_mode = #tpu.pipeline_mode<synchronous>, transform_indices = @transform_25, window_bounds = array<i64: 2, 1, 64>}, {pipeline_mode = #tpu.pipeline_mode<synchronous>, transform_indices = @transform_26, window_bounds = array<i64: 2, 64, 32>}, {pipeline_mode = #tpu.pipeline_mode<synchronous>, transform_indices = @transform_27, window_bounds = array<i64: 2, 1, 32>}, {pipeline_mode = #tpu.pipeline_mode<synchronous>, transform_indices = @transform_28, window_bounds = array<i64: 2, 1, 32>}, {pipeline_mode = #tpu.pipeline_mode<synchronous>, transform_indices = @transform_29, window_bounds = array<i64: 2, 1, 32>}, {pipeline_mode = #tpu.pipeline_mode<synchronous>, transform_indices = @transform_30, window_bounds = array<i64: 32, 48>}, {pipeline_mode = #tpu.pipeline_mode<synchronous>, transform_indices = @transform_31, window_bounds = array<i64: 1, 48>}, {transform_indices = @transform_32, window_bounds = array<i64: 1, 8, 48>}]} {
    %c0 = arith.constant 0 : index
    %c0_0 = arith.constant 0 : index
    %c0_1 = arith.constant 0 : index
    %0 = vector.load %arg1[%c0, %c0_0, %c0_1] : memref<1x1x8xi32, #tpu.memory_space<vmem>>, vector<1x1x8xi32>
    %1 = vector.shape_cast %0 : vector<1x1x8xi32> to vector<1x8xi32>
    %c0_i32 = arith.constant 0 : i32
    %2 = vector.broadcast %c0_i32 : i32 to vector<1x8xi32>
    %3 = arith.cmpi ne, %1, %2 : vector<1x8xi32>
    %c0_2 = arith.constant 0 : index
    %c0_3 = arith.constant 0 : index
    %c0_4 = arith.constant 0 : index
    %4 = vector.load %arg2[%c0_2, %c0_3, %c0_4] : memref<1x1x8xi32, #tpu.memory_space<vmem>>, vector<1x1x8xi32>
    %5 = vector.shape_cast %4 : vector<1x1x8xi32> to vector<1x8xi32>
    %c0_i32_5 = arith.constant 0 : i32
    %6 = vector.broadcast %c0_i32_5 : i32 to vector<1x8xi32>
    %7 = arith.cmpi ne, %5, %6 : vector<1x8xi32>
    %c0_6 = arith.constant 0 : index
    %c0_7 = arith.constant 0 : index
    %c0_8 = arith.constant 0 : index
    %8 = vector.load %arg3[%c0_6, %c0_7, %c0_8] : memref<1x8x32xf32, #tpu.memory_space<vmem>>, vector<1x8x32xf32>
    %9 = vector.shape_cast %8 : vector<1x8x32xf32> to vector<8x32xf32>
    %c0_9 = arith.constant 0 : index
    %c0_10 = arith.constant 0 : index
    %c0_11 = arith.constant 0 : index
    %10 = vector.load %arg4[%c0_9, %c0_10, %c0_11] : memref<1x8x32xf32, #tpu.memory_space<vmem>>, vector<1x8x32xf32>
    %11 = vector.shape_cast %10 : vector<1x8x32xf32> to vector<8x32xf32>
    %12 = tpu.iota {dimensions = array<i32: 0>} : vector<8x8xi32>
    %13 = tpu.iota {dimensions = array<i32: 1>} : vector<8x8xi32>
    %14 = arith.cmpi sge, %12, %13 : vector<8x8xi32>
    %15 = vector.broadcast %7 : vector<1x8xi1> to vector<8x8xi1>
    %16 = arith.andi %14, %15 : vector<8x8xi1>
    %c0_12 = arith.constant 0 : index
    %c0_13 = arith.constant 0 : index
    %c0_14 = arith.constant 0 : index
    %17 = vector.load %arg13[%c0_12, %c0_13, %c0_14] : memref<2x1x32xf32, #tpu.memory_space<vmem>>, vector<1x1x32xf32>
    %18 = vector.shape_cast %17 : vector<1x1x32xf32> to vector<1x32xf32>
    %c0_15 = arith.constant 0 : index
    %c0_16 = arith.constant 0 : index
    %c0_17 = arith.constant 0 : index
    %19 = vector.load %arg14[%c0_15, %c0_16, %c0_17] : memref<2x1x32xf32, #tpu.memory_space<vmem>>, vector<1x1x32xf32>
    %20 = vector.shape_cast %19 : vector<1x1x32xf32> to vector<1x32xf32>
    %c0_18 = arith.constant 0 : index
    %c0_19 = arith.constant 0 : index
    %c0_20 = arith.constant 0 : index
    %21 = vector.load %arg5[%c0_18, %c0_19, %c0_20] : memref<2x32x96xf32, #tpu.memory_space<vmem>>, vector<1x32x96xf32>
    %22 = vector.shape_cast %21 : vector<1x32x96xf32> to vector<32x96xf32>
    %c0_21 = arith.constant 0 : index
    %c0_22 = arith.constant 0 : index
    %c0_23 = arith.constant 0 : index
    %23 = vector.load %arg6[%c0_21, %c0_22, %c0_23] : memref<2x1x96xf32, #tpu.memory_space<vmem>>, vector<1x1x96xf32>
    %24 = vector.shape_cast %23 : vector<1x1x96xf32> to vector<1x96xf32>
    %c0_24 = arith.constant 0 : index
    %c0_25 = arith.constant 0 : index
    %c0_26 = arith.constant 0 : index
    %25 = vector.load %arg7[%c0_24, %c0_25, %c0_26] : memref<2x32x32xf32, #tpu.memory_space<vmem>>, vector<1x32x32xf32>
    %26 = vector.shape_cast %25 : vector<1x32x32xf32> to vector<32x32xf32>
    %c0_27 = arith.constant 0 : index
    %c0_28 = arith.constant 0 : index
    %c0_29 = arith.constant 0 : index
    %27 = vector.load %arg8[%c0_27, %c0_28, %c0_29] : memref<2x1x32xf32, #tpu.memory_space<vmem>>, vector<1x1x32xf32>
    %28 = vector.shape_cast %27 : vector<1x1x32xf32> to vector<1x32xf32>
    %cst = arith.constant dense<0.000000e+00> : vector<8x96xf32>
    %29 = tpu.matmul %9, %22, %cst {dimension_numbers = #tpu.dot_dimension_numbers<[1], [0], [0], [1], [0, 0, 1, 1], [], []>} : vector<8x32xf32>, vector<32x96xf32>, vector<8x96xf32> -> vector<8x96xf32>
    %30 = vector.broadcast %24 : vector<1x96xf32> to vector<8x96xf32>
    %31 = arith.addf %29, %30 : vector<8x96xf32>
    %32 = vector.extract_strided_slice %31 {offsets = [0, 0], sizes = [8, 32], strides = [1, 1]} : vector<8x96xf32> to vector<8x32xf32>
    %33 = vector.extract_strided_slice %31 {offsets = [0, 32], sizes = [8, 32], strides = [1, 1]} : vector<8x96xf32> to vector<8x32xf32>
    %34 = vector.extract_strided_slice %31 {offsets = [0, 64], sizes = [8, 32], strides = [1, 1]} : vector<8x96xf32> to vector<8x32xf32>
    %35 = vector.extract_strided_slice %32 {offsets = [0, 0], sizes = [8, 8], strides = [1, 1]} : vector<8x32xf32> to vector<8x8xf32>
    %36 = vector.extract_strided_slice %33 {offsets = [0, 0], sizes = [8, 8], strides = [1, 1]} : vector<8x32xf32> to vector<8x8xf32>
    %37 = vector.extract_strided_slice %34 {offsets = [0, 0], sizes = [8, 8], strides = [1, 1]} : vector<8x32xf32> to vector<8x8xf32>
    %38 = tpu.transpose %36, [1, 0] : vector<8x8xf32> -> vector<8x8xf32>
    %cst_30 = arith.constant dense<0.000000e+00> : vector<8x8xf32>
    %39 = tpu.matmul %35, %38, %cst_30 {dimension_numbers = #tpu.dot_dimension_numbers<[1], [0], [0], [1], [0, 0, 1, 1], [], []>} : vector<8x8xf32>, vector<8x8xf32>, vector<8x8xf32> -> vector<8x8xf32>
    %cst_31 = arith.constant 0.353553385 : f32
    %40 = vector.broadcast %cst_31 : f32 to vector<8x8xf32>
    %41 = arith.mulf %39, %40 : vector<8x8xf32>
    %cst_32 = arith.constant -1.000000e+30 : f32
    %42 = vector.shape_cast %3 : vector<1x8xi1> to vector<1x8xi1>
    %43 = vector.broadcast %42 : vector<1x8xi1> to vector<8x8xi1>
    %44 = vector.broadcast %cst_32 : f32 to vector<8x8xf32>
    %45 = arith.select %43, %41, %44 : vector<8x8xi1>, vector<8x8xf32>
    %cst_33 = arith.constant dense<0xFF800000> : vector<8xf32>
    %46 = vector.multi_reduction <maximumf>, %45, %cst_33 [1] : vector<8x8xf32> to vector<8xf32>
    %47 = vector.shape_cast %46 : vector<8xf32> to vector<8x1xf32>
    %48 = vector.broadcast %47 : vector<8x1xf32> to vector<8x8xf32>
    %49 = arith.subf %45, %48 : vector<8x8xf32>
    %50 = math.exp %49 : vector<8x8xf32>
    %cst_34 = arith.constant dense<0.000000e+00> : vector<8xf32>
    %51 = vector.multi_reduction <add>, %50, %cst_34 [1] : vector<8x8xf32> to vector<8xf32>
    %52 = vector.shape_cast %51 : vector<8xf32> to vector<8x1xf32>
    %53 = tpu.reciprocal %52 {approx = true} : vector<8x1xf32> -> vector<8x1xf32>
    %54 = vector.broadcast %53 : vector<8x1xf32> to vector<8x8xf32>
    %55 = arith.mulf %50, %54 : vector<8x8xf32>
    %cst_35 = arith.constant dense<0.000000e+00> : vector<8x8xf32>
    %56 = tpu.matmul %55, %37, %cst_35 {dimension_numbers = #tpu.dot_dimension_numbers<[1], [0], [0], [1], [0, 0, 1, 1], [], []>} : vector<8x8xf32>, vector<8x8xf32>, vector<8x8xf32> -> vector<8x8xf32>
    %57 = vector.extract_strided_slice %32 {offsets = [0, 8], sizes = [8, 8], strides = [1, 1]} : vector<8x32xf32> to vector<8x8xf32>
    %58 = vector.extract_strided_slice %33 {offsets = [0, 8], sizes = [8, 8], strides = [1, 1]} : vector<8x32xf32> to vector<8x8xf32>
    %59 = vector.extract_strided_slice %34 {offsets = [0, 8], sizes = [8, 8], strides = [1, 1]} : vector<8x32xf32> to vector<8x8xf32>
    %60 = tpu.transpose %58, [1, 0] : vector<8x8xf32> -> vector<8x8xf32>
    %cst_36 = arith.constant dense<0.000000e+00> : vector<8x8xf32>
    %61 = tpu.matmul %57, %60, %cst_36 {dimension_numbers = #tpu.dot_dimension_numbers<[1], [0], [0], [1], [0, 0, 1, 1], [], []>} : vector<8x8xf32>, vector<8x8xf32>, vector<8x8xf32> -> vector<8x8xf32>
    %cst_37 = arith.constant 0.353553385 : f32
    %62 = vector.broadcast %cst_37 : f32 to vector<8x8xf32>
    %63 = arith.mulf %61, %62 : vector<8x8xf32>
    %cst_38 = arith.constant -1.000000e+30 : f32
    %64 = vector.shape_cast %3 : vector<1x8xi1> to vector<1x8xi1>
    %65 = vector.broadcast %64 : vector<1x8xi1> to vector<8x8xi1>
    %66 = vector.broadcast %cst_38 : f32 to vector<8x8xf32>
    %67 = arith.select %65, %63, %66 : vector<8x8xi1>, vector<8x8xf32>
    %cst_39 = arith.constant dense<0xFF800000> : vector<8xf32>
    %68 = vector.multi_reduction <maximumf>, %67, %cst_39 [1] : vector<8x8xf32> to vector<8xf32>
    %69 = vector.shape_cast %68 : vector<8xf32> to vector<8x1xf32>
    %70 = vector.broadcast %69 : vector<8x1xf32> to vector<8x8xf32>
    %71 = arith.subf %67, %70 : vector<8x8xf32>
    %72 = math.exp %71 : vector<8x8xf32>
    %cst_40 = arith.constant dense<0.000000e+00> : vector<8xf32>
    %73 = vector.multi_reduction <add>, %72, %cst_40 [1] : vector<8x8xf32> to vector<8xf32>
    %74 = vector.shape_cast %73 : vector<8xf32> to vector<8x1xf32>
    %75 = tpu.reciprocal %74 {approx = true} : vector<8x1xf32> -> vector<8x1xf32>
    %76 = vector.broadcast %75 : vector<8x1xf32> to vector<8x8xf32>
    %77 = arith.mulf %72, %76 : vector<8x8xf32>
    %cst_41 = arith.constant dense<0.000000e+00> : vector<8x8xf32>
    %78 = tpu.matmul %77, %59, %cst_41 {dimension_numbers = #tpu.dot_dimension_numbers<[1], [0], [0], [1], [0, 0, 1, 1], [], []>} : vector<8x8xf32>, vector<8x8xf32>, vector<8x8xf32> -> vector<8x8xf32>
    %79 = vector.extract_strided_slice %32 {offsets = [0, 16], sizes = [8, 8], strides = [1, 1]} : vector<8x32xf32> to vector<8x8xf32>
    %80 = vector.extract_strided_slice %33 {offsets = [0, 16], sizes = [8, 8], strides = [1, 1]} : vector<8x32xf32> to vector<8x8xf32>
    %81 = vector.extract_strided_slice %34 {offsets = [0, 16], sizes = [8, 8], strides = [1, 1]} : vector<8x32xf32> to vector<8x8xf32>
    %82 = tpu.transpose %80, [1, 0] : vector<8x8xf32> -> vector<8x8xf32>
    %cst_42 = arith.constant dense<0.000000e+00> : vector<8x8xf32>
    %83 = tpu.matmul %79, %82, %cst_42 {dimension_numbers = #tpu.dot_dimension_numbers<[1], [0], [0], [1], [0, 0, 1, 1], [], []>} : vector<8x8xf32>, vector<8x8xf32>, vector<8x8xf32> -> vector<8x8xf32>
    %cst_43 = arith.constant 0.353553385 : f32
    %84 = vector.broadcast %cst_43 : f32 to vector<8x8xf32>
    %85 = arith.mulf %83, %84 : vector<8x8xf32>
    %cst_44 = arith.constant -1.000000e+30 : f32
    %86 = vector.shape_cast %3 : vector<1x8xi1> to vector<1x8xi1>
    %87 = vector.broadcast %86 : vector<1x8xi1> to vector<8x8xi1>
    %88 = vector.broadcast %cst_44 : f32 to vector<8x8xf32>
    %89 = arith.select %87, %85, %88 : vector<8x8xi1>, vector<8x8xf32>
    %cst_45 = arith.constant dense<0xFF800000> : vector<8xf32>
    %90 = vector.multi_reduction <maximumf>, %89, %cst_45 [1] : vector<8x8xf32> to vector<8xf32>
    %91 = vector.shape_cast %90 : vector<8xf32> to vector<8x1xf32>
    %92 = vector.broadcast %91 : vector<8x1xf32> to vector<8x8xf32>
    %93 = arith.subf %89, %92 : vector<8x8xf32>
    %94 = math.exp %93 : vector<8x8xf32>
    %cst_46 = arith.constant dense<0.000000e+00> : vector<8xf32>
    %95 = vector.multi_reduction <add>, %94, %cst_46 [1] : vector<8x8xf32> to vector<8xf32>
    %96 = vector.shape_cast %95 : vector<8xf32> to vector<8x1xf32>
    %97 = tpu.reciprocal %96 {approx = true} : vector<8x1xf32> -> vector<8x1xf32>
    %98 = vector.broadcast %97 : vector<8x1xf32> to vector<8x8xf32>
    %99 = arith.mulf %94, %98 : vector<8x8xf32>
    %cst_47 = arith.constant dense<0.000000e+00> : vector<8x8xf32>
    %100 = tpu.matmul %99, %81, %cst_47 {dimension_numbers = #tpu.dot_dimension_numbers<[1], [0], [0], [1], [0, 0, 1, 1], [], []>} : vector<8x8xf32>, vector<8x8xf32>, vector<8x8xf32> -> vector<8x8xf32>
    %101 = vector.extract_strided_slice %32 {offsets = [0, 24], sizes = [8, 8], strides = [1, 1]} : vector<8x32xf32> to vector<8x8xf32>
    %102 = vector.extract_strided_slice %33 {offsets = [0, 24], sizes = [8, 8], strides = [1, 1]} : vector<8x32xf32> to vector<8x8xf32>
    %103 = vector.extract_strided_slice %34 {offsets = [0, 24], sizes = [8, 8], strides = [1, 1]} : vector<8x32xf32> to vector<8x8xf32>
    %104 = tpu.transpose %102, [1, 0] : vector<8x8xf32> -> vector<8x8xf32>
    %cst_48 = arith.constant dense<0.000000e+00> : vector<8x8xf32>
    %105 = tpu.matmul %101, %104, %cst_48 {dimension_numbers = #tpu.dot_dimension_numbers<[1], [0], [0], [1], [0, 0, 1, 1], [], []>} : vector<8x8xf32>, vector<8x8xf32>, vector<8x8xf32> -> vector<8x8xf32>
    %cst_49 = arith.constant 0.353553385 : f32
    %106 = vector.broadcast %cst_49 : f32 to vector<8x8xf32>
    %107 = arith.mulf %105, %106 : vector<8x8xf32>
    %cst_50 = arith.constant -1.000000e+30 : f32
    %108 = vector.shape_cast %3 : vector<1x8xi1> to vector<1x8xi1>
    %109 = vector.broadcast %108 : vector<1x8xi1> to vector<8x8xi1>
    %110 = vector.broadcast %cst_50 : f32 to vector<8x8xf32>
    %111 = arith.select %109, %107, %110 : vector<8x8xi1>, vector<8x8xf32>
    %cst_51 = arith.constant dense<0xFF800000> : vector<8xf32>
    %112 = vector.multi_reduction <maximumf>, %111, %cst_51 [1] : vector<8x8xf32> to vector<8xf32>
    %113 = vector.shape_cast %112 : vector<8xf32> to vector<8x1xf32>
    %114 = vector.broadcast %113 : vector<8x1xf32> to vector<8x8xf32>
    %115 = arith.subf %111, %114 : vector<8x8xf32>
    %116 = math.exp %115 : vector<8x8xf32>
    %cst_52 = arith.constant dense<0.000000e+00> : vector<8xf32>
    %117 = vector.multi_reduction <add>, %116, %cst_52 [1] : vector<8x8xf32> to vector<8xf32>
    %118 = vector.shape_cast %117 : vector<8xf32> to vector<8x1xf32>
    %119 = tpu.reciprocal %118 {approx = true} : vector<8x1xf32> -> vector<8x1xf32>
    %120 = vector.broadcast %119 : vector<8x1xf32> to vector<8x8xf32>
    %121 = arith.mulf %116, %120 : vector<8x8xf32>
    %cst_53 = arith.constant dense<0.000000e+00> : vector<8x8xf32>
    %122 = tpu.matmul %121, %103, %cst_53 {dimension_numbers = #tpu.dot_dimension_numbers<[1], [0], [0], [1], [0, 0, 1, 1], [], []>} : vector<8x8xf32>, vector<8x8xf32>, vector<8x8xf32> -> vector<8x8xf32>
    %123 = tpu.concatenate %56, %78, %100, %122 in 1 : vector<8x8xf32>, vector<8x8xf32>, vector<8x8xf32>, vector<8x8xf32> -> vector<8x32xf32>
    %cst_54 = arith.constant dense<0.000000e+00> : vector<8x32xf32>
    %124 = tpu.matmul %123, %26, %cst_54 {dimension_numbers = #tpu.dot_dimension_numbers<[1], [0], [0], [1], [0, 0, 1, 1], [], []>} : vector<8x32xf32>, vector<32x32xf32>, vector<8x32xf32> -> vector<8x32xf32>
    %125 = vector.broadcast %28 : vector<1x32xf32> to vector<8x32xf32>
    %126 = arith.addf %124, %125 : vector<8x32xf32>
    %127 = arith.addf %9, %126 : vector<8x32xf32>
    %cst_55 = arith.constant dense<0.000000e+00> : vector<8xf32>
    %128 = vector.multi_reduction <add>, %127, %cst_55 [1] : vector<8x32xf32> to vector<8xf32>
    %129 = vector.shape_cast %128 : vector<8xf32> to vector<8x1xf32>
    %cst_56 = arith.constant 3.200000e+01 : f32
    %130 = vector.broadcast %cst_56 : f32 to vector<8x1xf32>
    %131 = arith.divf %129, %130 : vector<8x1xf32>
    %132 = vector.broadcast %131 : vector<8x1xf32> to vector<8x32xf32>
    %133 = arith.subf %127, %132 : vector<8x32xf32>
    %134 = arith.mulf %133, %133 : vector<8x32xf32>
    %cst_57 = arith.constant dense<0.000000e+00> : vector<8xf32>
    %135 = vector.multi_reduction <add>, %134, %cst_57 [1] : vector<8x32xf32> to vector<8xf32>
    %136 = vector.shape_cast %135 : vector<8xf32> to vector<8x1xf32>
    %cst_58 = arith.constant 3.200000e+01 : f32
    %137 = vector.broadcast %cst_58 : f32 to vector<8x1xf32>
    %138 = arith.divf %136, %137 : vector<8x1xf32>
    %cst_59 = arith.constant 9.99999974E-6 : f32
    %139 = vector.broadcast %cst_59 : f32 to vector<8x1xf32>
    %140 = arith.addf %138, %139 : vector<8x1xf32>
    %141 = math.rsqrt %140 : vector<8x1xf32>
    %142 = vector.broadcast %141 : vector<8x1xf32> to vector<8x32xf32>
    %143 = arith.mulf %133, %142 : vector<8x32xf32>
    %144 = vector.broadcast %18 : vector<1x32xf32> to vector<8x32xf32>
    %145 = arith.mulf %143, %144 : vector<8x32xf32>
    %146 = vector.broadcast %20 : vector<1x32xf32> to vector<8x32xf32>
    %147 = arith.addf %145, %146 : vector<8x32xf32>
    %c0_60 = arith.constant 0 : index
    %c0_61 = arith.constant 0 : index
    %c0_62 = arith.constant 0 : index
    %148 = vector.load %arg9[%c0_60, %c0_61, %c0_62] : memref<2x32x64xf32, #tpu.memory_space<vmem>>, vector<1x32x64xf32>
    %149 = vector.shape_cast %148 : vector<1x32x64xf32> to vector<32x64xf32>
    %cst_63 = arith.constant dense<0.000000e+00> : vector<8x64xf32>
    %150 = tpu.matmul %147, %149, %cst_63 {dimension_numbers = #tpu.dot_dimension_numbers<[1], [0], [0], [1], [0, 0, 1, 1], [], []>} : vector<8x32xf32>, vector<32x64xf32>, vector<8x64xf32> -> vector<8x64xf32>
    %c0_64 = arith.constant 0 : index
    %c0_65 = arith.constant 0 : index
    %c0_66 = arith.constant 0 : index
    %151 = vector.load %arg10[%c0_64, %c0_65, %c0_66] : memref<2x1x64xf32, #tpu.memory_space<vmem>>, vector<1x1x64xf32>
    %152 = vector.shape_cast %151 : vector<1x1x64xf32> to vector<1x64xf32>
    %153 = vector.broadcast %152 : vector<1x64xf32> to vector<8x64xf32>
    %154 = arith.addf %150, %153 : vector<8x64xf32>
    %cst_67 = arith.constant 5.000000e-01 : f32
    %155 = vector.broadcast %cst_67 : f32 to vector<8x64xf32>
    %156 = arith.mulf %155, %154 : vector<8x64xf32>
    %cst_68 = arith.constant 0.707106769 : f32
    %157 = vector.broadcast %cst_68 : f32 to vector<8x64xf32>
    %158 = arith.mulf %154, %157 : vector<8x64xf32>
    %159 = math.erf %158 : vector<8x64xf32>
    %cst_69 = arith.constant 1.000000e+00 : f32
    %160 = vector.broadcast %cst_69 : f32 to vector<8x64xf32>
    %161 = arith.addf %160, %159 : vector<8x64xf32>
    %162 = arith.mulf %156, %161 : vector<8x64xf32>
    %c0_70 = arith.constant 0 : index
    %c0_71 = arith.constant 0 : index
    %c0_72 = arith.constant 0 : index
    %163 = vector.load %arg11[%c0_70, %c0_71, %c0_72] : memref<2x64x32xf32, #tpu.memory_space<vmem>>, vector<1x64x32xf32>
    %164 = vector.shape_cast %163 : vector<1x64x32xf32> to vector<64x32xf32>
    %cst_73 = arith.constant dense<0.000000e+00> : vector<8x32xf32>
    %165 = tpu.matmul %162, %164, %cst_73 {dimension_numbers = #tpu.dot_dimension_numbers<[1], [0], [0], [1], [0, 0, 1, 1], [], []>} : vector<8x64xf32>, vector<64x32xf32>, vector<8x32xf32> -> vector<8x32xf32>
    %c0_74 = arith.constant 0 : index
    %c0_75 = arith.constant 0 : index
    %c0_76 = arith.constant 0 : index
    %166 = vector.load %arg12[%c0_74, %c0_75, %c0_76] : memref<2x1x32xf32, #tpu.memory_space<vmem>>, vector<1x1x32xf32>
    %167 = vector.shape_cast %166 : vector<1x1x32xf32> to vector<1x32xf32>
    %168 = vector.broadcast %167 : vector<1x32xf32> to vector<8x32xf32>
    %169 = arith.addf %165, %168 : vector<8x32xf32>
    %170 = arith.addf %147, %169 : vector<8x32xf32>
    %cst_77 = arith.constant dense<0.000000e+00> : vector<8xf32>
    %171 = vector.multi_reduction <add>, %170, %cst_77 [1] : vector<8x32xf32> to vector<8xf32>
    %172 = vector.shape_cast %171 : vector<8xf32> to vector<8x1xf32>
    %cst_78 = arith.constant 3.200000e+01 : f32
    %173 = vector.broadcast %cst_78 : f32 to vector<8x1xf32>
    %174 = arith.divf %172, %173 : vector<8x1xf32>
    %175 = vector.broadcast %174 : vector<8x1xf32> to vector<8x32xf32>
    %176 = arith.subf %170, %175 : vector<8x32xf32>
    %177 = arith.mulf %176, %176 : vector<8x32xf32>
    %cst_79 = arith.constant dense<0.000000e+00> : vector<8xf32>
    %178 = vector.multi_reduction <add>, %177, %cst_79 [1] : vector<8x32xf32> to vector<8xf32>
    %179 = vector.shape_cast %178 : vector<8xf32> to vector<8x1xf32>
    %cst_80 = arith.constant 3.200000e+01 : f32
    %180 = vector.broadcast %cst_80 : f32 to vector<8x1xf32>
    %181 = arith.divf %179, %180 : vector<8x1xf32>
    %cst_81 = arith.constant 9.99999974E-6 : f32
    %182 = vector.broadcast %cst_81 : f32 to vector<8x1xf32>
    %183 = arith.addf %181, %182 : vector<8x1xf32>
    %184 = math.rsqrt %183 : vector<8x1xf32>
    %185 = vector.broadcast %184 : vector<8x1xf32> to vector<8x32xf32>
    %186 = arith.mulf %176, %185 : vector<8x32xf32>
    %187 = vector.broadcast %18 : vector<1x32xf32> to vector<8x32xf32>
    %188 = arith.mulf %186, %187 : vector<8x32xf32>
    %189 = vector.broadcast %20 : vector<1x32xf32> to vector<8x32xf32>
    %190 = arith.addf %188, %189 : vector<8x32xf32>
    %c1 = arith.constant 1 : index
    %c0_82 = arith.constant 0 : index
    %c0_83 = arith.constant 0 : index
    %191 = vector.load %arg13[%c1, %c0_82, %c0_83] : memref<2x1x32xf32, #tpu.memory_space<vmem>>, vector<1x1x32xf32>
    %192 = vector.shape_cast %191 : vector<1x1x32xf32> to vector<1x32xf32>
    %c1_84 = arith.constant 1 : index
    %c0_85 = arith.constant 0 : index
    %c0_86 = arith.constant 0 : index
    %193 = vector.load %arg14[%c1_84, %c0_85, %c0_86] : memref<2x1x32xf32, #tpu.memory_space<vmem>>, vector<1x1x32xf32>
    %194 = vector.shape_cast %193 : vector<1x1x32xf32> to vector<1x32xf32>
    %c1_87 = arith.constant 1 : index
    %c0_88 = arith.constant 0 : index
    %c0_89 = arith.constant 0 : index
    %195 = vector.load %arg5[%c1_87, %c0_88, %c0_89] : memref<2x32x96xf32, #tpu.memory_space<vmem>>, vector<1x32x96xf32>
    %196 = vector.shape_cast %195 : vector<1x32x96xf32> to vector<32x96xf32>
    %c1_90 = arith.constant 1 : index
    %c0_91 = arith.constant 0 : index
    %c0_92 = arith.constant 0 : index
    %197 = vector.load %arg6[%c1_90, %c0_91, %c0_92] : memref<2x1x96xf32, #tpu.memory_space<vmem>>, vector<1x1x96xf32>
    %198 = vector.shape_cast %197 : vector<1x1x96xf32> to vector<1x96xf32>
    %c1_93 = arith.constant 1 : index
    %c0_94 = arith.constant 0 : index
    %c0_95 = arith.constant 0 : index
    %199 = vector.load %arg7[%c1_93, %c0_94, %c0_95] : memref<2x32x32xf32, #tpu.memory_space<vmem>>, vector<1x32x32xf32>
    %200 = vector.shape_cast %199 : vector<1x32x32xf32> to vector<32x32xf32>
    %c1_96 = arith.constant 1 : index
    %c0_97 = arith.constant 0 : index
    %c0_98 = arith.constant 0 : index
    %201 = vector.load %arg8[%c1_96, %c0_97, %c0_98] : memref<2x1x32xf32, #tpu.memory_space<vmem>>, vector<1x1x32xf32>
    %202 = vector.shape_cast %201 : vector<1x1x32xf32> to vector<1x32xf32>
    %cst_99 = arith.constant dense<0.000000e+00> : vector<8x96xf32>
    %203 = tpu.matmul %190, %196, %cst_99 {dimension_numbers = #tpu.dot_dimension_numbers<[1], [0], [0], [1], [0, 0, 1, 1], [], []>} : vector<8x32xf32>, vector<32x96xf32>, vector<8x96xf32> -> vector<8x96xf32>
    %204 = vector.broadcast %198 : vector<1x96xf32> to vector<8x96xf32>
    %205 = arith.addf %203, %204 : vector<8x96xf32>
    %206 = vector.extract_strided_slice %205 {offsets = [0, 0], sizes = [8, 32], strides = [1, 1]} : vector<8x96xf32> to vector<8x32xf32>
    %207 = vector.extract_strided_slice %205 {offsets = [0, 32], sizes = [8, 32], strides = [1, 1]} : vector<8x96xf32> to vector<8x32xf32>
    %208 = vector.extract_strided_slice %205 {offsets = [0, 64], sizes = [8, 32], strides = [1, 1]} : vector<8x96xf32> to vector<8x32xf32>
    %209 = vector.extract_strided_slice %206 {offsets = [0, 0], sizes = [8, 8], strides = [1, 1]} : vector<8x32xf32> to vector<8x8xf32>
    %210 = vector.extract_strided_slice %207 {offsets = [0, 0], sizes = [8, 8], strides = [1, 1]} : vector<8x32xf32> to vector<8x8xf32>
    %211 = vector.extract_strided_slice %208 {offsets = [0, 0], sizes = [8, 8], strides = [1, 1]} : vector<8x32xf32> to vector<8x8xf32>
    %212 = tpu.transpose %210, [1, 0] : vector<8x8xf32> -> vector<8x8xf32>
    %cst_100 = arith.constant dense<0.000000e+00> : vector<8x8xf32>
    %213 = tpu.matmul %209, %212, %cst_100 {dimension_numbers = #tpu.dot_dimension_numbers<[1], [0], [0], [1], [0, 0, 1, 1], [], []>} : vector<8x8xf32>, vector<8x8xf32>, vector<8x8xf32> -> vector<8x8xf32>
    %cst_101 = arith.constant 0.353553385 : f32
    %214 = vector.broadcast %cst_101 : f32 to vector<8x8xf32>
    %215 = arith.mulf %213, %214 : vector<8x8xf32>
    %cst_102 = arith.constant -1.000000e+30 : f32
    %216 = vector.shape_cast %3 : vector<1x8xi1> to vector<1x8xi1>
    %217 = vector.broadcast %216 : vector<1x8xi1> to vector<8x8xi1>
    %218 = vector.broadcast %cst_102 : f32 to vector<8x8xf32>
    %219 = arith.select %217, %215, %218 : vector<8x8xi1>, vector<8x8xf32>
    %cst_103 = arith.constant dense<0xFF800000> : vector<8xf32>
    %220 = vector.multi_reduction <maximumf>, %219, %cst_103 [1] : vector<8x8xf32> to vector<8xf32>
    %221 = vector.shape_cast %220 : vector<8xf32> to vector<8x1xf32>
    %222 = vector.broadcast %221 : vector<8x1xf32> to vector<8x8xf32>
    %223 = arith.subf %219, %222 : vector<8x8xf32>
    %224 = math.exp %223 : vector<8x8xf32>
    %cst_104 = arith.constant dense<0.000000e+00> : vector<8xf32>
    %225 = vector.multi_reduction <add>, %224, %cst_104 [1] : vector<8x8xf32> to vector<8xf32>
    %226 = vector.shape_cast %225 : vector<8xf32> to vector<8x1xf32>
    %227 = tpu.reciprocal %226 {approx = true} : vector<8x1xf32> -> vector<8x1xf32>
    %228 = vector.broadcast %227 : vector<8x1xf32> to vector<8x8xf32>
    %229 = arith.mulf %224, %228 : vector<8x8xf32>
    %cst_105 = arith.constant dense<0.000000e+00> : vector<8x8xf32>
    %230 = tpu.matmul %229, %211, %cst_105 {dimension_numbers = #tpu.dot_dimension_numbers<[1], [0], [0], [1], [0, 0, 1, 1], [], []>} : vector<8x8xf32>, vector<8x8xf32>, vector<8x8xf32> -> vector<8x8xf32>
    %231 = vector.extract_strided_slice %206 {offsets = [0, 8], sizes = [8, 8], strides = [1, 1]} : vector<8x32xf32> to vector<8x8xf32>
    %232 = vector.extract_strided_slice %207 {offsets = [0, 8], sizes = [8, 8], strides = [1, 1]} : vector<8x32xf32> to vector<8x8xf32>
    %233 = vector.extract_strided_slice %208 {offsets = [0, 8], sizes = [8, 8], strides = [1, 1]} : vector<8x32xf32> to vector<8x8xf32>
    %234 = tpu.transpose %232, [1, 0] : vector<8x8xf32> -> vector<8x8xf32>
    %cst_106 = arith.constant dense<0.000000e+00> : vector<8x8xf32>
    %235 = tpu.matmul %231, %234, %cst_106 {dimension_numbers = #tpu.dot_dimension_numbers<[1], [0], [0], [1], [0, 0, 1, 1], [], []>} : vector<8x8xf32>, vector<8x8xf32>, vector<8x8xf32> -> vector<8x8xf32>
    %cst_107 = arith.constant 0.353553385 : f32
    %236 = vector.broadcast %cst_107 : f32 to vector<8x8xf32>
    %237 = arith.mulf %235, %236 : vector<8x8xf32>
    %cst_108 = arith.constant -1.000000e+30 : f32
    %238 = vector.shape_cast %3 : vector<1x8xi1> to vector<1x8xi1>
    %239 = vector.broadcast %238 : vector<1x8xi1> to vector<8x8xi1>
    %240 = vector.broadcast %cst_108 : f32 to vector<8x8xf32>
    %241 = arith.select %239, %237, %240 : vector<8x8xi1>, vector<8x8xf32>
    %cst_109 = arith.constant dense<0xFF800000> : vector<8xf32>
    %242 = vector.multi_reduction <maximumf>, %241, %cst_109 [1] : vector<8x8xf32> to vector<8xf32>
    %243 = vector.shape_cast %242 : vector<8xf32> to vector<8x1xf32>
    %244 = vector.broadcast %243 : vector<8x1xf32> to vector<8x8xf32>
    %245 = arith.subf %241, %244 : vector<8x8xf32>
    %246 = math.exp %245 : vector<8x8xf32>
    %cst_110 = arith.constant dense<0.000000e+00> : vector<8xf32>
    %247 = vector.multi_reduction <add>, %246, %cst_110 [1] : vector<8x8xf32> to vector<8xf32>
    %248 = vector.shape_cast %247 : vector<8xf32> to vector<8x1xf32>
    %249 = tpu.reciprocal %248 {approx = true} : vector<8x1xf32> -> vector<8x1xf32>
    %250 = vector.broadcast %249 : vector<8x1xf32> to vector<8x8xf32>
    %251 = arith.mulf %246, %250 : vector<8x8xf32>
    %cst_111 = arith.constant dense<0.000000e+00> : vector<8x8xf32>
    %252 = tpu.matmul %251, %233, %cst_111 {dimension_numbers = #tpu.dot_dimension_numbers<[1], [0], [0], [1], [0, 0, 1, 1], [], []>} : vector<8x8xf32>, vector<8x8xf32>, vector<8x8xf32> -> vector<8x8xf32>
    %253 = vector.extract_strided_slice %206 {offsets = [0, 16], sizes = [8, 8], strides = [1, 1]} : vector<8x32xf32> to vector<8x8xf32>
    %254 = vector.extract_strided_slice %207 {offsets = [0, 16], sizes = [8, 8], strides = [1, 1]} : vector<8x32xf32> to vector<8x8xf32>
    %255 = vector.extract_strided_slice %208 {offsets = [0, 16], sizes = [8, 8], strides = [1, 1]} : vector<8x32xf32> to vector<8x8xf32>
    %256 = tpu.transpose %254, [1, 0] : vector<8x8xf32> -> vector<8x8xf32>
    %cst_112 = arith.constant dense<0.000000e+00> : vector<8x8xf32>
    %257 = tpu.matmul %253, %256, %cst_112 {dimension_numbers = #tpu.dot_dimension_numbers<[1], [0], [0], [1], [0, 0, 1, 1], [], []>} : vector<8x8xf32>, vector<8x8xf32>, vector<8x8xf32> -> vector<8x8xf32>
    %cst_113 = arith.constant 0.353553385 : f32
    %258 = vector.broadcast %cst_113 : f32 to vector<8x8xf32>
    %259 = arith.mulf %257, %258 : vector<8x8xf32>
    %cst_114 = arith.constant -1.000000e+30 : f32
    %260 = vector.shape_cast %3 : vector<1x8xi1> to vector<1x8xi1>
    %261 = vector.broadcast %260 : vector<1x8xi1> to vector<8x8xi1>
    %262 = vector.broadcast %cst_114 : f32 to vector<8x8xf32>
    %263 = arith.select %261, %259, %262 : vector<8x8xi1>, vector<8x8xf32>
    %cst_115 = arith.constant dense<0xFF800000> : vector<8xf32>
    %264 = vector.multi_reduction <maximumf>, %263, %cst_115 [1] : vector<8x8xf32> to vector<8xf32>
    %265 = vector.shape_cast %264 : vector<8xf32> to vector<8x1xf32>
    %266 = vector.broadcast %265 : vector<8x1xf32> to vector<8x8xf32>
    %267 = arith.subf %263, %266 : vector<8x8xf32>
    %268 = math.exp %267 : vector<8x8xf32>
    %cst_116 = arith.constant dense<0.000000e+00> : vector<8xf32>
    %269 = vector.multi_reduction <add>, %268, %cst_116 [1] : vector<8x8xf32> to vector<8xf32>
    %270 = vector.shape_cast %269 : vector<8xf32> to vector<8x1xf32>
    %271 = tpu.reciprocal %270 {approx = true} : vector<8x1xf32> -> vector<8x1xf32>
    %272 = vector.broadcast %271 : vector<8x1xf32> to vector<8x8xf32>
    %273 = arith.mulf %268, %272 : vector<8x8xf32>
    %cst_117 = arith.constant dense<0.000000e+00> : vector<8x8xf32>
    %274 = tpu.matmul %273, %255, %cst_117 {dimension_numbers = #tpu.dot_dimension_numbers<[1], [0], [0], [1], [0, 0, 1, 1], [], []>} : vector<8x8xf32>, vector<8x8xf32>, vector<8x8xf32> -> vector<8x8xf32>
    %275 = vector.extract_strided_slice %206 {offsets = [0, 24], sizes = [8, 8], strides = [1, 1]} : vector<8x32xf32> to vector<8x8xf32>
    %276 = vector.extract_strided_slice %207 {offsets = [0, 24], sizes = [8, 8], strides = [1, 1]} : vector<8x32xf32> to vector<8x8xf32>
    %277 = vector.extract_strided_slice %208 {offsets = [0, 24], sizes = [8, 8], strides = [1, 1]} : vector<8x32xf32> to vector<8x8xf32>
    %278 = tpu.transpose %276, [1, 0] : vector<8x8xf32> -> vector<8x8xf32>
    %cst_118 = arith.constant dense<0.000000e+00> : vector<8x8xf32>
    %279 = tpu.matmul %275, %278, %cst_118 {dimension_numbers = #tpu.dot_dimension_numbers<[1], [0], [0], [1], [0, 0, 1, 1], [], []>} : vector<8x8xf32>, vector<8x8xf32>, vector<8x8xf32> -> vector<8x8xf32>
    %cst_119 = arith.constant 0.353553385 : f32
    %280 = vector.broadcast %cst_119 : f32 to vector<8x8xf32>
    %281 = arith.mulf %279, %280 : vector<8x8xf32>
    %cst_120 = arith.constant -1.000000e+30 : f32
    %282 = vector.shape_cast %3 : vector<1x8xi1> to vector<1x8xi1>
    %283 = vector.broadcast %282 : vector<1x8xi1> to vector<8x8xi1>
    %284 = vector.broadcast %cst_120 : f32 to vector<8x8xf32>
    %285 = arith.select %283, %281, %284 : vector<8x8xi1>, vector<8x8xf32>
    %cst_121 = arith.constant dense<0xFF800000> : vector<8xf32>
    %286 = vector.multi_reduction <maximumf>, %285, %cst_121 [1] : vector<8x8xf32> to vector<8xf32>
    %287 = vector.shape_cast %286 : vector<8xf32> to vector<8x1xf32>
    %288 = vector.broadcast %287 : vector<8x1xf32> to vector<8x8xf32>
    %289 = arith.subf %285, %288 : vector<8x8xf32>
    %290 = math.exp %289 : vector<8x8xf32>
    %cst_122 = arith.constant dense<0.000000e+00> : vector<8xf32>
    %291 = vector.multi_reduction <add>, %290, %cst_122 [1] : vector<8x8xf32> to vector<8xf32>
    %292 = vector.shape_cast %291 : vector<8xf32> to vector<8x1xf32>
    %293 = tpu.reciprocal %292 {approx = true} : vector<8x1xf32> -> vector<8x1xf32>
    %294 = vector.broadcast %293 : vector<8x1xf32> to vector<8x8xf32>
    %295 = arith.mulf %290, %294 : vector<8x8xf32>
    %cst_123 = arith.constant dense<0.000000e+00> : vector<8x8xf32>
    %296 = tpu.matmul %295, %277, %cst_123 {dimension_numbers = #tpu.dot_dimension_numbers<[1], [0], [0], [1], [0, 0, 1, 1], [], []>} : vector<8x8xf32>, vector<8x8xf32>, vector<8x8xf32> -> vector<8x8xf32>
    %297 = tpu.concatenate %230, %252, %274, %296 in 1 : vector<8x8xf32>, vector<8x8xf32>, vector<8x8xf32>, vector<8x8xf32> -> vector<8x32xf32>
    %cst_124 = arith.constant dense<0.000000e+00> : vector<8x32xf32>
    %298 = tpu.matmul %297, %200, %cst_124 {dimension_numbers = #tpu.dot_dimension_numbers<[1], [0], [0], [1], [0, 0, 1, 1], [], []>} : vector<8x32xf32>, vector<32x32xf32>, vector<8x32xf32> -> vector<8x32xf32>
    %299 = vector.broadcast %202 : vector<1x32xf32> to vector<8x32xf32>
    %300 = arith.addf %298, %299 : vector<8x32xf32>
    %301 = arith.addf %190, %300 : vector<8x32xf32>
    %cst_125 = arith.constant dense<0.000000e+00> : vector<8xf32>
    %302 = vector.multi_reduction <add>, %301, %cst_125 [1] : vector<8x32xf32> to vector<8xf32>
    %303 = vector.shape_cast %302 : vector<8xf32> to vector<8x1xf32>
    %cst_126 = arith.constant 3.200000e+01 : f32
    %304 = vector.broadcast %cst_126 : f32 to vector<8x1xf32>
    %305 = arith.divf %303, %304 : vector<8x1xf32>
    %306 = vector.broadcast %305 : vector<8x1xf32> to vector<8x32xf32>
    %307 = arith.subf %301, %306 : vector<8x32xf32>
    %308 = arith.mulf %307, %307 : vector<8x32xf32>
    %cst_127 = arith.constant dense<0.000000e+00> : vector<8xf32>
    %309 = vector.multi_reduction <add>, %308, %cst_127 [1] : vector<8x32xf32> to vector<8xf32>
    %310 = vector.shape_cast %309 : vector<8xf32> to vector<8x1xf32>
    %cst_128 = arith.constant 3.200000e+01 : f32
    %311 = vector.broadcast %cst_128 : f32 to vector<8x1xf32>
    %312 = arith.divf %310, %311 : vector<8x1xf32>
    %cst_129 = arith.constant 9.99999974E-6 : f32
    %313 = vector.broadcast %cst_129 : f32 to vector<8x1xf32>
    %314 = arith.addf %312, %313 : vector<8x1xf32>
    %315 = math.rsqrt %314 : vector<8x1xf32>
    %316 = vector.broadcast %315 : vector<8x1xf32> to vector<8x32xf32>
    %317 = arith.mulf %307, %316 : vector<8x32xf32>
    %318 = vector.broadcast %192 : vector<1x32xf32> to vector<8x32xf32>
    %319 = arith.mulf %317, %318 : vector<8x32xf32>
    %320 = vector.broadcast %194 : vector<1x32xf32> to vector<8x32xf32>
    %321 = arith.addf %319, %320 : vector<8x32xf32>
    %c1_130 = arith.constant 1 : index
    %c0_131 = arith.constant 0 : index
    %c0_132 = arith.constant 0 : index
    %322 = vector.load %arg9[%c1_130, %c0_131, %c0_132] : memref<2x32x64xf32, #tpu.memory_space<vmem>>, vector<1x32x64xf32>
    %323 = vector.shape_cast %322 : vector<1x32x64xf32> to vector<32x64xf32>
    %cst_133 = arith.constant dense<0.000000e+00> : vector<8x64xf32>
    %324 = tpu.matmul %321, %323, %cst_133 {dimension_numbers = #tpu.dot_dimension_numbers<[1], [0], [0], [1], [0, 0, 1, 1], [], []>} : vector<8x32xf32>, vector<32x64xf32>, vector<8x64xf32> -> vector<8x64xf32>
    %c1_134 = arith.constant 1 : index
    %c0_135 = arith.constant 0 : index
    %c0_136 = arith.constant 0 : index
    %325 = vector.load %arg10[%c1_134, %c0_135, %c0_136] : memref<2x1x64xf32, #tpu.memory_space<vmem>>, vector<1x1x64xf32>
    %326 = vector.shape_cast %325 : vector<1x1x64xf32> to vector<1x64xf32>
    %327 = vector.broadcast %326 : vector<1x64xf32> to vector<8x64xf32>
    %328 = arith.addf %324, %327 : vector<8x64xf32>
    %cst_137 = arith.constant 5.000000e-01 : f32
    %329 = vector.broadcast %cst_137 : f32 to vector<8x64xf32>
    %330 = arith.mulf %329, %328 : vector<8x64xf32>
    %cst_138 = arith.constant 0.707106769 : f32
    %331 = vector.broadcast %cst_138 : f32 to vector<8x64xf32>
    %332 = arith.mulf %328, %331 : vector<8x64xf32>
    %333 = math.erf %332 : vector<8x64xf32>
    %cst_139 = arith.constant 1.000000e+00 : f32
    %334 = vector.broadcast %cst_139 : f32 to vector<8x64xf32>
    %335 = arith.addf %334, %333 : vector<8x64xf32>
    %336 = arith.mulf %330, %335 : vector<8x64xf32>
    %c1_140 = arith.constant 1 : index
    %c0_141 = arith.constant 0 : index
    %c0_142 = arith.constant 0 : index
    %337 = vector.load %arg11[%c1_140, %c0_141, %c0_142] : memref<2x64x32xf32, #tpu.memory_space<vmem>>, vector<1x64x32xf32>
    %338 = vector.shape_cast %337 : vector<1x64x32xf32> to vector<64x32xf32>
    %cst_143 = arith.constant dense<0.000000e+00> : vector<8x32xf32>
    %339 = tpu.matmul %336, %338, %cst_143 {dimension_numbers = #tpu.dot_dimension_numbers<[1], [0], [0], [1], [0, 0, 1, 1], [], []>} : vector<8x64xf32>, vector<64x32xf32>, vector<8x32xf32> -> vector<8x32xf32>
    %c1_144 = arith.constant 1 : index
    %c0_145 = arith.constant 0 : index
    %c0_146 = arith.constant 0 : index
    %340 = vector.load %arg12[%c1_144, %c0_145, %c0_146] : memref<2x1x32xf32, #tpu.memory_space<vmem>>, vector<1x1x32xf32>
    %341 = vector.shape_cast %340 : vector<1x1x32xf32> to vector<1x32xf32>
    %342 = vector.broadcast %341 : vector<1x32xf32> to vector<8x32xf32>
    %343 = arith.addf %339, %342 : vector<8x32xf32>
    %344 = arith.addf %321, %343 : vector<8x32xf32>
    %cst_147 = arith.constant dense<0.000000e+00> : vector<8xf32>
    %345 = vector.multi_reduction <add>, %344, %cst_147 [1] : vector<8x32xf32> to vector<8xf32>
    %346 = vector.shape_cast %345 : vector<8xf32> to vector<8x1xf32>
    %cst_148 = arith.constant 3.200000e+01 : f32
    %347 = vector.broadcast %cst_148 : f32 to vector<8x1xf32>
    %348 = arith.divf %346, %347 : vector<8x1xf32>
    %349 = vector.broadcast %348 : vector<8x1xf32> to vector<8x32xf32>
    %350 = arith.subf %344, %349 : vector<8x32xf32>
    %351 = arith.mulf %350, %350 : vector<8x32xf32>
    %cst_149 = arith.constant dense<0.000000e+00> : vector<8xf32>
    %352 = vector.multi_reduction <add>, %351, %cst_149 [1] : vector<8x32xf32> to vector<8xf32>
    %353 = vector.shape_cast %352 : vector<8xf32> to vector<8x1xf32>
    %cst_150 = arith.constant 3.200000e+01 : f32
    %354 = vector.broadcast %cst_150 : f32 to vector<8x1xf32>
    %355 = arith.divf %353, %354 : vector<8x1xf32>
    %cst_151 = arith.constant 9.99999974E-6 : f32
    %356 = vector.broadcast %cst_151 : f32 to vector<8x1xf32>
    %357 = arith.addf %355, %356 : vector<8x1xf32>
    %358 = math.rsqrt %357 : vector<8x1xf32>
    %359 = vector.broadcast %358 : vector<8x1xf32> to vector<8x32xf32>
    %360 = arith.mulf %350, %359 : vector<8x32xf32>
    %361 = vector.broadcast %192 : vector<1x32xf32> to vector<8x32xf32>
    %362 = arith.mulf %360, %361 : vector<8x32xf32>
    %363 = vector.broadcast %194 : vector<1x32xf32> to vector<8x32xf32>
    %364 = arith.addf %362, %363 : vector<8x32xf32>
    %c0_152 = arith.constant 0 : index
    %c0_153 = arith.constant 0 : index
    %c0_154 = arith.constant 0 : index
    %365 = vector.load %arg29[%c0_152, %c0_153, %c0_154] : memref<2x1x32xf32, #tpu.memory_space<vmem>>, vector<1x1x32xf32>
    %366 = vector.shape_cast %365 : vector<1x1x32xf32> to vector<1x32xf32>
    %c0_155 = arith.constant 0 : index
    %c0_156 = arith.constant 0 : index
    %c0_157 = arith.constant 0 : index
    %367 = vector.load %arg30[%c0_155, %c0_156, %c0_157] : memref<2x1x32xf32, #tpu.memory_space<vmem>>, vector<1x1x32xf32>
    %368 = vector.shape_cast %367 : vector<1x1x32xf32> to vector<1x32xf32>
    %c0_158 = arith.constant 0 : index
    %c0_159 = arith.constant 0 : index
    %c0_160 = arith.constant 0 : index
    %369 = vector.load %arg15[%c0_158, %c0_159, %c0_160] : memref<2x32x96xf32, #tpu.memory_space<vmem>>, vector<1x32x96xf32>
    %370 = vector.shape_cast %369 : vector<1x32x96xf32> to vector<32x96xf32>
    %c0_161 = arith.constant 0 : index
    %c0_162 = arith.constant 0 : index
    %c0_163 = arith.constant 0 : index
    %371 = vector.load %arg16[%c0_161, %c0_162, %c0_163] : memref<2x1x96xf32, #tpu.memory_space<vmem>>, vector<1x1x96xf32>
    %372 = vector.shape_cast %371 : vector<1x1x96xf32> to vector<1x96xf32>
    %c0_164 = arith.constant 0 : index
    %c0_165 = arith.constant 0 : index
    %c0_166 = arith.constant 0 : index
    %373 = vector.load %arg17[%c0_164, %c0_165, %c0_166] : memref<2x32x32xf32, #tpu.memory_space<vmem>>, vector<1x32x32xf32>
    %374 = vector.shape_cast %373 : vector<1x32x32xf32> to vector<32x32xf32>
    %c0_167 = arith.constant 0 : index
    %c0_168 = arith.constant 0 : index
    %c0_169 = arith.constant 0 : index
    %375 = vector.load %arg18[%c0_167, %c0_168, %c0_169] : memref<2x1x32xf32, #tpu.memory_space<vmem>>, vector<1x1x32xf32>
    %376 = vector.shape_cast %375 : vector<1x1x32xf32> to vector<1x32xf32>
    %cst_170 = arith.constant dense<0.000000e+00> : vector<8x96xf32>
    %377 = tpu.matmul %11, %370, %cst_170 {dimension_numbers = #tpu.dot_dimension_numbers<[1], [0], [0], [1], [0, 0, 1, 1], [], []>} : vector<8x32xf32>, vector<32x96xf32>, vector<8x96xf32> -> vector<8x96xf32>
    %378 = vector.broadcast %372 : vector<1x96xf32> to vector<8x96xf32>
    %379 = arith.addf %377, %378 : vector<8x96xf32>
    %380 = vector.extract_strided_slice %379 {offsets = [0, 0], sizes = [8, 32], strides = [1, 1]} : vector<8x96xf32> to vector<8x32xf32>
    %381 = vector.extract_strided_slice %379 {offsets = [0, 32], sizes = [8, 32], strides = [1, 1]} : vector<8x96xf32> to vector<8x32xf32>
    %382 = vector.extract_strided_slice %379 {offsets = [0, 64], sizes = [8, 32], strides = [1, 1]} : vector<8x96xf32> to vector<8x32xf32>
    %383 = vector.extract_strided_slice %380 {offsets = [0, 0], sizes = [8, 8], strides = [1, 1]} : vector<8x32xf32> to vector<8x8xf32>
    %384 = vector.extract_strided_slice %381 {offsets = [0, 0], sizes = [8, 8], strides = [1, 1]} : vector<8x32xf32> to vector<8x8xf32>
    %385 = vector.extract_strided_slice %382 {offsets = [0, 0], sizes = [8, 8], strides = [1, 1]} : vector<8x32xf32> to vector<8x8xf32>
    %386 = tpu.transpose %384, [1, 0] : vector<8x8xf32> -> vector<8x8xf32>
    %cst_171 = arith.constant dense<0.000000e+00> : vector<8x8xf32>
    %387 = tpu.matmul %383, %386, %cst_171 {dimension_numbers = #tpu.dot_dimension_numbers<[1], [0], [0], [1], [0, 0, 1, 1], [], []>} : vector<8x8xf32>, vector<8x8xf32>, vector<8x8xf32> -> vector<8x8xf32>
    %cst_172 = arith.constant 0.353553385 : f32
    %388 = vector.broadcast %cst_172 : f32 to vector<8x8xf32>
    %389 = arith.mulf %387, %388 : vector<8x8xf32>
    %cst_173 = arith.constant -1.000000e+30 : f32
    %390 = vector.broadcast %cst_173 : f32 to vector<8x8xf32>
    %391 = arith.select %16, %389, %390 : vector<8x8xi1>, vector<8x8xf32>
    %cst_174 = arith.constant dense<0xFF800000> : vector<8xf32>
    %392 = vector.multi_reduction <maximumf>, %391, %cst_174 [1] : vector<8x8xf32> to vector<8xf32>
    %393 = vector.shape_cast %392 : vector<8xf32> to vector<8x1xf32>
    %394 = vector.broadcast %393 : vector<8x1xf32> to vector<8x8xf32>
    %395 = arith.subf %391, %394 : vector<8x8xf32>
    %396 = math.exp %395 : vector<8x8xf32>
    %cst_175 = arith.constant dense<0.000000e+00> : vector<8xf32>
    %397 = vector.multi_reduction <add>, %396, %cst_175 [1] : vector<8x8xf32> to vector<8xf32>
    %398 = vector.shape_cast %397 : vector<8xf32> to vector<8x1xf32>
    %399 = tpu.reciprocal %398 {approx = true} : vector<8x1xf32> -> vector<8x1xf32>
    %400 = vector.broadcast %399 : vector<8x1xf32> to vector<8x8xf32>
    %401 = arith.mulf %396, %400 : vector<8x8xf32>
    %cst_176 = arith.constant dense<0.000000e+00> : vector<8x8xf32>
    %402 = tpu.matmul %401, %385, %cst_176 {dimension_numbers = #tpu.dot_dimension_numbers<[1], [0], [0], [1], [0, 0, 1, 1], [], []>} : vector<8x8xf32>, vector<8x8xf32>, vector<8x8xf32> -> vector<8x8xf32>
    %403 = vector.extract_strided_slice %380 {offsets = [0, 8], sizes = [8, 8], strides = [1, 1]} : vector<8x32xf32> to vector<8x8xf32>
    %404 = vector.extract_strided_slice %381 {offsets = [0, 8], sizes = [8, 8], strides = [1, 1]} : vector<8x32xf32> to vector<8x8xf32>
    %405 = vector.extract_strided_slice %382 {offsets = [0, 8], sizes = [8, 8], strides = [1, 1]} : vector<8x32xf32> to vector<8x8xf32>
    %406 = tpu.transpose %404, [1, 0] : vector<8x8xf32> -> vector<8x8xf32>
    %cst_177 = arith.constant dense<0.000000e+00> : vector<8x8xf32>
    %407 = tpu.matmul %403, %406, %cst_177 {dimension_numbers = #tpu.dot_dimension_numbers<[1], [0], [0], [1], [0, 0, 1, 1], [], []>} : vector<8x8xf32>, vector<8x8xf32>, vector<8x8xf32> -> vector<8x8xf32>
    %cst_178 = arith.constant 0.353553385 : f32
    %408 = vector.broadcast %cst_178 : f32 to vector<8x8xf32>
    %409 = arith.mulf %407, %408 : vector<8x8xf32>
    %cst_179 = arith.constant -1.000000e+30 : f32
    %410 = vector.broadcast %cst_179 : f32 to vector<8x8xf32>
    %411 = arith.select %16, %409, %410 : vector<8x8xi1>, vector<8x8xf32>
    %cst_180 = arith.constant dense<0xFF800000> : vector<8xf32>
    %412 = vector.multi_reduction <maximumf>, %411, %cst_180 [1] : vector<8x8xf32> to vector<8xf32>
    %413 = vector.shape_cast %412 : vector<8xf32> to vector<8x1xf32>
    %414 = vector.broadcast %413 : vector<8x1xf32> to vector<8x8xf32>
    %415 = arith.subf %411, %414 : vector<8x8xf32>
    %416 = math.exp %415 : vector<8x8xf32>
    %cst_181 = arith.constant dense<0.000000e+00> : vector<8xf32>
    %417 = vector.multi_reduction <add>, %416, %cst_181 [1] : vector<8x8xf32> to vector<8xf32>
    %418 = vector.shape_cast %417 : vector<8xf32> to vector<8x1xf32>
    %419 = tpu.reciprocal %418 {approx = true} : vector<8x1xf32> -> vector<8x1xf32>
    %420 = vector.broadcast %419 : vector<8x1xf32> to vector<8x8xf32>
    %421 = arith.mulf %416, %420 : vector<8x8xf32>
    %cst_182 = arith.constant dense<0.000000e+00> : vector<8x8xf32>
    %422 = tpu.matmul %421, %405, %cst_182 {dimension_numbers = #tpu.dot_dimension_numbers<[1], [0], [0], [1], [0, 0, 1, 1], [], []>} : vector<8x8xf32>, vector<8x8xf32>, vector<8x8xf32> -> vector<8x8xf32>
    %423 = vector.extract_strided_slice %380 {offsets = [0, 16], sizes = [8, 8], strides = [1, 1]} : vector<8x32xf32> to vector<8x8xf32>
    %424 = vector.extract_strided_slice %381 {offsets = [0, 16], sizes = [8, 8], strides = [1, 1]} : vector<8x32xf32> to vector<8x8xf32>
    %425 = vector.extract_strided_slice %382 {offsets = [0, 16], sizes = [8, 8], strides = [1, 1]} : vector<8x32xf32> to vector<8x8xf32>
    %426 = tpu.transpose %424, [1, 0] : vector<8x8xf32> -> vector<8x8xf32>
    %cst_183 = arith.constant dense<0.000000e+00> : vector<8x8xf32>
    %427 = tpu.matmul %423, %426, %cst_183 {dimension_numbers = #tpu.dot_dimension_numbers<[1], [0], [0], [1], [0, 0, 1, 1], [], []>} : vector<8x8xf32>, vector<8x8xf32>, vector<8x8xf32> -> vector<8x8xf32>
    %cst_184 = arith.constant 0.353553385 : f32
    %428 = vector.broadcast %cst_184 : f32 to vector<8x8xf32>
    %429 = arith.mulf %427, %428 : vector<8x8xf32>
    %cst_185 = arith.constant -1.000000e+30 : f32
    %430 = vector.broadcast %cst_185 : f32 to vector<8x8xf32>
    %431 = arith.select %16, %429, %430 : vector<8x8xi1>, vector<8x8xf32>
    %cst_186 = arith.constant dense<0xFF800000> : vector<8xf32>
    %432 = vector.multi_reduction <maximumf>, %431, %cst_186 [1] : vector<8x8xf32> to vector<8xf32>
    %433 = vector.shape_cast %432 : vector<8xf32> to vector<8x1xf32>
    %434 = vector.broadcast %433 : vector<8x1xf32> to vector<8x8xf32>
    %435 = arith.subf %431, %434 : vector<8x8xf32>
    %436 = math.exp %435 : vector<8x8xf32>
    %cst_187 = arith.constant dense<0.000000e+00> : vector<8xf32>
    %437 = vector.multi_reduction <add>, %436, %cst_187 [1] : vector<8x8xf32> to vector<8xf32>
    %438 = vector.shape_cast %437 : vector<8xf32> to vector<8x1xf32>
    %439 = tpu.reciprocal %438 {approx = true} : vector<8x1xf32> -> vector<8x1xf32>
    %440 = vector.broadcast %439 : vector<8x1xf32> to vector<8x8xf32>
    %441 = arith.mulf %436, %440 : vector<8x8xf32>
    %cst_188 = arith.constant dense<0.000000e+00> : vector<8x8xf32>
    %442 = tpu.matmul %441, %425, %cst_188 {dimension_numbers = #tpu.dot_dimension_numbers<[1], [0], [0], [1], [0, 0, 1, 1], [], []>} : vector<8x8xf32>, vector<8x8xf32>, vector<8x8xf32> -> vector<8x8xf32>
    %443 = vector.extract_strided_slice %380 {offsets = [0, 24], sizes = [8, 8], strides = [1, 1]} : vector<8x32xf32> to vector<8x8xf32>
    %444 = vector.extract_strided_slice %381 {offsets = [0, 24], sizes = [8, 8], strides = [1, 1]} : vector<8x32xf32> to vector<8x8xf32>
    %445 = vector.extract_strided_slice %382 {offsets = [0, 24], sizes = [8, 8], strides = [1, 1]} : vector<8x32xf32> to vector<8x8xf32>
    %446 = tpu.transpose %444, [1, 0] : vector<8x8xf32> -> vector<8x8xf32>
    %cst_189 = arith.constant dense<0.000000e+00> : vector<8x8xf32>
    %447 = tpu.matmul %443, %446, %cst_189 {dimension_numbers = #tpu.dot_dimension_numbers<[1], [0], [0], [1], [0, 0, 1, 1], [], []>} : vector<8x8xf32>, vector<8x8xf32>, vector<8x8xf32> -> vector<8x8xf32>
    %cst_190 = arith.constant 0.353553385 : f32
    %448 = vector.broadcast %cst_190 : f32 to vector<8x8xf32>
    %449 = arith.mulf %447, %448 : vector<8x8xf32>
    %cst_191 = arith.constant -1.000000e+30 : f32
    %450 = vector.broadcast %cst_191 : f32 to vector<8x8xf32>
    %451 = arith.select %16, %449, %450 : vector<8x8xi1>, vector<8x8xf32>
    %cst_192 = arith.constant dense<0xFF800000> : vector<8xf32>
    %452 = vector.multi_reduction <maximumf>, %451, %cst_192 [1] : vector<8x8xf32> to vector<8xf32>
    %453 = vector.shape_cast %452 : vector<8xf32> to vector<8x1xf32>
    %454 = vector.broadcast %453 : vector<8x1xf32> to vector<8x8xf32>
    %455 = arith.subf %451, %454 : vector<8x8xf32>
    %456 = math.exp %455 : vector<8x8xf32>
    %cst_193 = arith.constant dense<0.000000e+00> : vector<8xf32>
    %457 = vector.multi_reduction <add>, %456, %cst_193 [1] : vector<8x8xf32> to vector<8xf32>
    %458 = vector.shape_cast %457 : vector<8xf32> to vector<8x1xf32>
    %459 = tpu.reciprocal %458 {approx = true} : vector<8x1xf32> -> vector<8x1xf32>
    %460 = vector.broadcast %459 : vector<8x1xf32> to vector<8x8xf32>
    %461 = arith.mulf %456, %460 : vector<8x8xf32>
    %cst_194 = arith.constant dense<0.000000e+00> : vector<8x8xf32>
    %462 = tpu.matmul %461, %445, %cst_194 {dimension_numbers = #tpu.dot_dimension_numbers<[1], [0], [0], [1], [0, 0, 1, 1], [], []>} : vector<8x8xf32>, vector<8x8xf32>, vector<8x8xf32> -> vector<8x8xf32>
    %463 = tpu.concatenate %402, %422, %442, %462 in 1 : vector<8x8xf32>, vector<8x8xf32>, vector<8x8xf32>, vector<8x8xf32> -> vector<8x32xf32>
    %cst_195 = arith.constant dense<0.000000e+00> : vector<8x32xf32>
    %464 = tpu.matmul %463, %374, %cst_195 {dimension_numbers = #tpu.dot_dimension_numbers<[1], [0], [0], [1], [0, 0, 1, 1], [], []>} : vector<8x32xf32>, vector<32x32xf32>, vector<8x32xf32> -> vector<8x32xf32>
    %465 = vector.broadcast %376 : vector<1x32xf32> to vector<8x32xf32>
    %466 = arith.addf %464, %465 : vector<8x32xf32>
    %467 = arith.addf %11, %466 : vector<8x32xf32>
    %cst_196 = arith.constant dense<0.000000e+00> : vector<8xf32>
    %468 = vector.multi_reduction <add>, %467, %cst_196 [1] : vector<8x32xf32> to vector<8xf32>
    %469 = vector.shape_cast %468 : vector<8xf32> to vector<8x1xf32>
    %cst_197 = arith.constant 3.200000e+01 : f32
    %470 = vector.broadcast %cst_197 : f32 to vector<8x1xf32>
    %471 = arith.divf %469, %470 : vector<8x1xf32>
    %472 = vector.broadcast %471 : vector<8x1xf32> to vector<8x32xf32>
    %473 = arith.subf %467, %472 : vector<8x32xf32>
    %474 = arith.mulf %473, %473 : vector<8x32xf32>
    %cst_198 = arith.constant dense<0.000000e+00> : vector<8xf32>
    %475 = vector.multi_reduction <add>, %474, %cst_198 [1] : vector<8x32xf32> to vector<8xf32>
    %476 = vector.shape_cast %475 : vector<8xf32> to vector<8x1xf32>
    %cst_199 = arith.constant 3.200000e+01 : f32
    %477 = vector.broadcast %cst_199 : f32 to vector<8x1xf32>
    %478 = arith.divf %476, %477 : vector<8x1xf32>
    %cst_200 = arith.constant 9.99999974E-6 : f32
    %479 = vector.broadcast %cst_200 : f32 to vector<8x1xf32>
    %480 = arith.addf %478, %479 : vector<8x1xf32>
    %481 = math.rsqrt %480 : vector<8x1xf32>
    %482 = vector.broadcast %481 : vector<8x1xf32> to vector<8x32xf32>
    %483 = arith.mulf %473, %482 : vector<8x32xf32>
    %484 = vector.broadcast %366 : vector<1x32xf32> to vector<8x32xf32>
    %485 = arith.mulf %483, %484 : vector<8x32xf32>
    %486 = vector.broadcast %368 : vector<1x32xf32> to vector<8x32xf32>
    %487 = arith.addf %485, %486 : vector<8x32xf32>
    %c0_201 = arith.constant 0 : index
    %c0_202 = arith.constant 0 : index
    %c0_203 = arith.constant 0 : index
    %488 = vector.load %arg19[%c0_201, %c0_202, %c0_203] : memref<2x32x32xf32, #tpu.memory_space<vmem>>, vector<1x32x32xf32>
    %489 = vector.shape_cast %488 : vector<1x32x32xf32> to vector<32x32xf32>
    %c0_204 = arith.constant 0 : index
    %c0_205 = arith.constant 0 : index
    %c0_206 = arith.constant 0 : index
    %490 = vector.load %arg20[%c0_204, %c0_205, %c0_206] : memref<2x1x32xf32, #tpu.memory_space<vmem>>, vector<1x1x32xf32>
    %491 = vector.shape_cast %490 : vector<1x1x32xf32> to vector<1x32xf32>
    %c0_207 = arith.constant 0 : index
    %c0_208 = arith.constant 0 : index
    %c0_209 = arith.constant 0 : index
    %492 = vector.load %arg21[%c0_207, %c0_208, %c0_209] : memref<2x32x64xf32, #tpu.memory_space<vmem>>, vector<1x32x64xf32>
    %493 = vector.shape_cast %492 : vector<1x32x64xf32> to vector<32x64xf32>
    %c0_210 = arith.constant 0 : index
    %c0_211 = arith.constant 0 : index
    %c0_212 = arith.constant 0 : index
    %494 = vector.load %arg22[%c0_210, %c0_211, %c0_212] : memref<2x1x64xf32, #tpu.memory_space<vmem>>, vector<1x1x64xf32>
    %495 = vector.shape_cast %494 : vector<1x1x64xf32> to vector<1x64xf32>
    %c0_213 = arith.constant 0 : index
    %c0_214 = arith.constant 0 : index
    %c0_215 = arith.constant 0 : index
    %496 = vector.load %arg23[%c0_213, %c0_214, %c0_215] : memref<2x32x32xf32, #tpu.memory_space<vmem>>, vector<1x32x32xf32>
    %497 = vector.shape_cast %496 : vector<1x32x32xf32> to vector<32x32xf32>
    %c0_216 = arith.constant 0 : index
    %c0_217 = arith.constant 0 : index
    %c0_218 = arith.constant 0 : index
    %498 = vector.load %arg24[%c0_216, %c0_217, %c0_218] : memref<2x1x32xf32, #tpu.memory_space<vmem>>, vector<1x1x32xf32>
    %499 = vector.shape_cast %498 : vector<1x1x32xf32> to vector<1x32xf32>
    %cst_219 = arith.constant dense<0.000000e+00> : vector<8x32xf32>
    %500 = tpu.matmul %487, %489, %cst_219 {dimension_numbers = #tpu.dot_dimension_numbers<[1], [0], [0], [1], [0, 0, 1, 1], [], []>} : vector<8x32xf32>, vector<32x32xf32>, vector<8x32xf32> -> vector<8x32xf32>
    %501 = vector.broadcast %491 : vector<1x32xf32> to vector<8x32xf32>
    %502 = arith.addf %500, %501 : vector<8x32xf32>
    %cst_220 = arith.constant dense<0.000000e+00> : vector<8x64xf32>
    %503 = tpu.matmul %364, %493, %cst_220 {dimension_numbers = #tpu.dot_dimension_numbers<[1], [0], [0], [1], [0, 0, 1, 1], [], []>} : vector<8x32xf32>, vector<32x64xf32>, vector<8x64xf32> -> vector<8x64xf32>
    %504 = vector.broadcast %495 : vector<1x64xf32> to vector<8x64xf32>
    %505 = arith.addf %503, %504 : vector<8x64xf32>
    %506 = vector.extract_strided_slice %505 {offsets = [0, 0], sizes = [8, 32], strides = [1, 1]} : vector<8x64xf32> to vector<8x32xf32>
    %507 = vector.extract_strided_slice %505 {offsets = [0, 32], sizes = [8, 32], strides = [1, 1]} : vector<8x64xf32> to vector<8x32xf32>
    %508 = vector.extract_strided_slice %502 {offsets = [0, 0], sizes = [8, 8], strides = [1, 1]} : vector<8x32xf32> to vector<8x8xf32>
    %509 = vector.extract_strided_slice %506 {offsets = [0, 0], sizes = [8, 8], strides = [1, 1]} : vector<8x32xf32> to vector<8x8xf32>
    %510 = vector.extract_strided_slice %507 {offsets = [0, 0], sizes = [8, 8], strides = [1, 1]} : vector<8x32xf32> to vector<8x8xf32>
    %511 = tpu.transpose %509, [1, 0] : vector<8x8xf32> -> vector<8x8xf32>
    %cst_221 = arith.constant dense<0.000000e+00> : vector<8x8xf32>
    %512 = tpu.matmul %508, %511, %cst_221 {dimension_numbers = #tpu.dot_dimension_numbers<[1], [0], [0], [1], [0, 0, 1, 1], [], []>} : vector<8x8xf32>, vector<8x8xf32>, vector<8x8xf32> -> vector<8x8xf32>
    %cst_222 = arith.constant 0.353553385 : f32
    %513 = vector.broadcast %cst_222 : f32 to vector<8x8xf32>
    %514 = arith.mulf %512, %513 : vector<8x8xf32>
    %cst_223 = arith.constant -1.000000e+30 : f32
    %515 = vector.shape_cast %3 : vector<1x8xi1> to vector<1x8xi1>
    %516 = vector.broadcast %515 : vector<1x8xi1> to vector<8x8xi1>
    %517 = vector.broadcast %cst_223 : f32 to vector<8x8xf32>
    %518 = arith.select %516, %514, %517 : vector<8x8xi1>, vector<8x8xf32>
    %cst_224 = arith.constant dense<0xFF800000> : vector<8xf32>
    %519 = vector.multi_reduction <maximumf>, %518, %cst_224 [1] : vector<8x8xf32> to vector<8xf32>
    %520 = vector.shape_cast %519 : vector<8xf32> to vector<8x1xf32>
    %521 = vector.broadcast %520 : vector<8x1xf32> to vector<8x8xf32>
    %522 = arith.subf %518, %521 : vector<8x8xf32>
    %523 = math.exp %522 : vector<8x8xf32>
    %cst_225 = arith.constant dense<0.000000e+00> : vector<8xf32>
    %524 = vector.multi_reduction <add>, %523, %cst_225 [1] : vector<8x8xf32> to vector<8xf32>
    %525 = vector.shape_cast %524 : vector<8xf32> to vector<8x1xf32>
    %526 = tpu.reciprocal %525 {approx = true} : vector<8x1xf32> -> vector<8x1xf32>
    %527 = vector.broadcast %526 : vector<8x1xf32> to vector<8x8xf32>
    %528 = arith.mulf %523, %527 : vector<8x8xf32>
    %cst_226 = arith.constant dense<0.000000e+00> : vector<8x8xf32>
    %529 = tpu.matmul %528, %510, %cst_226 {dimension_numbers = #tpu.dot_dimension_numbers<[1], [0], [0], [1], [0, 0, 1, 1], [], []>} : vector<8x8xf32>, vector<8x8xf32>, vector<8x8xf32> -> vector<8x8xf32>
    %530 = vector.extract_strided_slice %502 {offsets = [0, 8], sizes = [8, 8], strides = [1, 1]} : vector<8x32xf32> to vector<8x8xf32>
    %531 = vector.extract_strided_slice %506 {offsets = [0, 8], sizes = [8, 8], strides = [1, 1]} : vector<8x32xf32> to vector<8x8xf32>
    %532 = vector.extract_strided_slice %507 {offsets = [0, 8], sizes = [8, 8], strides = [1, 1]} : vector<8x32xf32> to vector<8x8xf32>
    %533 = tpu.transpose %531, [1, 0] : vector<8x8xf32> -> vector<8x8xf32>
    %cst_227 = arith.constant dense<0.000000e+00> : vector<8x8xf32>
    %534 = tpu.matmul %530, %533, %cst_227 {dimension_numbers = #tpu.dot_dimension_numbers<[1], [0], [0], [1], [0, 0, 1, 1], [], []>} : vector<8x8xf32>, vector<8x8xf32>, vector<8x8xf32> -> vector<8x8xf32>
    %cst_228 = arith.constant 0.353553385 : f32
    %535 = vector.broadcast %cst_228 : f32 to vector<8x8xf32>
    %536 = arith.mulf %534, %535 : vector<8x8xf32>
    %cst_229 = arith.constant -1.000000e+30 : f32
    %537 = vector.shape_cast %3 : vector<1x8xi1> to vector<1x8xi1>
    %538 = vector.broadcast %537 : vector<1x8xi1> to vector<8x8xi1>
    %539 = vector.broadcast %cst_229 : f32 to vector<8x8xf32>
    %540 = arith.select %538, %536, %539 : vector<8x8xi1>, vector<8x8xf32>
    %cst_230 = arith.constant dense<0xFF800000> : vector<8xf32>
    %541 = vector.multi_reduction <maximumf>, %540, %cst_230 [1] : vector<8x8xf32> to vector<8xf32>
    %542 = vector.shape_cast %541 : vector<8xf32> to vector<8x1xf32>
    %543 = vector.broadcast %542 : vector<8x1xf32> to vector<8x8xf32>
    %544 = arith.subf %540, %543 : vector<8x8xf32>
    %545 = math.exp %544 : vector<8x8xf32>
    %cst_231 = arith.constant dense<0.000000e+00> : vector<8xf32>
    %546 = vector.multi_reduction <add>, %545, %cst_231 [1] : vector<8x8xf32> to vector<8xf32>
    %547 = vector.shape_cast %546 : vector<8xf32> to vector<8x1xf32>
    %548 = tpu.reciprocal %547 {approx = true} : vector<8x1xf32> -> vector<8x1xf32>
    %549 = vector.broadcast %548 : vector<8x1xf32> to vector<8x8xf32>
    %550 = arith.mulf %545, %549 : vector<8x8xf32>
    %cst_232 = arith.constant dense<0.000000e+00> : vector<8x8xf32>
    %551 = tpu.matmul %550, %532, %cst_232 {dimension_numbers = #tpu.dot_dimension_numbers<[1], [0], [0], [1], [0, 0, 1, 1], [], []>} : vector<8x8xf32>, vector<8x8xf32>, vector<8x8xf32> -> vector<8x8xf32>
    %552 = vector.extract_strided_slice %502 {offsets = [0, 16], sizes = [8, 8], strides = [1, 1]} : vector<8x32xf32> to vector<8x8xf32>
    %553 = vector.extract_strided_slice %506 {offsets = [0, 16], sizes = [8, 8], strides = [1, 1]} : vector<8x32xf32> to vector<8x8xf32>
    %554 = vector.extract_strided_slice %507 {offsets = [0, 16], sizes = [8, 8], strides = [1, 1]} : vector<8x32xf32> to vector<8x8xf32>
    %555 = tpu.transpose %553, [1, 0] : vector<8x8xf32> -> vector<8x8xf32>
    %cst_233 = arith.constant dense<0.000000e+00> : vector<8x8xf32>
    %556 = tpu.matmul %552, %555, %cst_233 {dimension_numbers = #tpu.dot_dimension_numbers<[1], [0], [0], [1], [0, 0, 1, 1], [], []>} : vector<8x8xf32>, vector<8x8xf32>, vector<8x8xf32> -> vector<8x8xf32>
    %cst_234 = arith.constant 0.353553385 : f32
    %557 = vector.broadcast %cst_234 : f32 to vector<8x8xf32>
    %558 = arith.mulf %556, %557 : vector<8x8xf32>
    %cst_235 = arith.constant -1.000000e+30 : f32
    %559 = vector.shape_cast %3 : vector<1x8xi1> to vector<1x8xi1>
    %560 = vector.broadcast %559 : vector<1x8xi1> to vector<8x8xi1>
    %561 = vector.broadcast %cst_235 : f32 to vector<8x8xf32>
    %562 = arith.select %560, %558, %561 : vector<8x8xi1>, vector<8x8xf32>
    %cst_236 = arith.constant dense<0xFF800000> : vector<8xf32>
    %563 = vector.multi_reduction <maximumf>, %562, %cst_236 [1] : vector<8x8xf32> to vector<8xf32>
    %564 = vector.shape_cast %563 : vector<8xf32> to vector<8x1xf32>
    %565 = vector.broadcast %564 : vector<8x1xf32> to vector<8x8xf32>
    %566 = arith.subf %562, %565 : vector<8x8xf32>
    %567 = math.exp %566 : vector<8x8xf32>
    %cst_237 = arith.constant dense<0.000000e+00> : vector<8xf32>
    %568 = vector.multi_reduction <add>, %567, %cst_237 [1] : vector<8x8xf32> to vector<8xf32>
    %569 = vector.shape_cast %568 : vector<8xf32> to vector<8x1xf32>
    %570 = tpu.reciprocal %569 {approx = true} : vector<8x1xf32> -> vector<8x1xf32>
    %571 = vector.broadcast %570 : vector<8x1xf32> to vector<8x8xf32>
    %572 = arith.mulf %567, %571 : vector<8x8xf32>
    %cst_238 = arith.constant dense<0.000000e+00> : vector<8x8xf32>
    %573 = tpu.matmul %572, %554, %cst_238 {dimension_numbers = #tpu.dot_dimension_numbers<[1], [0], [0], [1], [0, 0, 1, 1], [], []>} : vector<8x8xf32>, vector<8x8xf32>, vector<8x8xf32> -> vector<8x8xf32>
    %574 = vector.extract_strided_slice %502 {offsets = [0, 24], sizes = [8, 8], strides = [1, 1]} : vector<8x32xf32> to vector<8x8xf32>
    %575 = vector.extract_strided_slice %506 {offsets = [0, 24], sizes = [8, 8], strides = [1, 1]} : vector<8x32xf32> to vector<8x8xf32>
    %576 = vector.extract_strided_slice %507 {offsets = [0, 24], sizes = [8, 8], strides = [1, 1]} : vector<8x32xf32> to vector<8x8xf32>
    %577 = tpu.transpose %575, [1, 0] : vector<8x8xf32> -> vector<8x8xf32>
    %cst_239 = arith.constant dense<0.000000e+00> : vector<8x8xf32>
    %578 = tpu.matmul %574, %577, %cst_239 {dimension_numbers = #tpu.dot_dimension_numbers<[1], [0], [0], [1], [0, 0, 1, 1], [], []>} : vector<8x8xf32>, vector<8x8xf32>, vector<8x8xf32> -> vector<8x8xf32>
    %cst_240 = arith.constant 0.353553385 : f32
    %579 = vector.broadcast %cst_240 : f32 to vector<8x8xf32>
    %580 = arith.mulf %578, %579 : vector<8x8xf32>
    %cst_241 = arith.constant -1.000000e+30 : f32
    %581 = vector.shape_cast %3 : vector<1x8xi1> to vector<1x8xi1>
    %582 = vector.broadcast %581 : vector<1x8xi1> to vector<8x8xi1>
    %583 = vector.broadcast %cst_241 : f32 to vector<8x8xf32>
    %584 = arith.select %582, %580, %583 : vector<8x8xi1>, vector<8x8xf32>
    %cst_242 = arith.constant dense<0xFF800000> : vector<8xf32>
    %585 = vector.multi_reduction <maximumf>, %584, %cst_242 [1] : vector<8x8xf32> to vector<8xf32>
    %586 = vector.shape_cast %585 : vector<8xf32> to vector<8x1xf32>
    %587 = vector.broadcast %586 : vector<8x1xf32> to vector<8x8xf32>
    %588 = arith.subf %584, %587 : vector<8x8xf32>
    %589 = math.exp %588 : vector<8x8xf32>
    %cst_243 = arith.constant dense<0.000000e+00> : vector<8xf32>
    %590 = vector.multi_reduction <add>, %589, %cst_243 [1] : vector<8x8xf32> to vector<8xf32>
    %591 = vector.shape_cast %590 : vector<8xf32> to vector<8x1xf32>
    %592 = tpu.reciprocal %591 {approx = true} : vector<8x1xf32> -> vector<8x1xf32>
    %593 = vector.broadcast %592 : vector<8x1xf32> to vector<8x8xf32>
    %594 = arith.mulf %589, %593 : vector<8x8xf32>
    %cst_244 = arith.constant dense<0.000000e+00> : vector<8x8xf32>
    %595 = tpu.matmul %594, %576, %cst_244 {dimension_numbers = #tpu.dot_dimension_numbers<[1], [0], [0], [1], [0, 0, 1, 1], [], []>} : vector<8x8xf32>, vector<8x8xf32>, vector<8x8xf32> -> vector<8x8xf32>
    %596 = tpu.concatenate %529, %551, %573, %595 in 1 : vector<8x8xf32>, vector<8x8xf32>, vector<8x8xf32>, vector<8x8xf32> -> vector<8x32xf32>
    %cst_245 = arith.constant dense<0.000000e+00> : vector<8x32xf32>
    %597 = tpu.matmul %596, %497, %cst_245 {dimension_numbers = #tpu.dot_dimension_numbers<[1], [0], [0], [1], [0, 0, 1, 1], [], []>} : vector<8x32xf32>, vector<32x32xf32>, vector<8x32xf32> -> vector<8x32xf32>
    %598 = vector.broadcast %499 : vector<1x32xf32> to vector<8x32xf32>
    %599 = arith.addf %597, %598 : vector<8x32xf32>
    %600 = arith.addf %487, %599 : vector<8x32xf32>
    %cst_246 = arith.constant dense<0.000000e+00> : vector<8xf32>
    %601 = vector.multi_reduction <add>, %600, %cst_246 [1] : vector<8x32xf32> to vector<8xf32>
    %602 = vector.shape_cast %601 : vector<8xf32> to vector<8x1xf32>
    %cst_247 = arith.constant 3.200000e+01 : f32
    %603 = vector.broadcast %cst_247 : f32 to vector<8x1xf32>
    %604 = arith.divf %602, %603 : vector<8x1xf32>
    %605 = vector.broadcast %604 : vector<8x1xf32> to vector<8x32xf32>
    %606 = arith.subf %600, %605 : vector<8x32xf32>
    %607 = arith.mulf %606, %606 : vector<8x32xf32>
    %cst_248 = arith.constant dense<0.000000e+00> : vector<8xf32>
    %608 = vector.multi_reduction <add>, %607, %cst_248 [1] : vector<8x32xf32> to vector<8xf32>
    %609 = vector.shape_cast %608 : vector<8xf32> to vector<8x1xf32>
    %cst_249 = arith.constant 3.200000e+01 : f32
    %610 = vector.broadcast %cst_249 : f32 to vector<8x1xf32>
    %611 = arith.divf %609, %610 : vector<8x1xf32>
    %cst_250 = arith.constant 9.99999974E-6 : f32
    %612 = vector.broadcast %cst_250 : f32 to vector<8x1xf32>
    %613 = arith.addf %611, %612 : vector<8x1xf32>
    %614 = math.rsqrt %613 : vector<8x1xf32>
    %615 = vector.broadcast %614 : vector<8x1xf32> to vector<8x32xf32>
    %616 = arith.mulf %606, %615 : vector<8x32xf32>
    %617 = vector.broadcast %366 : vector<1x32xf32> to vector<8x32xf32>
    %618 = arith.mulf %616, %617 : vector<8x32xf32>
    %619 = vector.broadcast %368 : vector<1x32xf32> to vector<8x32xf32>
    %620 = arith.addf %618, %619 : vector<8x32xf32>
    %c0_251 = arith.constant 0 : index
    %c0_252 = arith.constant 0 : index
    %c0_253 = arith.constant 0 : index
    %621 = vector.load %arg25[%c0_251, %c0_252, %c0_253] : memref<2x32x64xf32, #tpu.memory_space<vmem>>, vector<1x32x64xf32>
    %622 = vector.shape_cast %621 : vector<1x32x64xf32> to vector<32x64xf32>
    %cst_254 = arith.constant dense<0.000000e+00> : vector<8x64xf32>
    %623 = tpu.matmul %620, %622, %cst_254 {dimension_numbers = #tpu.dot_dimension_numbers<[1], [0], [0], [1], [0, 0, 1, 1], [], []>} : vector<8x32xf32>, vector<32x64xf32>, vector<8x64xf32> -> vector<8x64xf32>
    %c0_255 = arith.constant 0 : index
    %c0_256 = arith.constant 0 : index
    %c0_257 = arith.constant 0 : index
    %624 = vector.load %arg26[%c0_255, %c0_256, %c0_257] : memref<2x1x64xf32, #tpu.memory_space<vmem>>, vector<1x1x64xf32>
    %625 = vector.shape_cast %624 : vector<1x1x64xf32> to vector<1x64xf32>
    %626 = vector.broadcast %625 : vector<1x64xf32> to vector<8x64xf32>
    %627 = arith.addf %623, %626 : vector<8x64xf32>
    %cst_258 = arith.constant 5.000000e-01 : f32
    %628 = vector.broadcast %cst_258 : f32 to vector<8x64xf32>
    %629 = arith.mulf %628, %627 : vector<8x64xf32>
    %cst_259 = arith.constant 0.707106769 : f32
    %630 = vector.broadcast %cst_259 : f32 to vector<8x64xf32>
    %631 = arith.mulf %627, %630 : vector<8x64xf32>
    %632 = math.erf %631 : vector<8x64xf32>
    %cst_260 = arith.constant 1.000000e+00 : f32
    %633 = vector.broadcast %cst_260 : f32 to vector<8x64xf32>
    %634 = arith.addf %633, %632 : vector<8x64xf32>
    %635 = arith.mulf %629, %634 : vector<8x64xf32>
    %c0_261 = arith.constant 0 : index
    %c0_262 = arith.constant 0 : index
    %c0_263 = arith.constant 0 : index
    %636 = vector.load %arg27[%c0_261, %c0_262, %c0_263] : memref<2x64x32xf32, #tpu.memory_space<vmem>>, vector<1x64x32xf32>
    %637 = vector.shape_cast %636 : vector<1x64x32xf32> to vector<64x32xf32>
    %cst_264 = arith.constant dense<0.000000e+00> : vector<8x32xf32>
    %638 = tpu.matmul %635, %637, %cst_264 {dimension_numbers = #tpu.dot_dimension_numbers<[1], [0], [0], [1], [0, 0, 1, 1], [], []>} : vector<8x64xf32>, vector<64x32xf32>, vector<8x32xf32> -> vector<8x32xf32>
    %c0_265 = arith.constant 0 : index
    %c0_266 = arith.constant 0 : index
    %c0_267 = arith.constant 0 : index
    %639 = vector.load %arg28[%c0_265, %c0_266, %c0_267] : memref<2x1x32xf32, #tpu.memory_space<vmem>>, vector<1x1x32xf32>
    %640 = vector.shape_cast %639 : vector<1x1x32xf32> to vector<1x32xf32>
    %641 = vector.broadcast %640 : vector<1x32xf32> to vector<8x32xf32>
    %642 = arith.addf %638, %641 : vector<8x32xf32>
    %643 = arith.addf %620, %642 : vector<8x32xf32>
    %cst_268 = arith.constant dense<0.000000e+00> : vector<8xf32>
    %644 = vector.multi_reduction <add>, %643, %cst_268 [1] : vector<8x32xf32> to vector<8xf32>
    %645 = vector.shape_cast %644 : vector<8xf32> to vector<8x1xf32>
    %cst_269 = arith.constant 3.200000e+01 : f32
    %646 = vector.broadcast %cst_269 : f32 to vector<8x1xf32>
    %647 = arith.divf %645, %646 : vector<8x1xf32>
    %648 = vector.broadcast %647 : vector<8x1xf32> to vector<8x32xf32>
    %649 = arith.subf %643, %648 : vector<8x32xf32>
    %650 = arith.mulf %649, %649 : vector<8x32xf32>
    %cst_270 = arith.constant dense<0.000000e+00> : vector<8xf32>
    %651 = vector.multi_reduction <add>, %650, %cst_270 [1] : vector<8x32xf32> to vector<8xf32>
    %652 = vector.shape_cast %651 : vector<8xf32> to vector<8x1xf32>
    %cst_271 = arith.constant 3.200000e+01 : f32
    %653 = vector.broadcast %cst_271 : f32 to vector<8x1xf32>
    %654 = arith.divf %652, %653 : vector<8x1xf32>
    %cst_272 = arith.constant 9.99999974E-6 : f32
    %655 = vector.broadcast %cst_272 : f32 to vector<8x1xf32>
    %656 = arith.addf %654, %655 : vector<8x1xf32>
    %657 = math.rsqrt %656 : vector<8x1xf32>
    %658 = vector.broadcast %657 : vector<8x1xf32> to vector<8x32xf32>
    %659 = arith.mulf %649, %658 : vector<8x32xf32>
    %660 = vector.broadcast %366 : vector<1x32xf32> to vector<8x32xf32>
    %661 = arith.mulf %659, %660 : vector<8x32xf32>
    %662 = vector.broadcast %368 : vector<1x32xf32> to vector<8x32xf32>
    %663 = arith.addf %661, %662 : vector<8x32xf32>
    %c1_273 = arith.constant 1 : index
    %c0_274 = arith.constant 0 : index
    %c0_275 = arith.constant 0 : index
    %664 = vector.load %arg29[%c1_273, %c0_274, %c0_275] : memref<2x1x32xf32, #tpu.memory_space<vmem>>, vector<1x1x32xf32>
    %665 = vector.shape_cast %664 : vector<1x1x32xf32> to vector<1x32xf32>
    %c1_276 = arith.constant 1 : index
    %c0_277 = arith.constant 0 : index
    %c0_278 = arith.constant 0 : index
    %666 = vector.load %arg30[%c1_276, %c0_277, %c0_278] : memref<2x1x32xf32, #tpu.memory_space<vmem>>, vector<1x1x32xf32>
    %667 = vector.shape_cast %666 : vector<1x1x32xf32> to vector<1x32xf32>
    %c1_279 = arith.constant 1 : index
    %c0_280 = arith.constant 0 : index
    %c0_281 = arith.constant 0 : index
    %668 = vector.load %arg15[%c1_279, %c0_280, %c0_281] : memref<2x32x96xf32, #tpu.memory_space<vmem>>, vector<1x32x96xf32>
    %669 = vector.shape_cast %668 : vector<1x32x96xf32> to vector<32x96xf32>
    %c1_282 = arith.constant 1 : index
    %c0_283 = arith.constant 0 : index
    %c0_284 = arith.constant 0 : index
    %670 = vector.load %arg16[%c1_282, %c0_283, %c0_284] : memref<2x1x96xf32, #tpu.memory_space<vmem>>, vector<1x1x96xf32>
    %671 = vector.shape_cast %670 : vector<1x1x96xf32> to vector<1x96xf32>
    %c1_285 = arith.constant 1 : index
    %c0_286 = arith.constant 0 : index
    %c0_287 = arith.constant 0 : index
    %672 = vector.load %arg17[%c1_285, %c0_286, %c0_287] : memref<2x32x32xf32, #tpu.memory_space<vmem>>, vector<1x32x32xf32>
    %673 = vector.shape_cast %672 : vector<1x32x32xf32> to vector<32x32xf32>
    %c1_288 = arith.constant 1 : index
    %c0_289 = arith.constant 0 : index
    %c0_290 = arith.constant 0 : index
    %674 = vector.load %arg18[%c1_288, %c0_289, %c0_290] : memref<2x1x32xf32, #tpu.memory_space<vmem>>, vector<1x1x32xf32>
    %675 = vector.shape_cast %674 : vector<1x1x32xf32> to vector<1x32xf32>
    %cst_291 = arith.constant dense<0.000000e+00> : vector<8x96xf32>
    %676 = tpu.matmul %663, %669, %cst_291 {dimension_numbers = #tpu.dot_dimension_numbers<[1], [0], [0], [1], [0, 0, 1, 1], [], []>} : vector<8x32xf32>, vector<32x96xf32>, vector<8x96xf32> -> vector<8x96xf32>
    %677 = vector.broadcast %671 : vector<1x96xf32> to vector<8x96xf32>
    %678 = arith.addf %676, %677 : vector<8x96xf32>
    %679 = vector.extract_strided_slice %678 {offsets = [0, 0], sizes = [8, 32], strides = [1, 1]} : vector<8x96xf32> to vector<8x32xf32>
    %680 = vector.extract_strided_slice %678 {offsets = [0, 32], sizes = [8, 32], strides = [1, 1]} : vector<8x96xf32> to vector<8x32xf32>
    %681 = vector.extract_strided_slice %678 {offsets = [0, 64], sizes = [8, 32], strides = [1, 1]} : vector<8x96xf32> to vector<8x32xf32>
    %682 = vector.extract_strided_slice %679 {offsets = [0, 0], sizes = [8, 8], strides = [1, 1]} : vector<8x32xf32> to vector<8x8xf32>
    %683 = vector.extract_strided_slice %680 {offsets = [0, 0], sizes = [8, 8], strides = [1, 1]} : vector<8x32xf32> to vector<8x8xf32>
    %684 = vector.extract_strided_slice %681 {offsets = [0, 0], sizes = [8, 8], strides = [1, 1]} : vector<8x32xf32> to vector<8x8xf32>
    %685 = tpu.transpose %683, [1, 0] : vector<8x8xf32> -> vector<8x8xf32>
    %cst_292 = arith.constant dense<0.000000e+00> : vector<8x8xf32>
    %686 = tpu.matmul %682, %685, %cst_292 {dimension_numbers = #tpu.dot_dimension_numbers<[1], [0], [0], [1], [0, 0, 1, 1], [], []>} : vector<8x8xf32>, vector<8x8xf32>, vector<8x8xf32> -> vector<8x8xf32>
    %cst_293 = arith.constant 0.353553385 : f32
    %687 = vector.broadcast %cst_293 : f32 to vector<8x8xf32>
    %688 = arith.mulf %686, %687 : vector<8x8xf32>
    %cst_294 = arith.constant -1.000000e+30 : f32
    %689 = vector.broadcast %cst_294 : f32 to vector<8x8xf32>
    %690 = arith.select %16, %688, %689 : vector<8x8xi1>, vector<8x8xf32>
    %cst_295 = arith.constant dense<0xFF800000> : vector<8xf32>
    %691 = vector.multi_reduction <maximumf>, %690, %cst_295 [1] : vector<8x8xf32> to vector<8xf32>
    %692 = vector.shape_cast %691 : vector<8xf32> to vector<8x1xf32>
    %693 = vector.broadcast %692 : vector<8x1xf32> to vector<8x8xf32>
    %694 = arith.subf %690, %693 : vector<8x8xf32>
    %695 = math.exp %694 : vector<8x8xf32>
    %cst_296 = arith.constant dense<0.000000e+00> : vector<8xf32>
    %696 = vector.multi_reduction <add>, %695, %cst_296 [1] : vector<8x8xf32> to vector<8xf32>
    %697 = vector.shape_cast %696 : vector<8xf32> to vector<8x1xf32>
    %698 = tpu.reciprocal %697 {approx = true} : vector<8x1xf32> -> vector<8x1xf32>
    %699 = vector.broadcast %698 : vector<8x1xf32> to vector<8x8xf32>
    %700 = arith.mulf %695, %699 : vector<8x8xf32>
    %cst_297 = arith.constant dense<0.000000e+00> : vector<8x8xf32>
    %701 = tpu.matmul %700, %684, %cst_297 {dimension_numbers = #tpu.dot_dimension_numbers<[1], [0], [0], [1], [0, 0, 1, 1], [], []>} : vector<8x8xf32>, vector<8x8xf32>, vector<8x8xf32> -> vector<8x8xf32>
    %702 = vector.extract_strided_slice %679 {offsets = [0, 8], sizes = [8, 8], strides = [1, 1]} : vector<8x32xf32> to vector<8x8xf32>
    %703 = vector.extract_strided_slice %680 {offsets = [0, 8], sizes = [8, 8], strides = [1, 1]} : vector<8x32xf32> to vector<8x8xf32>
    %704 = vector.extract_strided_slice %681 {offsets = [0, 8], sizes = [8, 8], strides = [1, 1]} : vector<8x32xf32> to vector<8x8xf32>
    %705 = tpu.transpose %703, [1, 0] : vector<8x8xf32> -> vector<8x8xf32>
    %cst_298 = arith.constant dense<0.000000e+00> : vector<8x8xf32>
    %706 = tpu.matmul %702, %705, %cst_298 {dimension_numbers = #tpu.dot_dimension_numbers<[1], [0], [0], [1], [0, 0, 1, 1], [], []>} : vector<8x8xf32>, vector<8x8xf32>, vector<8x8xf32> -> vector<8x8xf32>
    %cst_299 = arith.constant 0.353553385 : f32
    %707 = vector.broadcast %cst_299 : f32 to vector<8x8xf32>
    %708 = arith.mulf %706, %707 : vector<8x8xf32>
    %cst_300 = arith.constant -1.000000e+30 : f32
    %709 = vector.broadcast %cst_300 : f32 to vector<8x8xf32>
    %710 = arith.select %16, %708, %709 : vector<8x8xi1>, vector<8x8xf32>
    %cst_301 = arith.constant dense<0xFF800000> : vector<8xf32>
    %711 = vector.multi_reduction <maximumf>, %710, %cst_301 [1] : vector<8x8xf32> to vector<8xf32>
    %712 = vector.shape_cast %711 : vector<8xf32> to vector<8x1xf32>
    %713 = vector.broadcast %712 : vector<8x1xf32> to vector<8x8xf32>
    %714 = arith.subf %710, %713 : vector<8x8xf32>
    %715 = math.exp %714 : vector<8x8xf32>
    %cst_302 = arith.constant dense<0.000000e+00> : vector<8xf32>
    %716 = vector.multi_reduction <add>, %715, %cst_302 [1] : vector<8x8xf32> to vector<8xf32>
    %717 = vector.shape_cast %716 : vector<8xf32> to vector<8x1xf32>
    %718 = tpu.reciprocal %717 {approx = true} : vector<8x1xf32> -> vector<8x1xf32>
    %719 = vector.broadcast %718 : vector<8x1xf32> to vector<8x8xf32>
    %720 = arith.mulf %715, %719 : vector<8x8xf32>
    %cst_303 = arith.constant dense<0.000000e+00> : vector<8x8xf32>
    %721 = tpu.matmul %720, %704, %cst_303 {dimension_numbers = #tpu.dot_dimension_numbers<[1], [0], [0], [1], [0, 0, 1, 1], [], []>} : vector<8x8xf32>, vector<8x8xf32>, vector<8x8xf32> -> vector<8x8xf32>
    %722 = vector.extract_strided_slice %679 {offsets = [0, 16], sizes = [8, 8], strides = [1, 1]} : vector<8x32xf32> to vector<8x8xf32>
    %723 = vector.extract_strided_slice %680 {offsets = [0, 16], sizes = [8, 8], strides = [1, 1]} : vector<8x32xf32> to vector<8x8xf32>
    %724 = vector.extract_strided_slice %681 {offsets = [0, 16], sizes = [8, 8], strides = [1, 1]} : vector<8x32xf32> to vector<8x8xf32>
    %725 = tpu.transpose %723, [1, 0] : vector<8x8xf32> -> vector<8x8xf32>
    %cst_304 = arith.constant dense<0.000000e+00> : vector<8x8xf32>
    %726 = tpu.matmul %722, %725, %cst_304 {dimension_numbers = #tpu.dot_dimension_numbers<[1], [0], [0], [1], [0, 0, 1, 1], [], []>} : vector<8x8xf32>, vector<8x8xf32>, vector<8x8xf32> -> vector<8x8xf32>
    %cst_305 = arith.constant 0.353553385 : f32
    %727 = vector.broadcast %cst_305 : f32 to vector<8x8xf32>
    %728 = arith.mulf %726, %727 : vector<8x8xf32>
    %cst_306 = arith.constant -1.000000e+30 : f32
    %729 = vector.broadcast %cst_306 : f32 to vector<8x8xf32>
    %730 = arith.select %16, %728, %729 : vector<8x8xi1>, vector<8x8xf32>
    %cst_307 = arith.constant dense<0xFF800000> : vector<8xf32>
    %731 = vector.multi_reduction <maximumf>, %730, %cst_307 [1] : vector<8x8xf32> to vector<8xf32>
    %732 = vector.shape_cast %731 : vector<8xf32> to vector<8x1xf32>
    %733 = vector.broadcast %732 : vector<8x1xf32> to vector<8x8xf32>
    %734 = arith.subf %730, %733 : vector<8x8xf32>
    %735 = math.exp %734 : vector<8x8xf32>
    %cst_308 = arith.constant dense<0.000000e+00> : vector<8xf32>
    %736 = vector.multi_reduction <add>, %735, %cst_308 [1] : vector<8x8xf32> to vector<8xf32>
    %737 = vector.shape_cast %736 : vector<8xf32> to vector<8x1xf32>
    %738 = tpu.reciprocal %737 {approx = true} : vector<8x1xf32> -> vector<8x1xf32>
    %739 = vector.broadcast %738 : vector<8x1xf32> to vector<8x8xf32>
    %740 = arith.mulf %735, %739 : vector<8x8xf32>
    %cst_309 = arith.constant dense<0.000000e+00> : vector<8x8xf32>
    %741 = tpu.matmul %740, %724, %cst_309 {dimension_numbers = #tpu.dot_dimension_numbers<[1], [0], [0], [1], [0, 0, 1, 1], [], []>} : vector<8x8xf32>, vector<8x8xf32>, vector<8x8xf32> -> vector<8x8xf32>
    %742 = vector.extract_strided_slice %679 {offsets = [0, 24], sizes = [8, 8], strides = [1, 1]} : vector<8x32xf32> to vector<8x8xf32>
    %743 = vector.extract_strided_slice %680 {offsets = [0, 24], sizes = [8, 8], strides = [1, 1]} : vector<8x32xf32> to vector<8x8xf32>
    %744 = vector.extract_strided_slice %681 {offsets = [0, 24], sizes = [8, 8], strides = [1, 1]} : vector<8x32xf32> to vector<8x8xf32>
    %745 = tpu.transpose %743, [1, 0] : vector<8x8xf32> -> vector<8x8xf32>
    %cst_310 = arith.constant dense<0.000000e+00> : vector<8x8xf32>
    %746 = tpu.matmul %742, %745, %cst_310 {dimension_numbers = #tpu.dot_dimension_numbers<[1], [0], [0], [1], [0, 0, 1, 1], [], []>} : vector<8x8xf32>, vector<8x8xf32>, vector<8x8xf32> -> vector<8x8xf32>
    %cst_311 = arith.constant 0.353553385 : f32
    %747 = vector.broadcast %cst_311 : f32 to vector<8x8xf32>
    %748 = arith.mulf %746, %747 : vector<8x8xf32>
    %cst_312 = arith.constant -1.000000e+30 : f32
    %749 = vector.broadcast %cst_312 : f32 to vector<8x8xf32>
    %750 = arith.select %16, %748, %749 : vector<8x8xi1>, vector<8x8xf32>
    %cst_313 = arith.constant dense<0xFF800000> : vector<8xf32>
    %751 = vector.multi_reduction <maximumf>, %750, %cst_313 [1] : vector<8x8xf32> to vector<8xf32>
    %752 = vector.shape_cast %751 : vector<8xf32> to vector<8x1xf32>
    %753 = vector.broadcast %752 : vector<8x1xf32> to vector<8x8xf32>
    %754 = arith.subf %750, %753 : vector<8x8xf32>
    %755 = math.exp %754 : vector<8x8xf32>
    %cst_314 = arith.constant dense<0.000000e+00> : vector<8xf32>
    %756 = vector.multi_reduction <add>, %755, %cst_314 [1] : vector<8x8xf32> to vector<8xf32>
    %757 = vector.shape_cast %756 : vector<8xf32> to vector<8x1xf32>
    %758 = tpu.reciprocal %757 {approx = true} : vector<8x1xf32> -> vector<8x1xf32>
    %759 = vector.broadcast %758 : vector<8x1xf32> to vector<8x8xf32>
    %760 = arith.mulf %755, %759 : vector<8x8xf32>
    %cst_315 = arith.constant dense<0.000000e+00> : vector<8x8xf32>
    %761 = tpu.matmul %760, %744, %cst_315 {dimension_numbers = #tpu.dot_dimension_numbers<[1], [0], [0], [1], [0, 0, 1, 1], [], []>} : vector<8x8xf32>, vector<8x8xf32>, vector<8x8xf32> -> vector<8x8xf32>
    %762 = tpu.concatenate %701, %721, %741, %761 in 1 : vector<8x8xf32>, vector<8x8xf32>, vector<8x8xf32>, vector<8x8xf32> -> vector<8x32xf32>
    %cst_316 = arith.constant dense<0.000000e+00> : vector<8x32xf32>
    %763 = tpu.matmul %762, %673, %cst_316 {dimension_numbers = #tpu.dot_dimension_numbers<[1], [0], [0], [1], [0, 0, 1, 1], [], []>} : vector<8x32xf32>, vector<32x32xf32>, vector<8x32xf32> -> vector<8x32xf32>
    %764 = vector.broadcast %675 : vector<1x32xf32> to vector<8x32xf32>
    %765 = arith.addf %763, %764 : vector<8x32xf32>
    %766 = arith.addf %663, %765 : vector<8x32xf32>
    %cst_317 = arith.constant dense<0.000000e+00> : vector<8xf32>
    %767 = vector.multi_reduction <add>, %766, %cst_317 [1] : vector<8x32xf32> to vector<8xf32>
    %768 = vector.shape_cast %767 : vector<8xf32> to vector<8x1xf32>
    %cst_318 = arith.constant 3.200000e+01 : f32
    %769 = vector.broadcast %cst_318 : f32 to vector<8x1xf32>
    %770 = arith.divf %768, %769 : vector<8x1xf32>
    %771 = vector.broadcast %770 : vector<8x1xf32> to vector<8x32xf32>
    %772 = arith.subf %766, %771 : vector<8x32xf32>
    %773 = arith.mulf %772, %772 : vector<8x32xf32>
    %cst_319 = arith.constant dense<0.000000e+00> : vector<8xf32>
    %774 = vector.multi_reduction <add>, %773, %cst_319 [1] : vector<8x32xf32> to vector<8xf32>
    %775 = vector.shape_cast %774 : vector<8xf32> to vector<8x1xf32>
    %cst_320 = arith.constant 3.200000e+01 : f32
    %776 = vector.broadcast %cst_320 : f32 to vector<8x1xf32>
    %777 = arith.divf %775, %776 : vector<8x1xf32>
    %cst_321 = arith.constant 9.99999974E-6 : f32
    %778 = vector.broadcast %cst_321 : f32 to vector<8x1xf32>
    %779 = arith.addf %777, %778 : vector<8x1xf32>
    %780 = math.rsqrt %779 : vector<8x1xf32>
    %781 = vector.broadcast %780 : vector<8x1xf32> to vector<8x32xf32>
    %782 = arith.mulf %772, %781 : vector<8x32xf32>
    %783 = vector.broadcast %665 : vector<1x32xf32> to vector<8x32xf32>
    %784 = arith.mulf %782, %783 : vector<8x32xf32>
    %785 = vector.broadcast %667 : vector<1x32xf32> to vector<8x32xf32>
    %786 = arith.addf %784, %785 : vector<8x32xf32>
    %c1_322 = arith.constant 1 : index
    %c0_323 = arith.constant 0 : index
    %c0_324 = arith.constant 0 : index
    %787 = vector.load %arg19[%c1_322, %c0_323, %c0_324] : memref<2x32x32xf32, #tpu.memory_space<vmem>>, vector<1x32x32xf32>
    %788 = vector.shape_cast %787 : vector<1x32x32xf32> to vector<32x32xf32>
    %c1_325 = arith.constant 1 : index
    %c0_326 = arith.constant 0 : index
    %c0_327 = arith.constant 0 : index
    %789 = vector.load %arg20[%c1_325, %c0_326, %c0_327] : memref<2x1x32xf32, #tpu.memory_space<vmem>>, vector<1x1x32xf32>
    %790 = vector.shape_cast %789 : vector<1x1x32xf32> to vector<1x32xf32>
    %c1_328 = arith.constant 1 : index
    %c0_329 = arith.constant 0 : index
    %c0_330 = arith.constant 0 : index
    %791 = vector.load %arg21[%c1_328, %c0_329, %c0_330] : memref<2x32x64xf32, #tpu.memory_space<vmem>>, vector<1x32x64xf32>
    %792 = vector.shape_cast %791 : vector<1x32x64xf32> to vector<32x64xf32>
    %c1_331 = arith.constant 1 : index
    %c0_332 = arith.constant 0 : index
    %c0_333 = arith.constant 0 : index
    %793 = vector.load %arg22[%c1_331, %c0_332, %c0_333] : memref<2x1x64xf32, #tpu.memory_space<vmem>>, vector<1x1x64xf32>
    %794 = vector.shape_cast %793 : vector<1x1x64xf32> to vector<1x64xf32>
    %c1_334 = arith.constant 1 : index
    %c0_335 = arith.constant 0 : index
    %c0_336 = arith.constant 0 : index
    %795 = vector.load %arg23[%c1_334, %c0_335, %c0_336] : memref<2x32x32xf32, #tpu.memory_space<vmem>>, vector<1x32x32xf32>
    %796 = vector.shape_cast %795 : vector<1x32x32xf32> to vector<32x32xf32>
    %c1_337 = arith.constant 1 : index
    %c0_338 = arith.constant 0 : index
    %c0_339 = arith.constant 0 : index
    %797 = vector.load %arg24[%c1_337, %c0_338, %c0_339] : memref<2x1x32xf32, #tpu.memory_space<vmem>>, vector<1x1x32xf32>
    %798 = vector.shape_cast %797 : vector<1x1x32xf32> to vector<1x32xf32>
    %cst_340 = arith.constant dense<0.000000e+00> : vector<8x32xf32>
    %799 = tpu.matmul %786, %788, %cst_340 {dimension_numbers = #tpu.dot_dimension_numbers<[1], [0], [0], [1], [0, 0, 1, 1], [], []>} : vector<8x32xf32>, vector<32x32xf32>, vector<8x32xf32> -> vector<8x32xf32>
    %800 = vector.broadcast %790 : vector<1x32xf32> to vector<8x32xf32>
    %801 = arith.addf %799, %800 : vector<8x32xf32>
    %cst_341 = arith.constant dense<0.000000e+00> : vector<8x64xf32>
    %802 = tpu.matmul %364, %792, %cst_341 {dimension_numbers = #tpu.dot_dimension_numbers<[1], [0], [0], [1], [0, 0, 1, 1], [], []>} : vector<8x32xf32>, vector<32x64xf32>, vector<8x64xf32> -> vector<8x64xf32>
    %803 = vector.broadcast %794 : vector<1x64xf32> to vector<8x64xf32>
    %804 = arith.addf %802, %803 : vector<8x64xf32>
    %805 = vector.extract_strided_slice %804 {offsets = [0, 0], sizes = [8, 32], strides = [1, 1]} : vector<8x64xf32> to vector<8x32xf32>
    %806 = vector.extract_strided_slice %804 {offsets = [0, 32], sizes = [8, 32], strides = [1, 1]} : vector<8x64xf32> to vector<8x32xf32>
    %807 = vector.extract_strided_slice %801 {offsets = [0, 0], sizes = [8, 8], strides = [1, 1]} : vector<8x32xf32> to vector<8x8xf32>
    %808 = vector.extract_strided_slice %805 {offsets = [0, 0], sizes = [8, 8], strides = [1, 1]} : vector<8x32xf32> to vector<8x8xf32>
    %809 = vector.extract_strided_slice %806 {offsets = [0, 0], sizes = [8, 8], strides = [1, 1]} : vector<8x32xf32> to vector<8x8xf32>
    %810 = tpu.transpose %808, [1, 0] : vector<8x8xf32> -> vector<8x8xf32>
    %cst_342 = arith.constant dense<0.000000e+00> : vector<8x8xf32>
    %811 = tpu.matmul %807, %810, %cst_342 {dimension_numbers = #tpu.dot_dimension_numbers<[1], [0], [0], [1], [0, 0, 1, 1], [], []>} : vector<8x8xf32>, vector<8x8xf32>, vector<8x8xf32> -> vector<8x8xf32>
    %cst_343 = arith.constant 0.353553385 : f32
    %812 = vector.broadcast %cst_343 : f32 to vector<8x8xf32>
    %813 = arith.mulf %811, %812 : vector<8x8xf32>
    %cst_344 = arith.constant -1.000000e+30 : f32
    %814 = vector.shape_cast %3 : vector<1x8xi1> to vector<1x8xi1>
    %815 = vector.broadcast %814 : vector<1x8xi1> to vector<8x8xi1>
    %816 = vector.broadcast %cst_344 : f32 to vector<8x8xf32>
    %817 = arith.select %815, %813, %816 : vector<8x8xi1>, vector<8x8xf32>
    %cst_345 = arith.constant dense<0xFF800000> : vector<8xf32>
    %818 = vector.multi_reduction <maximumf>, %817, %cst_345 [1] : vector<8x8xf32> to vector<8xf32>
    %819 = vector.shape_cast %818 : vector<8xf32> to vector<8x1xf32>
    %820 = vector.broadcast %819 : vector<8x1xf32> to vector<8x8xf32>
    %821 = arith.subf %817, %820 : vector<8x8xf32>
    %822 = math.exp %821 : vector<8x8xf32>
    %cst_346 = arith.constant dense<0.000000e+00> : vector<8xf32>
    %823 = vector.multi_reduction <add>, %822, %cst_346 [1] : vector<8x8xf32> to vector<8xf32>
    %824 = vector.shape_cast %823 : vector<8xf32> to vector<8x1xf32>
    %825 = tpu.reciprocal %824 {approx = true} : vector<8x1xf32> -> vector<8x1xf32>
    %826 = vector.broadcast %825 : vector<8x1xf32> to vector<8x8xf32>
    %827 = arith.mulf %822, %826 : vector<8x8xf32>
    %cst_347 = arith.constant dense<0.000000e+00> : vector<8x8xf32>
    %828 = tpu.matmul %827, %809, %cst_347 {dimension_numbers = #tpu.dot_dimension_numbers<[1], [0], [0], [1], [0, 0, 1, 1], [], []>} : vector<8x8xf32>, vector<8x8xf32>, vector<8x8xf32> -> vector<8x8xf32>
    %829 = vector.extract_strided_slice %801 {offsets = [0, 8], sizes = [8, 8], strides = [1, 1]} : vector<8x32xf32> to vector<8x8xf32>
    %830 = vector.extract_strided_slice %805 {offsets = [0, 8], sizes = [8, 8], strides = [1, 1]} : vector<8x32xf32> to vector<8x8xf32>
    %831 = vector.extract_strided_slice %806 {offsets = [0, 8], sizes = [8, 8], strides = [1, 1]} : vector<8x32xf32> to vector<8x8xf32>
    %832 = tpu.transpose %830, [1, 0] : vector<8x8xf32> -> vector<8x8xf32>
    %cst_348 = arith.constant dense<0.000000e+00> : vector<8x8xf32>
    %833 = tpu.matmul %829, %832, %cst_348 {dimension_numbers = #tpu.dot_dimension_numbers<[1], [0], [0], [1], [0, 0, 1, 1], [], []>} : vector<8x8xf32>, vector<8x8xf32>, vector<8x8xf32> -> vector<8x8xf32>
    %cst_349 = arith.constant 0.353553385 : f32
    %834 = vector.broadcast %cst_349 : f32 to vector<8x8xf32>
    %835 = arith.mulf %833, %834 : vector<8x8xf32>
    %cst_350 = arith.constant -1.000000e+30 : f32
    %836 = vector.shape_cast %3 : vector<1x8xi1> to vector<1x8xi1>
    %837 = vector.broadcast %836 : vector<1x8xi1> to vector<8x8xi1>
    %838 = vector.broadcast %cst_350 : f32 to vector<8x8xf32>
    %839 = arith.select %837, %835, %838 : vector<8x8xi1>, vector<8x8xf32>
    %cst_351 = arith.constant dense<0xFF800000> : vector<8xf32>
    %840 = vector.multi_reduction <maximumf>, %839, %cst_351 [1] : vector<8x8xf32> to vector<8xf32>
    %841 = vector.shape_cast %840 : vector<8xf32> to vector<8x1xf32>
    %842 = vector.broadcast %841 : vector<8x1xf32> to vector<8x8xf32>
    %843 = arith.subf %839, %842 : vector<8x8xf32>
    %844 = math.exp %843 : vector<8x8xf32>
    %cst_352 = arith.constant dense<0.000000e+00> : vector<8xf32>
    %845 = vector.multi_reduction <add>, %844, %cst_352 [1] : vector<8x8xf32> to vector<8xf32>
    %846 = vector.shape_cast %845 : vector<8xf32> to vector<8x1xf32>
    %847 = tpu.reciprocal %846 {approx = true} : vector<8x1xf32> -> vector<8x1xf32>
    %848 = vector.broadcast %847 : vector<8x1xf32> to vector<8x8xf32>
    %849 = arith.mulf %844, %848 : vector<8x8xf32>
    %cst_353 = arith.constant dense<0.000000e+00> : vector<8x8xf32>
    %850 = tpu.matmul %849, %831, %cst_353 {dimension_numbers = #tpu.dot_dimension_numbers<[1], [0], [0], [1], [0, 0, 1, 1], [], []>} : vector<8x8xf32>, vector<8x8xf32>, vector<8x8xf32> -> vector<8x8xf32>
    %851 = vector.extract_strided_slice %801 {offsets = [0, 16], sizes = [8, 8], strides = [1, 1]} : vector<8x32xf32> to vector<8x8xf32>
    %852 = vector.extract_strided_slice %805 {offsets = [0, 16], sizes = [8, 8], strides = [1, 1]} : vector<8x32xf32> to vector<8x8xf32>
    %853 = vector.extract_strided_slice %806 {offsets = [0, 16], sizes = [8, 8], strides = [1, 1]} : vector<8x32xf32> to vector<8x8xf32>
    %854 = tpu.transpose %852, [1, 0] : vector<8x8xf32> -> vector<8x8xf32>
    %cst_354 = arith.constant dense<0.000000e+00> : vector<8x8xf32>
    %855 = tpu.matmul %851, %854, %cst_354 {dimension_numbers = #tpu.dot_dimension_numbers<[1], [0], [0], [1], [0, 0, 1, 1], [], []>} : vector<8x8xf32>, vector<8x8xf32>, vector<8x8xf32> -> vector<8x8xf32>
    %cst_355 = arith.constant 0.353553385 : f32
    %856 = vector.broadcast %cst_355 : f32 to vector<8x8xf32>
    %857 = arith.mulf %855, %856 : vector<8x8xf32>
    %cst_356 = arith.constant -1.000000e+30 : f32
    %858 = vector.shape_cast %3 : vector<1x8xi1> to vector<1x8xi1>
    %859 = vector.broadcast %858 : vector<1x8xi1> to vector<8x8xi1>
    %860 = vector.broadcast %cst_356 : f32 to vector<8x8xf32>
    %861 = arith.select %859, %857, %860 : vector<8x8xi1>, vector<8x8xf32>
    %cst_357 = arith.constant dense<0xFF800000> : vector<8xf32>
    %862 = vector.multi_reduction <maximumf>, %861, %cst_357 [1] : vector<8x8xf32> to vector<8xf32>
    %863 = vector.shape_cast %862 : vector<8xf32> to vector<8x1xf32>
    %864 = vector.broadcast %863 : vector<8x1xf32> to vector<8x8xf32>
    %865 = arith.subf %861, %864 : vector<8x8xf32>
    %866 = math.exp %865 : vector<8x8xf32>
    %cst_358 = arith.constant dense<0.000000e+00> : vector<8xf32>
    %867 = vector.multi_reduction <add>, %866, %cst_358 [1] : vector<8x8xf32> to vector<8xf32>
    %868 = vector.shape_cast %867 : vector<8xf32> to vector<8x1xf32>
    %869 = tpu.reciprocal %868 {approx = true} : vector<8x1xf32> -> vector<8x1xf32>
    %870 = vector.broadcast %869 : vector<8x1xf32> to vector<8x8xf32>
    %871 = arith.mulf %866, %870 : vector<8x8xf32>
    %cst_359 = arith.constant dense<0.000000e+00> : vector<8x8xf32>
    %872 = tpu.matmul %871, %853, %cst_359 {dimension_numbers = #tpu.dot_dimension_numbers<[1], [0], [0], [1], [0, 0, 1, 1], [], []>} : vector<8x8xf32>, vector<8x8xf32>, vector<8x8xf32> -> vector<8x8xf32>
    %873 = vector.extract_strided_slice %801 {offsets = [0, 24], sizes = [8, 8], strides = [1, 1]} : vector<8x32xf32> to vector<8x8xf32>
    %874 = vector.extract_strided_slice %805 {offsets = [0, 24], sizes = [8, 8], strides = [1, 1]} : vector<8x32xf32> to vector<8x8xf32>
    %875 = vector.extract_strided_slice %806 {offsets = [0, 24], sizes = [8, 8], strides = [1, 1]} : vector<8x32xf32> to vector<8x8xf32>
    %876 = tpu.transpose %874, [1, 0] : vector<8x8xf32> -> vector<8x8xf32>
    %cst_360 = arith.constant dense<0.000000e+00> : vector<8x8xf32>
    %877 = tpu.matmul %873, %876, %cst_360 {dimension_numbers = #tpu.dot_dimension_numbers<[1], [0], [0], [1], [0, 0, 1, 1], [], []>} : vector<8x8xf32>, vector<8x8xf32>, vector<8x8xf32> -> vector<8x8xf32>
    %cst_361 = arith.constant 0.353553385 : f32
    %878 = vector.broadcast %cst_361 : f32 to vector<8x8xf32>
    %879 = arith.mulf %877, %878 : vector<8x8xf32>
    %cst_362 = arith.constant -1.000000e+30 : f32
    %880 = vector.shape_cast %3 : vector<1x8xi1> to vector<1x8xi1>
    %881 = vector.broadcast %880 : vector<1x8xi1> to vector<8x8xi1>
    %882 = vector.broadcast %cst_362 : f32 to vector<8x8xf32>
    %883 = arith.select %881, %879, %882 : vector<8x8xi1>, vector<8x8xf32>
    %cst_363 = arith.constant dense<0xFF800000> : vector<8xf32>
    %884 = vector.multi_reduction <maximumf>, %883, %cst_363 [1] : vector<8x8xf32> to vector<8xf32>
    %885 = vector.shape_cast %884 : vector<8xf32> to vector<8x1xf32>
    %886 = vector.broadcast %885 : vector<8x1xf32> to vector<8x8xf32>
    %887 = arith.subf %883, %886 : vector<8x8xf32>
    %888 = math.exp %887 : vector<8x8xf32>
    %cst_364 = arith.constant dense<0.000000e+00> : vector<8xf32>
    %889 = vector.multi_reduction <add>, %888, %cst_364 [1] : vector<8x8xf32> to vector<8xf32>
    %890 = vector.shape_cast %889 : vector<8xf32> to vector<8x1xf32>
    %891 = tpu.reciprocal %890 {approx = true} : vector<8x1xf32> -> vector<8x1xf32>
    %892 = vector.broadcast %891 : vector<8x1xf32> to vector<8x8xf32>
    %893 = arith.mulf %888, %892 : vector<8x8xf32>
    %cst_365 = arith.constant dense<0.000000e+00> : vector<8x8xf32>
    %894 = tpu.matmul %893, %875, %cst_365 {dimension_numbers = #tpu.dot_dimension_numbers<[1], [0], [0], [1], [0, 0, 1, 1], [], []>} : vector<8x8xf32>, vector<8x8xf32>, vector<8x8xf32> -> vector<8x8xf32>
    %895 = tpu.concatenate %828, %850, %872, %894 in 1 : vector<8x8xf32>, vector<8x8xf32>, vector<8x8xf32>, vector<8x8xf32> -> vector<8x32xf32>
    %cst_366 = arith.constant dense<0.000000e+00> : vector<8x32xf32>
    %896 = tpu.matmul %895, %796, %cst_366 {dimension_numbers = #tpu.dot_dimension_numbers<[1], [0], [0], [1], [0, 0, 1, 1], [], []>} : vector<8x32xf32>, vector<32x32xf32>, vector<8x32xf32> -> vector<8x32xf32>
    %897 = vector.broadcast %798 : vector<1x32xf32> to vector<8x32xf32>
    %898 = arith.addf %896, %897 : vector<8x32xf32>
    %899 = arith.addf %786, %898 : vector<8x32xf32>
    %cst_367 = arith.constant dense<0.000000e+00> : vector<8xf32>
    %900 = vector.multi_reduction <add>, %899, %cst_367 [1] : vector<8x32xf32> to vector<8xf32>
    %901 = vector.shape_cast %900 : vector<8xf32> to vector<8x1xf32>
    %cst_368 = arith.constant 3.200000e+01 : f32
    %902 = vector.broadcast %cst_368 : f32 to vector<8x1xf32>
    %903 = arith.divf %901, %902 : vector<8x1xf32>
    %904 = vector.broadcast %903 : vector<8x1xf32> to vector<8x32xf32>
    %905 = arith.subf %899, %904 : vector<8x32xf32>
    %906 = arith.mulf %905, %905 : vector<8x32xf32>
    %cst_369 = arith.constant dense<0.000000e+00> : vector<8xf32>
    %907 = vector.multi_reduction <add>, %906, %cst_369 [1] : vector<8x32xf32> to vector<8xf32>
    %908 = vector.shape_cast %907 : vector<8xf32> to vector<8x1xf32>
    %cst_370 = arith.constant 3.200000e+01 : f32
    %909 = vector.broadcast %cst_370 : f32 to vector<8x1xf32>
    %910 = arith.divf %908, %909 : vector<8x1xf32>
    %cst_371 = arith.constant 9.99999974E-6 : f32
    %911 = vector.broadcast %cst_371 : f32 to vector<8x1xf32>
    %912 = arith.addf %910, %911 : vector<8x1xf32>
    %913 = math.rsqrt %912 : vector<8x1xf32>
    %914 = vector.broadcast %913 : vector<8x1xf32> to vector<8x32xf32>
    %915 = arith.mulf %905, %914 : vector<8x32xf32>
    %916 = vector.broadcast %665 : vector<1x32xf32> to vector<8x32xf32>
    %917 = arith.mulf %915, %916 : vector<8x32xf32>
    %918 = vector.broadcast %667 : vector<1x32xf32> to vector<8x32xf32>
    %919 = arith.addf %917, %918 : vector<8x32xf32>
    %c1_372 = arith.constant 1 : index
    %c0_373 = arith.constant 0 : index
    %c0_374 = arith.constant 0 : index
    %920 = vector.load %arg25[%c1_372, %c0_373, %c0_374] : memref<2x32x64xf32, #tpu.memory_space<vmem>>, vector<1x32x64xf32>
    %921 = vector.shape_cast %920 : vector<1x32x64xf32> to vector<32x64xf32>
    %cst_375 = arith.constant dense<0.000000e+00> : vector<8x64xf32>
    %922 = tpu.matmul %919, %921, %cst_375 {dimension_numbers = #tpu.dot_dimension_numbers<[1], [0], [0], [1], [0, 0, 1, 1], [], []>} : vector<8x32xf32>, vector<32x64xf32>, vector<8x64xf32> -> vector<8x64xf32>
    %c1_376 = arith.constant 1 : index
    %c0_377 = arith.constant 0 : index
    %c0_378 = arith.constant 0 : index
    %923 = vector.load %arg26[%c1_376, %c0_377, %c0_378] : memref<2x1x64xf32, #tpu.memory_space<vmem>>, vector<1x1x64xf32>
    %924 = vector.shape_cast %923 : vector<1x1x64xf32> to vector<1x64xf32>
    %925 = vector.broadcast %924 : vector<1x64xf32> to vector<8x64xf32>
    %926 = arith.addf %922, %925 : vector<8x64xf32>
    %cst_379 = arith.constant 5.000000e-01 : f32
    %927 = vector.broadcast %cst_379 : f32 to vector<8x64xf32>
    %928 = arith.mulf %927, %926 : vector<8x64xf32>
    %cst_380 = arith.constant 0.707106769 : f32
    %929 = vector.broadcast %cst_380 : f32 to vector<8x64xf32>
    %930 = arith.mulf %926, %929 : vector<8x64xf32>
    %931 = math.erf %930 : vector<8x64xf32>
    %cst_381 = arith.constant 1.000000e+00 : f32
    %932 = vector.broadcast %cst_381 : f32 to vector<8x64xf32>
    %933 = arith.addf %932, %931 : vector<8x64xf32>
    %934 = arith.mulf %928, %933 : vector<8x64xf32>
    %c1_382 = arith.constant 1 : index
    %c0_383 = arith.constant 0 : index
    %c0_384 = arith.constant 0 : index
    %935 = vector.load %arg27[%c1_382, %c0_383, %c0_384] : memref<2x64x32xf32, #tpu.memory_space<vmem>>, vector<1x64x32xf32>
    %936 = vector.shape_cast %935 : vector<1x64x32xf32> to vector<64x32xf32>
    %cst_385 = arith.constant dense<0.000000e+00> : vector<8x32xf32>
    %937 = tpu.matmul %934, %936, %cst_385 {dimension_numbers = #tpu.dot_dimension_numbers<[1], [0], [0], [1], [0, 0, 1, 1], [], []>} : vector<8x64xf32>, vector<64x32xf32>, vector<8x32xf32> -> vector<8x32xf32>
    %c1_386 = arith.constant 1 : index
    %c0_387 = arith.constant 0 : index
    %c0_388 = arith.constant 0 : index
    %938 = vector.load %arg28[%c1_386, %c0_387, %c0_388] : memref<2x1x32xf32, #tpu.memory_space<vmem>>, vector<1x1x32xf32>
    %939 = vector.shape_cast %938 : vector<1x1x32xf32> to vector<1x32xf32>
    %940 = vector.broadcast %939 : vector<1x32xf32> to vector<8x32xf32>
    %941 = arith.addf %937, %940 : vector<8x32xf32>
    %942 = arith.addf %919, %941 : vector<8x32xf32>
    %cst_389 = arith.constant dense<0.000000e+00> : vector<8xf32>
    %943 = vector.multi_reduction <add>, %942, %cst_389 [1] : vector<8x32xf32> to vector<8xf32>
    %944 = vector.shape_cast %943 : vector<8xf32> to vector<8x1xf32>
    %cst_390 = arith.constant 3.200000e+01 : f32
    %945 = vector.broadcast %cst_390 : f32 to vector<8x1xf32>
    %946 = arith.divf %944, %945 : vector<8x1xf32>
    %947 = vector.broadcast %946 : vector<8x1xf32> to vector<8x32xf32>
    %948 = arith.subf %942, %947 : vector<8x32xf32>
    %949 = arith.mulf %948, %948 : vector<8x32xf32>
    %cst_391 = arith.constant dense<0.000000e+00> : vector<8xf32>
    %950 = vector.multi_reduction <add>, %949, %cst_391 [1] : vector<8x32xf32> to vector<8xf32>
    %951 = vector.shape_cast %950 : vector<8xf32> to vector<8x1xf32>
    %cst_392 = arith.constant 3.200000e+01 : f32
    %952 = vector.broadcast %cst_392 : f32 to vector<8x1xf32>
    %953 = arith.divf %951, %952 : vector<8x1xf32>
    %cst_393 = arith.constant 9.99999974E-6 : f32
    %954 = vector.broadcast %cst_393 : f32 to vector<8x1xf32>
    %955 = arith.addf %953, %954 : vector<8x1xf32>
    %956 = math.rsqrt %955 : vector<8x1xf32>
    %957 = vector.broadcast %956 : vector<8x1xf32> to vector<8x32xf32>
    %958 = arith.mulf %948, %957 : vector<8x32xf32>
    %959 = vector.broadcast %665 : vector<1x32xf32> to vector<8x32xf32>
    %960 = arith.mulf %958, %959 : vector<8x32xf32>
    %961 = vector.broadcast %667 : vector<1x32xf32> to vector<8x32xf32>
    %962 = arith.addf %960, %961 : vector<8x32xf32>
    %c0_394 = arith.constant 0 : index
    %c0_395 = arith.constant 0 : index
    %963 = vector.load %arg31[%c0_394, %c0_395] : memref<32x48xf32, #tpu.memory_space<vmem>>, vector<32x48xf32>
    %cst_396 = arith.constant dense<0.000000e+00> : vector<8x48xf32>
    %964 = tpu.matmul %962, %963, %cst_396 {dimension_numbers = #tpu.dot_dimension_numbers<[1], [0], [0], [1], [0, 0, 1, 1], [], []>} : vector<8x32xf32>, vector<32x48xf32>, vector<8x48xf32> -> vector<8x48xf32>
    %c0_397 = arith.constant 0 : index
    %c0_398 = arith.constant 0 : index
    %965 = vector.load %arg32[%c0_397, %c0_398] : memref<1x48xf32, #tpu.memory_space<vmem>>, vector<1x48xf32>
    %966 = vector.broadcast %965 : vector<1x48xf32> to vector<8x48xf32>
    %967 = arith.addf %964, %966 : vector<8x48xf32>
    %c0_399 = arith.constant 0 : index
    %c0_400 = arith.constant 0 : index
    %c0_401 = arith.constant 0 : index
    %968 = vector.load %arg33[%c0_399, %c0_400, %c0_401] : memref<1x8x48xf32, #tpu.memory_space<vmem>>, vector<1x8x48xf32>
    %969 = vector.shape_cast %968 : vector<1x8x48xf32> to vector<8x48xf32>
    %970 = vector.shape_cast %967 : vector<8x48xf32> to vector<1x8x48xf32>
    tpu.vector_store %arg33[%c0_399, %c0_400, %c0_401], %970 {strides = array<i32>} : memref<1x8x48xf32, #tpu.memory_space<vmem>>, vector<1x8x48xf32>,
    return
  }
  func.func @transform_0(%arg0: i32) -> (i32, i32, i32) {
    %c0_i32 = arith.constant 0 : i32
    %c0_i32_0 = arith.constant 0 : i32
    %c0_i32_1 = arith.constant 0 : i32
    return %arg0, %c0_i32, %c0_i32_0 : i32, i32, i32
  }
  func.func @transform_1(%arg0: i32) -> (i32, i32, i32) {
    %c0_i32 = arith.constant 0 : i32
    %c0_i32_0 = arith.constant 0 : i32
    %c0_i32_1 = arith.constant 0 : i32
    return %arg0, %c0_i32, %c0_i32_0 : i32, i32, i32
  }
  func.func @transform_2(%arg0: i32) -> (i32, i32, i32) {
    %c0_i32 = arith.constant 0 : i32
    %c0_i32_0 = arith.constant 0 : i32
    %c0_i32_1 = arith.constant 0 : i32
    return %arg0, %c0_i32, %c0_i32_0 : i32, i32, i32
  }
  func.func @transform_3(%arg0: i32) -> (i32, i32, i32) {
    %c0_i32 = arith.constant 0 : i32
    %c0_i32_0 = arith.constant 0 : i32
    %c0_i32_1 = arith.constant 0 : i32
    return %arg0, %c0_i32, %c0_i32_0 : i32, i32, i32
  }
  func.func @transform_4(%arg0: i32) -> (i32, i32, i32) {
    %c0_i32 = arith.constant 0 : i32
    %c0_i32_0 = arith.constant 0 : i32
    %c0_i32_1 = arith.constant 0 : i32
    %c0_i32_2 = arith.constant 0 : i32
    return %c0_i32, %c0_i32_0, %c0_i32_1 : i32, i32, i32
  }
  func.func @transform_5(%arg0: i32) -> (i32, i32, i32) {
    %c0_i32 = arith.constant 0 : i32
    %c0_i32_0 = arith.constant 0 : i32
    %c0_i32_1 = arith.constant 0 : i32
    %c0_i32_2 = arith.constant 0 : i32
    return %c0_i32, %c0_i32_0, %c0_i32_1 : i32, i32, i32
  }
  func.func @transform_6(%arg0: i32) -> (i32, i32, i32) {
    %c0_i32 = arith.constant 0 : i32
    %c0_i32_0 = arith.constant 0 : i32
    %c0_i32_1 = arith.constant 0 : i32
    %c0_i32_2 = arith.constant 0 : i32
    return %c0_i32, %c0_i32_0, %c0_i32_1 : i32, i32, i32
  }
  func.func @transform_7(%arg0: i32) -> (i32, i32, i32) {
    %c0_i32 = arith.constant 0 : i32
    %c0_i32_0 = arith.constant 0 : i32
    %c0_i32_1 = arith.constant 0 : i32
    %c0_i32_2 = arith.constant 0 : i32
    return %c0_i32, %c0_i32_0, %c0_i32_1 : i32, i32, i32
  }
  func.func @transform_8(%arg0: i32) -> (i32, i32, i32) {
    %c0_i32 = arith.constant 0 : i32
    %c0_i32_0 = arith.constant 0 : i32
    %c0_i32_1 = arith.constant 0 : i32
    %c0_i32_2 = arith.constant 0 : i32
    return %c0_i32, %c0_i32_0, %c0_i32_1 : i32, i32, i32
  }
  func.func @transform_9(%arg0: i32) -> (i32, i32, i32) {
    %c0_i32 = arith.constant 0 : i32
    %c0_i32_0 = arith.constant 0 : i32
    %c0_i32_1 = arith.constant 0 : i32
    %c0_i32_2 = arith.constant 0 : i32
    return %c0_i32, %c0_i32_0, %c0_i32_1 : i32, i32, i32
  }
  func.func @transform_10(%arg0: i32) -> (i32, i32, i32) {
    %c0_i32 = arith.constant 0 : i32
    %c0_i32_0 = arith.constant 0 : i32
    %c0_i32_1 = arith.constant 0 : i32
    %c0_i32_2 = arith.constant 0 : i32
    return %c0_i32, %c0_i32_0, %c0_i32_1 : i32, i32, i32
  }
  func.func @transform_11(%arg0: i32) -> (i32, i32, i32) {
    %c0_i32 = arith.constant 0 : i32
    %c0_i32_0 = arith.constant 0 : i32
    %c0_i32_1 = arith.constant 0 : i32
    %c0_i32_2 = arith.constant 0 : i32
    return %c0_i32, %c0_i32_0, %c0_i32_1 : i32, i32, i32
  }
  func.func @transform_12(%arg0: i32) -> (i32, i32, i32) {
    %c0_i32 = arith.constant 0 : i32
    %c0_i32_0 = arith.constant 0 : i32
    %c0_i32_1 = arith.constant 0 : i32
    %c0_i32_2 = arith.constant 0 : i32
    return %c0_i32, %c0_i32_0, %c0_i32_1 : i32, i32, i32
  }
  func.func @transform_13(%arg0: i32) -> (i32, i32, i32) {
    %c0_i32 = arith.constant 0 : i32
    %c0_i32_0 = arith.constant 0 : i32
    %c0_i32_1 = arith.constant 0 : i32
    %c0_i32_2 = arith.constant 0 : i32
    return %c0_i32, %c0_i32_0, %c0_i32_1 : i32, i32, i32
  }
  func.func @transform_14(%arg0: i32) -> (i32, i32, i32) {
    %c0_i32 = arith.constant 0 : i32
    %c0_i32_0 = arith.constant 0 : i32
    %c0_i32_1 = arith.constant 0 : i32
    %c0_i32_2 = arith.constant 0 : i32
    return %c0_i32, %c0_i32_0, %c0_i32_1 : i32, i32, i32
  }
  func.func @transform_15(%arg0: i32) -> (i32, i32, i32) {
    %c0_i32 = arith.constant 0 : i32
    %c0_i32_0 = arith.constant 0 : i32
    %c0_i32_1 = arith.constant 0 : i32
    %c0_i32_2 = arith.constant 0 : i32
    return %c0_i32, %c0_i32_0, %c0_i32_1 : i32, i32, i32
  }
  func.func @transform_16(%arg0: i32) -> (i32, i32, i32) {
    %c0_i32 = arith.constant 0 : i32
    %c0_i32_0 = arith.constant 0 : i32
    %c0_i32_1 = arith.constant 0 : i32
    %c0_i32_2 = arith.constant 0 : i32
    return %c0_i32, %c0_i32_0, %c0_i32_1 : i32, i32, i32
  }
  func.func @transform_17(%arg0: i32) -> (i32, i32, i32) {
    %c0_i32 = arith.constant 0 : i32
    %c0_i32_0 = arith.constant 0 : i32
    %c0_i32_1 = arith.constant 0 : i32
    %c0_i32_2 = arith.constant 0 : i32
    return %c0_i32, %c0_i32_0, %c0_i32_1 : i32, i32, i32
  }
  func.func @transform_18(%arg0: i32) -> (i32, i32, i32) {
    %c0_i32 = arith.constant 0 : i32
    %c0_i32_0 = arith.constant 0 : i32
    %c0_i32_1 = arith.constant 0 : i32
    %c0_i32_2 = arith.constant 0 : i32
    return %c0_i32, %c0_i32_0, %c0_i32_1 : i32, i32, i32
  }
  func.func @transform_19(%arg0: i32) -> (i32, i32, i32) {
    %c0_i32 = arith.constant 0 : i32
    %c0_i32_0 = arith.constant 0 : i32
    %c0_i32_1 = arith.constant 0 : i32
    %c0_i32_2 = arith.constant 0 : i32
    return %c0_i32, %c0_i32_0, %c0_i32_1 : i32, i32, i32
  }
  func.func @transform_20(%arg0: i32) -> (i32, i32, i32) {
    %c0_i32 = arith.constant 0 : i32
    %c0_i32_0 = arith.constant 0 : i32
    %c0_i32_1 = arith.constant 0 : i32
    %c0_i32_2 = arith.constant 0 : i32
    return %c0_i32, %c0_i32_0, %c0_i32_1 : i32, i32, i32
  }
  func.func @transform_21(%arg0: i32) -> (i32, i32, i32) {
    %c0_i32 = arith.constant 0 : i32
    %c0_i32_0 = arith.constant 0 : i32
    %c0_i32_1 = arith.constant 0 : i32
    %c0_i32_2 = arith.constant 0 : i32
    return %c0_i32, %c0_i32_0, %c0_i32_1 : i32, i32, i32
  }
  func.func @transform_22(%arg0: i32) -> (i32, i32, i32) {
    %c0_i32 = arith.constant 0 : i32
    %c0_i32_0 = arith.constant 0 : i32
    %c0_i32_1 = arith.constant 0 : i32
    %c0_i32_2 = arith.constant 0 : i32
    return %c0_i32, %c0_i32_0, %c0_i32_1 : i32, i32, i32
  }
  func.func @transform_23(%arg0: i32) -> (i32, i32, i32) {
    %c0_i32 = arith.constant 0 : i32
    %c0_i32_0 = arith.constant 0 : i32
    %c0_i32_1 = arith.constant 0 : i32
    %c0_i32_2 = arith.constant 0 : i32
    return %c0_i32, %c0_i32_0, %c0_i32_1 : i32, i32, i32
  }
  func.func @transform_24(%arg0: i32) -> (i32, i32, i32) {
    %c0_i32 = arith.constant 0 : i32
    %c0_i32_0 = arith.constant 0 : i32
    %c0_i32_1 = arith.constant 0 : i32
    %c0_i32_2 = arith.constant 0 : i32
    return %c0_i32, %c0_i32_0, %c0_i32_1 : i32, i32, i32
  }
  func.func @transform_25(%arg0: i32) -> (i32, i32, i32) {
    %c0_i32 = arith.constant 0 : i32
    %c0_i32_0 = arith.constant 0 : i32
    %c0_i32_1 = arith.constant 0 : i32
    %c0_i32_2 = arith.constant 0 : i32
    return %c0_i32, %c0_i32_0, %c0_i32_1 : i32, i32, i32
  }
  func.func @transform_26(%arg0: i32) -> (i32, i32, i32) {
    %c0_i32 = arith.constant 0 : i32
    %c0_i32_0 = arith.constant 0 : i32
    %c0_i32_1 = arith.constant 0 : i32
    %c0_i32_2 = arith.constant 0 : i32
    return %c0_i32, %c0_i32_0, %c0_i32_1 : i32, i32, i32
  }
  func.func @transform_27(%arg0: i32) -> (i32, i32, i32) {
    %c0_i32 = arith.constant 0 : i32
    %c0_i32_0 = arith.constant 0 : i32
    %c0_i32_1 = arith.constant 0 : i32
    %c0_i32_2 = arith.constant 0 : i32
    return %c0_i32, %c0_i32_0, %c0_i32_1 : i32, i32, i32
  }
  func.func @transform_28(%arg0: i32) -> (i32, i32, i32) {
    %c0_i32 = arith.constant 0 : i32
    %c0_i32_0 = arith.constant 0 : i32
    %c0_i32_1 = arith.constant 0 : i32
    %c0_i32_2 = arith.constant 0 : i32
    return %c0_i32, %c0_i32_0, %c0_i32_1 : i32, i32, i32
  }
  func.func @transform_29(%arg0: i32) -> (i32, i32, i32) {
    %c0_i32 = arith.constant 0 : i32
    %c0_i32_0 = arith.constant 0 : i32
    %c0_i32_1 = arith.constant 0 : i32
    %c0_i32_2 = arith.constant 0 : i32
    return %c0_i32, %c0_i32_0, %c0_i32_1 : i32, i32, i32
  }
  func.func @transform_30(%arg0: i32) -> (i32, i32) {
    %c0_i32 = arith.constant 0 : i32
    %c0_i32_0 = arith.constant 0 : i32
    %c0_i32_1 = arith.constant 0 : i32
    return %c0_i32, %c0_i32_0 : i32, i32
  }
  func.func @transform_31(%arg0: i32) -> (i32, i32) {
    %c0_i32 = arith.constant 0 : i32
    %c0_i32_0 = arith.constant 0 : i32
    %c0_i32_1 = arith.constant 0 : i32
    return %c0_i32, %c0_i32_0 : i32, i32
  }
  func.func @transform_32(%arg0: i32) -> (i32, i32, i32) {
    %c0_i32 = arith.constant 0 : i32
    %c0_i32_0 = arith.constant 0 : i32
    %c0_i32_1 = arith.constant 0 : i32
    return %arg0, %c0_i32, %c0_i32_0 : i32, i32, i32
  }
}

</mosaic_0001>

<bundles_post_ra>
// kernel: _lambda_.1
= control target key start
LH: loop header
LB: loop body
LE: loop exit
PB: predicated region body
PF: predicated region fallthrough
CT: control target
= control target key end

     0   :  { %s9918_s6 = smov 1   ;;  %s9919_s10 = smov 2   ;;  %s11363_s0 = inlined_call_operand.smem [shape: u32[33], index: -1, kind: input, shape index: {}] }
   0x1   :  { %s9997_s5 = sld [smem:[%s11363_s0]]   ;;  %s9920_s14 = smov 3  }
   0x2   :  { %s10002_s9 = sld [smem:[%s11363_s0 + %s9918_s6]]   ;;  %s9921_s18 = smov 4  }
   0x3   :  { %s10007_s13 = sld [smem:[%s11363_s0 + %s9919_s10]]   ;;  %s9922_s22 = smov 5  }
   0x4   :  { %s10012_s17 = sld [smem:[%s11363_s0 + %s9920_s14]]   ;;  %s9923_s26 = smov 6  }
   0x5   :  { %s10017_s21 = sld [smem:[%s11363_s0 + %s9921_s18]]   ;;  %s9924_s30 = smov 7  }
   0x6   :  { %s10022_s25 = sld [smem:[%s11363_s0 + %s9922_s22]]   ;;  %s9925_s4 = smov 8  }
   0x7   :  { %11436 = sst [smem:[#allocation39_spill]] %s9997_s5  ;;  %s9926_s10 = smov 9  }
   0x8   :  { %11437 = sst [smem:[#allocation40_spill]] %s10002_s9  ;;  %s9927_s15 = smov 10  }
   0x9   :  { %11438 = sst [smem:[#allocation41_spill]] %s10007_s13  ;;  %s9928_s20 = smov 11  }
   0xa   :  { %11439 = sst [smem:[#allocation42_spill]] %s10012_s17  ;;  %s9930_s1 = smov 13  }
   0xb   :  { %11440 = sst [smem:[#allocation43_spill]] %s10017_s21  ;;  %s9931_s7 = smov 14  }
   0xc   :  { %11441 = sst [smem:[#allocation44_spill]] %s10022_s25  ;;  %s9933_s22 = smov 16  }
   0xd   :  { %s10027_s29 = sld [smem:[%s11363_s0 + %s9923_s26]]   ;;  %s9929_s26 = smov 12  }
   0xe   :  { %s10032_s3 = sld [smem:[%s11363_s0 + %s9924_s30]]   ;;  %s9934_s28 = smov 17  }
   0xf   :  { %s10037_s8 = sld [smem:[%s11363_s0 + %s9925_s4]]  }
  0x10   :  { %s10042_s14 = sld [smem:[%s11363_s0 + %s9926_s10]]  }
  0x11   :  { %s10047_s19 = sld [smem:[%s11363_s0 + %s9927_s15]]   ;;  %s9932_s15 = smov 15  }
  0x12   :  { %s10052_s24 = sld [smem:[%s11363_s0 + %s9928_s20]]  }
  0x13   :  { %11442 = sst [smem:[#allocation45_spill]] %s10027_s29 }
  0x14   :  { %11443 = sst [smem:[#allocation46_spill]] %s10032_s3 }
  0x15   :  { %11444 = sst [smem:[#allocation47_spill]] %s10037_s8 }
  0x16   :  { %11445 = sst [smem:[#allocation48_spill]] %s10042_s14 }
  0x17   :  { %11446 = sst [smem:[#allocation49_spill]] %s10047_s19 }
  0x18   :  { %11447 = sst [smem:[#allocation50_spill]] %s10052_s24 }
  0x19   :  { %s10057_s30 = sld [smem:[%s11363_s0 + %s9929_s26]]  }
  0x1a   :  { %s10062_s6 = sld [smem:[%s11363_s0 + %s9930_s1]]  }
  0x1b   :  { %s10067_s12 = sld [smem:[%s11363_s0 + %s9931_s7]]   ;;  %s9935_s7 = smov 18  }
  0x1c   :  { %s10072_s20 = sld [smem:[%s11363_s0 + %s9932_s15]]   ;;  %s9936_s15 = smov 19  }
  0x1d   :  { %s10077_s27 = sld [smem:[%s11363_s0 + %s9933_s22]]   ;;  %s9937_s22 = smov 20  }
  0x1e   :  { %s10082_s4 = sld [smem:[%s11363_s0 + %s9934_s28]]   ;;  %s9938_s28 = smov 21  }
  0x1f   :  { %11448 = sst [smem:[#allocation51_spill]] %s10057_s30 }
  0x20   :  { %11449 = sst [smem:[#allocation52_spill]] %s10062_s6 }
  0x21   :  { %11450 = sst [smem:[#allocation53_spill]] %s10067_s12 }
  0x22   :  { %11451 = sst [smem:[#allocation54_spill]] %s10072_s20 }
  0x23   :  { %11452 = sst [smem:[#allocation55_spill]] %s10077_s27 }
  0x24   :  { %11453 = sst [smem:[#allocation56_spill]] %s10082_s4 }
  0x25   :  { %s10087_s17 = sld [smem:[%s11363_s0 + %s9935_s7]]   ;;  %s9939_s7 = smov 22  }
  0x26   :  { %s10092_s24 = sld [smem:[%s11363_s0 + %s9936_s15]]   ;;  %s9940_s15 = smov 23  }
  0x27   :  { %s10097_s14 = sld [smem:[%s11363_s0 + %s9937_s22]]   ;;  %s9941_s22 = smov 24  }
  0x28   :  { %s10102_s19 = sld [smem:[%s11363_s0 + %s9938_s28]]   ;;  %s9942_s28 = smov 25  }
  0x29   :  { %s10107_s6 = sld [smem:[%s11363_s0 + %s9939_s7]]   ;;  %s9943_s7 = smov 26  }
  0x2a   :  { %s10112_s30 = sld [smem:[%s11363_s0 + %s9940_s15]]   ;;  %s9944_s15 = smov 27  }
  0x2b   :  { %11454 = sst [smem:[#allocation57_spill]] %s10087_s17 }
  0x2c   :  { %s10117_s3 = sld [smem:[%s11363_s0 + %s9941_s22]]   ;;  %s9945_s22 = smov 28  }
  0x2d   :  { %11455 = sst [smem:[#allocation58_spill]] %s10097_s14 }
  0x2e   :  { %11456 = sst [smem:[#allocation59_spill]] %s10102_s19 }
  0x2f   :  { %11457 = sst [smem:[#allocation60_spill]] %s10107_s6 }
  0x30   :  { %s10122_s29 = sld [smem:[%s11363_s0 + %s9942_s28]]   ;;  %s9946_s28 = smov 29  }
  0x31   :  { %s10127_s5 = sld [smem:[%s11363_s0 + %s9943_s7]]   ;;  %s9947_s7 = smov 30  }
  0x32   :  { %11458 = sst [smem:[#allocation61_spill]] %s10117_s3 }
  0x33   :  { %s10132_s25 = sld [smem:[%s11363_s0 + %s9944_s15]]   ;;  %s9948_s15 = smov 31  }
  0x34   :  { %s10137_s13 = sld [smem:[%s11363_s0 + %s9945_s22]]   ;;  %s9949_s22 = smov 32  }
  0x35   :  { %s10142_s21 = sld [smem:[%s11363_s0 + %s9946_s28]]  }
  0x36   :  { %s10152_s9 = sld [smem:[%s11363_s0 + %s9948_s15]]  }
  0x37   :  { %11459 = sst [smem:[#allocation62_spill]] %s10127_s5 }
  0x38   :  { %s10147_s5 = sld [smem:[%s11363_s0 + %s9947_s7]]  }
  0x3a   :  { %11460 = sst [smem:[#allocation63_spill]] %s10137_s13 }
  0x3b   :  { %s10157_s13 = sld [smem:[%s11363_s0 + %s9949_s22]]  }
  0x3c   :  { %11462 = sst [smem:[#allocation65_spill]] %s10152_s9 }
  0x3e   :  { %11461 = sst [smem:[#allocation64_spill]] %s10147_s5 }
  0x3f   :  { %70 = vsyncpa [#allocation3], 0 }
  0x40   :  { %71 = vsyncpa [#allocation6], 0 }
  0x41   :  { %72 = vsyncpa [#allocation9], 0 }
  0x42   :  { %73 = vsyncpa [#allocation12], 0 }
  0x43   :  { %74 = vsyncpa [#allocation15], 0 }
  0x44   :  { %75 = vsyncpa [#allocation18], 0 }
  0x45   :  { %76 = vsyncpa [#allocation21], 0 }
  0x46   :  { %77 = vsyncpa [#allocation24], 0 }
  0x47   :  { %78 = vsyncpa [#allocation27], 0 }
  0x48   :  { %79 = vsyncpa [#allocation4], 0 }
  0x49   :  { %81 = vsyncpa [#allocation4 + $0x1], 0  ;;  %s10159_s28 = smov 0   ;;  %s10161_s1 = smov 0  }
  0x4a   :  { %s10163_s2 = smov 0   ;;  %s10165_s7 = smov 0  }
  0x4b   :  { %11463 = sst [smem:[#allocation66_spill]] %s10165_s7 }
  0x4c LB: > { %s11465_s20 = sld [smem:[#allocation54_spill]]  ;;  %s11466_s19 = sld [smem:[#allocation59_spill]]  ;;  %s9912_s2 = sphi %s10163_s2, %s11554_s2   ;;  %s9908_s1 = sphi %s10161_s1, %s11556_s1   ;;  %s9904_s28 = sphi %s10159_s28, %s11555_s28  }
  0x4d   : > { %s11467_s17 = sld [smem:[#allocation57_spill]]  ;;  %s11468_s14 = sld [smem:[#allocation58_spill]] }
  0x4e   : > { %s11469_s9 = sld [smem:[#allocation65_spill]]  ;;  %s11470_s8 = sld [smem:[#allocation47_spill]] }
  0x4f   : > { %s11471_s6 = sld [smem:[#allocation60_spill]]  ;;  %s11472_s5 = sld [smem:[#allocation64_spill]] }
  0x50   : > { %s11473_s4 = sld [smem:[#allocation56_spill]]  ;;  %s11474_s3 = sld [smem:[#allocation61_spill]] }
  0x51   : > { %s11475_s27 = sld [smem:[#allocation55_spill]]  ;;  %s11476_s12 = sld [smem:[#allocation53_spill]] }
  0x52   : > { %s11477_s7 = sld [smem:[#allocation66_spill]]  ;;  %11479 = sst [smem:[#allocation67_spill]] %s9912_s2 }
  0x53   : > { %11478 = sst [smem:[#allocation66_spill]] %s9904_s28  ;;  %s786_s15 = sadd.s32 1, %s9912_s2 }
  0x54   : > { %p796_p0 = scmp.ne.s32.totalorder %s9912_s2, %s9908_s1  ;;  %p802_p3 = scmp.ne.s32.totalorder %s9908_s1, %s9904_s28 }
  0x57   : > { %s9370_s28 = scalar_lea.hbm %s11476_s12, 1024 }
  0x58   : > { %11480 = sst [smem:[#allocation68_spill]] %s11477_s7  ;;  %s10180_s0 = sadd.s32 4294967295, %s11477_s7  }
  0x59   : > { %s7877_s10 = sadd.s32 4294967294, %s11477_s7   ;;  %s10184_s11 = sadd.s32 1, %s11477_s7  }
  0x5a   : > { %11481 = sst [smem:[#allocation69_spill]] %s10184_s11  ;;  %s783_s16 = ssub.s32 %s11477_s7, %s10184_s11 }
  0x5b   : > { %p784_p1 = scmp.eq.s32.totalorder %s783_s16, 0  ;;  %p797_p2 = scmp.eq.s32.totalorder %s10180_s0, 1 }
  0x5c   : > { %p803_p4 = scmp.eq.s32.totalorder %s7877_s10, 1  ;;  %p7878_p7 = scmp.ge.s32.totalorder %s11477_s7, 1 }
  0x5d   : > { %s10195_s18 = scalar_select %p784_p1, %s9912_s2, %s786_s15  }
  0x5e   : > { %p10197_p5 = por %p797_p2, %p796_p0  ;;  %p10201_p6 = por %p803_p4, %p802_p3 }
  0x5f   : > { %11482 = sst [smem:[#allocation70_spill]] %s10195_s18  ;;  %p810_p8 = scmp.lt.s32.totalorder %s11477_s7, 3 }
  0x60   : > { %s11483_s22 = scalar_select %p10197_p5, 1, 0 }
  0x61   : > { %s11484_s23 = scalar_select %p10201_p6, 1, 0 }
  0x62   : > { %p11380_p9 = scmp.eq.s32.totalorder %s10180_s0, 0  ;;  %p10208_p10 = pnand %p7878_p7, %p810_p8 }
  0x63   : > { %11485 = sst [smem:[#allocation71_spill]] %s11484_s23  ;;  %s9950_s10 = smov [#allocation5]  }
  0x64   : > { %s11486_s26 = scalar_select %p10208_p10, 1, 0 }
  0x65   : > { %p9058_p11 = pneg %p10208_p10  ;;  %s862_s15 = sshll.u32 %s9950_s10, 4  ;;  %s10214_s15 = int_to_ptr.vmem [resolvable:$true] %s862_s15 }
  0x66   : > { %s9951_s18 = smov [#allocation8]   ;;  %s9952_s11 = smov [#allocation11]  }
  0x67   : > { %p10218_p12 = pnand %p11380_p9, %p9058_p11  ;;  %s888_s2 = sshll.u32 %s9951_s18, 4  ;;  %s10222_s2 = int_to_ptr.vmem [resolvable:$true] %s888_s2 }
  0x68   : > { %s10224_s23 = sshll.u32 %s9952_s11, 4  ;;  %p9371_p13 = scmp.ne.s32.totalorder %s11476_s12, %s9370_s28  ;;  %s915_s23 = int_to_ptr.vmem [resolvable:$true] %s10224_s23 }
  0x69   : > { %p10230_p0 = pneg %p10218_p12  ;;  %p9377_p3 = scmp.lt.u32.totalorder %s9370_s28, %s11476_s12 }
  0x6b   : > { %p9373_p1 = pnand %p10230_p0, %p9371_p13 }
  0x6d   : > { %p9374_p2 = pneg %p9373_p1 }
  0x6f   : > { %p9379_p4 = pnand %p9377_p3, %p9374_p2 }
  0x71   : > { %9382 = shalt.err (!%p9379_p4)
}
  0x72   : > { %s9383_s11 = scalar_lea.vmem %s10214_s15, 1024  ;;  %p9391_p9 = scmp.lt.s32.totalorder %s10214_s15, %s10214_s15 }
  0x73   : > { %p9384_p7 = scmp.ne.s32.totalorder %s10214_s15, %s9383_s11  ;;  %p9392_p6 = scmp.lt.s32.totalorder %s9383_s11, %s9383_s11 }
  0x75   : > { %p9386_p8 = pnand %p9384_p7, %p10230_p0  ;;  %p9393_p5 = por %p9392_p6, %p9391_p9 }
  0x77   : > { %p9387_p11 = pneg %p9386_p8 }
  0x79   : > { %p9394_p10 = pnand %p9393_p5, %p9387_p11 }
  0x7b   : > { %9397 = shalt.err (!%p9394_p10)
}
  0x7c   : > { %s11390_s18 = smov 128   ;;  %s11391_s28 = smov 8  }
  0x7d   : > { %9064 = dma.hbm_to_vmem [thread:$0]  (!%p10218_p12), %s11476_s12, 1024, %s10214_s15, [#allocation6], %s11390_s18, %s11390_s18, %s11391_s28  }
  0x7e   : > { %s9398_s7 = scalar_lea.hbm %s11475_s27, 1024 }
  0x7f   : > { %p9399_p13 = scmp.ne.s32.totalorder %s11475_s27, %s9398_s7  ;;  %p9405_p9 = scmp.lt.u32.totalorder %s9398_s7, %s11475_s27 }
  0x81   : > { %p9401_p6 = pnand %p9399_p13, %p10230_p0 }
  0x83   : > { %p9402_p5 = pneg %p9401_p6 }
  0x85   : > { %p9407_p10 = pnand %p9405_p9, %p9402_p5 }
  0x87   : > { %9410 = shalt.err (!%p9407_p10)
}
  0x88   : > { %s9411_s11 = scalar_lea.vmem %s10222_s2, 1024  ;;  %p9419_p4 = scmp.lt.s32.totalorder %s10222_s2, %s10222_s2 }
  0x89   : > { %p9412_p1 = scmp.ne.s32.totalorder %s10222_s2, %s9411_s11  ;;  %p9420_p7 = scmp.lt.s32.totalorder %s9411_s11, %s9411_s11 }
  0x8b   : > { %p9414_p2 = pnand %p9412_p1, %p10230_p0  ;;  %p9421_p8 = por %p9420_p7, %p9419_p4 }
  0x8d   : > { %p9415_p3 = pneg %p9414_p2 }
  0x8f   : > { %p9422_p11 = pnand %p9421_p8, %p9415_p3 }
  0x91   : > { %9425 = shalt.err (!%p9422_p11)
}
  0x92   : > { %9070 = dma.hbm_to_vmem [thread:$0]  (!%p10218_p12), %s11475_s27, 1024, %s10222_s2, [#allocation9], %s11390_s18, %s11390_s18, %s11391_s28  }
  0x93   : > { %s9426_s7 = scalar_lea.hbm %s11467_s17, 1024 }
  0x94   : > { %p9427_p13 = scmp.ne.s32.totalorder %s11467_s17, %s9426_s7  ;;  %p9433_p9 = scmp.lt.u32.totalorder %s9426_s7, %s11467_s17 }
  0x96   : > { %p9429_p6 = pnand %p9427_p13, %p10230_p0 }
  0x98   : > { %p9430_p5 = pneg %p9429_p6 }
  0x9a   : > { %p9435_p10 = pnand %p9433_p9, %p9430_p5 }
  0x9c   : > { %9438 = shalt.err (!%p9435_p10)
}
  0x9d   : > { %s9439_s15 = scalar_lea.vmem %s915_s23, 1024  ;;  %p9447_p4 = scmp.lt.s32.totalorder %s915_s23, %s915_s23 }
  0x9e   : > { %p9440_p1 = scmp.ne.s32.totalorder %s915_s23, %s9439_s15  ;;  %p9448_p7 = scmp.lt.s32.totalorder %s9439_s15, %s9439_s15 }
  0xa0   : > { %p9442_p2 = pnand %p9440_p1, %p10230_p0  ;;  %p9449_p8 = por %p9448_p7, %p9447_p4 }
  0xa2   : > { %p9443_p3 = pneg %p9442_p2 }
  0xa4   : > { %p9450_p11 = pnand %p9449_p8, %p9443_p3 }
  0xa6   : > { %9453 = shalt.err (!%p9450_p11)
}
  0xa7   : > { %9076 = dma.hbm_to_vmem [thread:$0]  (!%p10218_p12), %s11467_s17, 1024, %s915_s23, [#allocation12], %s11390_s18, %s11390_s18, %s11391_s28  }
  0xa8   : > { %s9955_s2 = smov [#allocation14]   ;;  %s9956_s7 = smov [#allocation17]  }
  0xa9   : > { %s940_s11 = sshll.u32 %s9955_s2, 4  ;;  %s966_s12 = sshll.u32 %s9956_s7, 4  ;;  %s941_s11 = int_to_ptr.vmem [resolvable:$true] %s940_s11  ;;  %s967_s12 = int_to_ptr.vmem [resolvable:$true] %s966_s12 }
  0xaa   : > { %s9454_s15 = scalar_lea.hbm %s11468_s14, 1024 }
  0xab   : > { %p9455_p13 = scmp.ne.s32.totalorder %s11468_s14, %s9454_s15  ;;  %p9461_p9 = scmp.lt.u32.totalorder %s9454_s15, %s11468_s14 }
  0xad   : > { %p9457_p6 = pnand %p9455_p13, %p10230_p0 }
  0xaf   : > { %p9458_p5 = pneg %p9457_p6 }
  0xb1   : > { %p9463_p10 = pnand %p9461_p9, %p9458_p5 }
  0xb3   : > { %9466 = shalt.err (!%p9463_p10)
}
  0xb4   : > { %s9467_s27 = scalar_lea.vmem %s941_s11, 1024  ;;  %p9475_p4 = scmp.lt.s32.totalorder %s941_s11, %s941_s11 }
  0xb5   : > { %p9468_p1 = scmp.ne.s32.totalorder %s941_s11, %s9467_s27  ;;  %p9476_p7 = scmp.lt.s32.totalorder %s9467_s27, %s9467_s27 }
  0xb7   : > { %p9470_p2 = pnand %p9468_p1, %p10230_p0  ;;  %p9477_p8 = por %p9476_p7, %p9475_p4 }
  0xb9   : > { %p9471_p3 = pneg %p9470_p2 }
  0xbb   : > { %p9478_p11 = pnand %p9477_p8, %p9471_p3 }
  0xbd   : > { %9481 = shalt.err (!%p9478_p11)
}
  0xbe   : > { %9082 = dma.hbm_to_vmem [thread:$0]  (!%p10218_p12), %s11468_s14, 1024, %s941_s11, [#allocation15], %s11390_s18, %s11390_s18, %s11391_s28  }
  0xbf   : > { %s9482_s23 = scalar_lea.hbm %s11471_s6, 1024 }
  0xc0   : > { %p9483_p13 = scmp.ne.s32.totalorder %s11471_s6, %s9482_s23  ;;  %p9489_p9 = scmp.lt.u32.totalorder %s9482_s23, %s11471_s6 }
  0xc2   : > { %p9485_p6 = pnand %p9483_p13, %p10230_p0 }
  0xc4   : > { %p9486_p5 = pneg %p9485_p6 }
  0xc6   : > { %p9491_p10 = pnand %p9489_p9, %p9486_p5 }
  0xc8   : > { %9494 = shalt.err (!%p9491_p10)
}
  0xc9   : > { %s9495_s27 = scalar_lea.vmem %s967_s12, 1024  ;;  %p9503_p4 = scmp.lt.s32.totalorder %s967_s12, %s967_s12 }
  0xca   : > { %p9496_p1 = scmp.ne.s32.totalorder %s967_s12, %s9495_s27  ;;  %p9504_p7 = scmp.lt.s32.totalorder %s9495_s27, %s9495_s27 }
  0xcc   : > { %p9498_p2 = pnand %p9496_p1, %p10230_p0  ;;  %p9505_p8 = por %p9504_p7, %p9503_p4 }
  0xce   : > { %p9499_p3 = pneg %p9498_p2 }
  0xd0   : > { %p9506_p11 = pnand %p9505_p8, %p9499_p3 }
  0xd2   : > { %9509 = shalt.err (!%p9506_p11)
}
  0xd3   : > { %9088 = dma.hbm_to_vmem [thread:$0]  (!%p10218_p12), %s11471_s6, 1024, %s967_s12, [#allocation18], %s11390_s18, %s11390_s18, %s11391_s28  }
  0xd4   : > { %s9957_s2 = smov [#allocation20]   ;;  %s9510_s7 = scalar_lea.hbm %s11474_s3, 1024 }
  0xd5   : > { %s992_s11 = sshll.u32 %s9957_s2, 4  ;;  %p9511_p13 = scmp.ne.s32.totalorder %s11474_s3, %s9510_s7  ;;  %s993_s11 = int_to_ptr.vmem [resolvable:$true] %s992_s11 }
  0xd6   : > { %p9517_p9 = scmp.lt.u32.totalorder %s9510_s7, %s11474_s3 }
  0xd7   : > { %p9513_p6 = pnand %p9511_p13, %p10230_p0 }
  0xd9   : > { %p9514_p5 = pneg %p9513_p6 }
  0xdb   : > { %p9519_p10 = pnand %p9517_p9, %p9514_p5 }
  0xdd   : > { %9522 = shalt.err (!%p9519_p10)
}
  0xde   : > { %s9523_s15 = scalar_lea.vmem %s993_s11, 1024  ;;  %p9531_p4 = scmp.lt.s32.totalorder %s993_s11, %s993_s11 }
  0xdf   : > { %p9524_p1 = scmp.ne.s32.totalorder %s993_s11, %s9523_s15  ;;  %p9532_p7 = scmp.lt.s32.totalorder %s9523_s15, %s9523_s15 }
  0xe1   : > { %p9526_p2 = pnand %p9524_p1, %p10230_p0  ;;  %p9533_p8 = por %p9532_p7, %p9531_p4 }
  0xe3   : > { %p9527_p3 = pneg %p9526_p2 }
  0xe5   : > { %p9534_p11 = pnand %p9533_p8, %p9527_p3 }
  0xe7   : > { %9537 = shalt.err (!%p9534_p11)
}
  0xe8   : > { %9094 = dma.hbm_to_vmem [thread:$0]  (!%p10218_p12), %s11474_s3, 1024, %s993_s11, [#allocation21], %s11390_s18, %s11390_s18, %s11391_s28  }
  0xe9   : > { %s9958_s12 = smov [#allocation23]   ;;  %s9959_s27 = smov [#allocation2]  }
  0xea   : > { %s1021_s23 = sshll.u32 %s9958_s12, 4  ;;  %s834_s2 = sshll.u32 %s9959_s27, 4  ;;  %s1022_s23 = int_to_ptr.vmem [resolvable:$true] %s1021_s23  ;;  %s10321_s2 = int_to_ptr.vmem [resolvable:$true] %s834_s2 }
  0xeb   : > { %s9538_s7 = scalar_lea.hbm %s10132_s25, 32 }
  0xec   : > { %p9539_p13 = scmp.ne.s32.totalorder %s10132_s25, %s9538_s7  ;;  %p9545_p9 = scmp.lt.u32.totalorder %s9538_s7, %s10132_s25 }
  0xee   : > { %p9541_p6 = pnand %p9539_p13, %p10230_p0 }
  0xf0   : > { %p9542_p5 = pneg %p9541_p6 }
  0xf2   : > { %p9547_p10 = pnand %p9545_p9, %p9542_p5 }
  0xf4   : > { %9550 = shalt.err (!%p9547_p10)
}
  0xf5   : > { %s9551_s15 = scalar_lea.vmem %s1022_s23, 32  ;;  %p9559_p4 = scmp.lt.s32.totalorder %s1022_s23, %s1022_s23 }
  0xf6   : > { %p9552_p1 = scmp.ne.s32.totalorder %s1022_s23, %s9551_s15  ;;  %p9560_p7 = scmp.lt.s32.totalorder %s9551_s15, %s9551_s15 }
  0xf8   : > { %p9554_p2 = pnand %p9552_p1, %p10230_p0  ;;  %p9561_p8 = por %p9560_p7, %p9559_p4 }
  0xfa   : > { %p9555_p3 = pneg %p9554_p2 }
  0xfc   : > { %p9562_p11 = pnand %p9561_p8, %p9555_p3 }
  0xfe   : > { %9565 = shalt.err (!%p9562_p11)
}
  0xff   : > { %s11386_s11 = smov 16   ;;  %s11388_s12 = smov 1  }
 0x100   : > { %9100 = dma.hbm_to_vmem [thread:$0]  (!%p10218_p12), %s10132_s25, 32, %s1022_s23, [#allocation24], %s11386_s11, %s11386_s11, %s11388_s12  }
 0x101   : > { %s9566_s27 = scalar_lea.hbm %s11470_s8, 1024 }
 0x102   : > { %p9567_p13 = scmp.ne.s32.totalorder %s11470_s8, %s9566_s27  ;;  %p9573_p9 = scmp.lt.u32.totalorder %s9566_s27, %s11470_s8 }
 0x104   : > { %p9569_p6 = pnand %p9567_p13, %p10230_p0 }
 0x106   : > { %p9570_p5 = pneg %p9569_p6 }
 0x108   : > { %p9575_p10 = pnand %p9573_p9, %p9570_p5 }
 0x10a   : > { %9578 = shalt.err (!%p9575_p10)
}
 0x10b   : > { %s9579_s7 = scalar_lea.vmem %s10321_s2, 1024  ;;  %p9587_p4 = scmp.lt.s32.totalorder %s10321_s2, %s10321_s2 }
 0x10c   : > { %p9580_p1 = scmp.ne.s32.totalorder %s10321_s2, %s9579_s7  ;;  %p9588_p7 = scmp.lt.s32.totalorder %s9579_s7, %s9579_s7 }
 0x10e   : > { %p9582_p2 = pnand %p9580_p1, %p10230_p0  ;;  %p9589_p8 = por %p9588_p7, %p9587_p4 }
 0x110   : > { %p9583_p3 = pneg %p9582_p2 }
 0x112   : > { %p9590_p11 = pnand %p9589_p8, %p9583_p3 }
 0x114   : > { %9593 = shalt.err (!%p9590_p11)
}
 0x115   : > { %9061 = dma.hbm_to_vmem [thread:$0]  (!%p10218_p12), %s11470_s8, 1024, %s10321_s2, [#allocation3], %s11390_s18, %s11390_s18, %s11391_s28  }
 0x116   : > { %s9962_s23 = smov [#allocation7]   ;;  %s9963_s27 = smov [#allocation10]  }
 0x117   : > { %s875_s15 = sshll.u32 %s9962_s23, 4  ;;  %s901_s11 = sshll.u32 %s9963_s27, 4  ;;  %s876_s15 = int_to_ptr.vmem [resolvable:$true] %s875_s15  ;;  %s10354_s11 = int_to_ptr.vmem [resolvable:$true] %s901_s11 }
 0x118   : > { %s9594_s7 = scalar_lea.hbm %s11465_s20, 32 }
 0x119   : > { %p9595_p13 = scmp.ne.s32.totalorder %s11465_s20, %s9594_s7  ;;  %p9601_p9 = scmp.lt.u32.totalorder %s9594_s7, %s11465_s20 }
 0x11b   : > { %p9597_p6 = pnand %p9595_p13, %p10230_p0 }
 0x11d   : > { %p9598_p5 = pneg %p9597_p6 }
 0x11f   : > { %p9603_p10 = pnand %p9601_p9, %p9598_p5 }
 0x121   : > { %9606 = shalt.err (!%p9603_p10)
}
 0x122   : > { %s9607_s12 = scalar_lea.vmem %s876_s15, 32  ;;  %p9615_p4 = scmp.lt.s32.totalorder %s876_s15, %s876_s15 }
 0x123   : > { %p9608_p1 = scmp.ne.s32.totalorder %s876_s15, %s9607_s12  ;;  %p9616_p7 = scmp.lt.s32.totalorder %s9607_s12, %s9607_s12 }
 0x125   : > { %p9610_p2 = pnand %p9608_p1, %p10230_p0  ;;  %p9617_p8 = por %p9616_p7, %p9615_p4 }
 0x127   : > { %p9611_p3 = pneg %p9610_p2 }
 0x129   : > { %p9618_p11 = pnand %p9617_p8, %p9611_p3 }
 0x12b   : > { %9621 = shalt.err (!%p9618_p11)
}
 0x12c   : > { %s11489_s2 = smov 1   ;;  %s11490_s23 = smov 16  }
 0x12d   : > { %9067 = dma.hbm_to_vmem [thread:$0]  (!%p10218_p12), %s11465_s20, 32, %s876_s15, [#allocation6], %s11490_s23, %s11490_s23, %s11489_s2  }
 0x12e   : > { %s9622_s27 = scalar_lea.hbm %s11473_s4, 32 }
 0x12f   : > { %p9623_p13 = scmp.ne.s32.totalorder %s11473_s4, %s9622_s27  ;;  %p9629_p9 = scmp.lt.u32.totalorder %s9622_s27, %s11473_s4 }
 0x131   : > { %p9625_p6 = pnand %p9623_p13, %p10230_p0 }
 0x133   : > { %p9626_p5 = pneg %p9625_p6 }
 0x135   : > { %p9631_p10 = pnand %p9629_p9, %p9626_p5 }
 0x137   : > { %9634 = shalt.err (!%p9631_p10)
}
 0x138   : > { %s9635_s12 = scalar_lea.vmem %s10354_s11, 32  ;;  %p9643_p4 = scmp.lt.s32.totalorder %s10354_s11, %s10354_s11 }
 0x139   : > { %p9636_p1 = scmp.ne.s32.totalorder %s10354_s11, %s9635_s12  ;;  %p9644_p7 = scmp.lt.s32.totalorder %s9635_s12, %s9635_s12 }
 0x13b   : > { %p9638_p2 = pnand %p9636_p1, %p10230_p0  ;;  %p9645_p8 = por %p9644_p7, %p9643_p4 }
 0x13d   : > { %p9639_p3 = pneg %p9638_p2 }
 0x13f   : > { %p9646_p11 = pnand %p9645_p8, %p9639_p3 }
 0x141   : > { %9649 = shalt.err (!%p9646_p11)
}
 0x142   : > { %9073 = dma.hbm_to_vmem [thread:$0]  (!%p10218_p12), %s11473_s4, 32, %s10354_s11, [#allocation9], %s11490_s23, %s11490_s23, %s11489_s2  }
 0x143   : > { %s9964_s15 = smov [#allocation13]   ;;  %s9965_s27 = smov [#allocation16]  }
 0x144   : > { %s927_s7 = sshll.u32 %s9964_s15, 4  ;;  %s953_s18 = sshll.u32 %s9965_s27, 4  ;;  %s928_s7 = int_to_ptr.vmem [resolvable:$true] %s927_s7  ;;  %s10387_s18 = int_to_ptr.vmem [resolvable:$true] %s953_s18 }
 0x145   : > { %s9650_s12 = scalar_lea.hbm %s10092_s24, 32 }
 0x146   : > { %p9651_p13 = scmp.ne.s32.totalorder %s10092_s24, %s9650_s12  ;;  %p9657_p9 = scmp.lt.u32.totalorder %s9650_s12, %s10092_s24 }
 0x148   : > { %p9653_p6 = pnand %p9651_p13, %p10230_p0 }
 0x14a   : > { %p9654_p5 = pneg %p9653_p6 }
 0x14c   : > { %p9659_p10 = pnand %p9657_p9, %p9654_p5 }
 0x14e   : > { %9662 = shalt.err (!%p9659_p10)
}
 0x14f   : > { %s9663_s28 = scalar_lea.vmem %s928_s7, 32  ;;  %p9671_p4 = scmp.lt.s32.totalorder %s928_s7, %s928_s7 }
 0x150   : > { %p9664_p1 = scmp.ne.s32.totalorder %s928_s7, %s9663_s28  ;;  %p9672_p7 = scmp.lt.s32.totalorder %s9663_s28, %s9663_s28 }
 0x152   : > { %p9666_p2 = pnand %p9664_p1, %p10230_p0  ;;  %p9673_p8 = por %p9672_p7, %p9671_p4 }
 0x154   : > { %p9667_p3 = pneg %p9666_p2 }
 0x156   : > { %p9674_p11 = pnand %p9673_p8, %p9667_p3 }
 0x158   : > { %9677 = shalt.err (!%p9674_p11)
}
 0x159   : > { %9079 = dma.hbm_to_vmem [thread:$0]  (!%p10218_p12), %s10092_s24, 32, %s928_s7, [#allocation12], %s11490_s23, %s11490_s23, %s11489_s2  }
 0x15a   : > { %s9678_s11 = scalar_lea.hbm %s11466_s19, 32 }
 0x15b   : > { %p9679_p13 = scmp.ne.s32.totalorder %s11466_s19, %s9678_s11  ;;  %p9685_p9 = scmp.lt.u32.totalorder %s9678_s11, %s11466_s19 }
 0x15d   : > { %p9681_p6 = pnand %p9679_p13, %p10230_p0 }
 0x15f   : > { %p9682_p5 = pneg %p9681_p6 }
 0x161   : > { %p9687_p10 = pnand %p9685_p9, %p9682_p5 }
 0x163   : > { %9690 = shalt.err (!%p9687_p10)
}
 0x164   : > { %s9691_s28 = scalar_lea.vmem %s10387_s18, 32  ;;  %p9699_p4 = scmp.lt.s32.totalorder %s10387_s18, %s10387_s18 }
 0x165   : > { %p9692_p1 = scmp.ne.s32.totalorder %s10387_s18, %s9691_s28  ;;  %p9700_p7 = scmp.lt.s32.totalorder %s9691_s28, %s9691_s28 }
 0x167   : > { %p9694_p2 = pnand %p9692_p1, %p10230_p0  ;;  %p9701_p8 = por %p9700_p7, %p9699_p4 }
 0x169   : > { %p9695_p3 = pneg %p9694_p2 }
 0x16b   : > { %p9702_p11 = pnand %p9701_p8, %p9695_p3 }
 0x16d   : > { %9705 = shalt.err (!%p9702_p11)
}
 0x16e   : > { %9085 = dma.hbm_to_vmem [thread:$0]  (!%p10218_p12), %s11466_s19, 32, %s10387_s18, [#allocation15], %s11490_s23, %s11490_s23, %s11489_s2  }
 0x16f   : > { %s9966_s15 = smov [#allocation19]   ;;  %s9967_s27 = smov [#allocation22]  }
 0x170   : > { %s979_s7 = sshll.u32 %s9966_s15, 4  ;;  %s1005_s12 = sshll.u32 %s9967_s27, 4  ;;  %s980_s7 = int_to_ptr.vmem [resolvable:$true] %s979_s7  ;;  %s10420_s12 = int_to_ptr.vmem [resolvable:$true] %s1005_s12 }
 0x171   : > { %s9706_s11 = scalar_lea.hbm %s10112_s30, 32 }
 0x172   : > { %p9707_p13 = scmp.ne.s32.totalorder %s10112_s30, %s9706_s11  ;;  %p9713_p9 = scmp.lt.u32.totalorder %s9706_s11, %s10112_s30 }
 0x174   : > { %p9709_p6 = pnand %p9707_p13, %p10230_p0 }
 0x176   : > { %p9710_p5 = pneg %p9709_p6 }
 0x178   : > { %p9715_p10 = pnand %p9713_p9, %p9710_p5 }
 0x17a   : > { %9718 = shalt.err (!%p9715_p10)
}
 0x17b   : > { %s9719_s28 = scalar_lea.vmem %s980_s7, 32  ;;  %p9727_p4 = scmp.lt.s32.totalorder %s980_s7, %s980_s7 }
 0x17c   : > { %p9720_p1 = scmp.ne.s32.totalorder %s980_s7, %s9719_s28  ;;  %p9728_p7 = scmp.lt.s32.totalorder %s9719_s28, %s9719_s28 }
 0x17e   : > { %p9722_p2 = pnand %p9720_p1, %p10230_p0  ;;  %p9729_p8 = por %p9728_p7, %p9727_p4 }
 0x180   : > { %p9723_p3 = pneg %p9722_p2 }
 0x182   : > { %p9730_p11 = pnand %p9729_p8, %p9723_p3 }
 0x184   : > { %9733 = shalt.err (!%p9730_p11)
}
 0x185   : > { %9091 = dma.hbm_to_vmem [thread:$0]  (!%p10218_p12), %s10112_s30, 32, %s980_s7, [#allocation18], %s11490_s23, %s11490_s23, %s11489_s2  }
 0x186   : > { %s9734_s18 = scalar_lea.hbm %s10122_s29, 32 }
 0x187   : > { %p9735_p13 = scmp.ne.s32.totalorder %s10122_s29, %s9734_s18  ;;  %p9741_p9 = scmp.lt.u32.totalorder %s9734_s18, %s10122_s29 }
 0x189   : > { %p9737_p6 = pnand %p9735_p13, %p10230_p0 }
 0x18b   : > { %p9738_p5 = pneg %p9737_p6 }
 0x18d   : > { %p9743_p10 = pnand %p9741_p9, %p9738_p5 }
 0x18f   : > { %9746 = shalt.err (!%p9743_p10)
}
 0x190   : > { %s9747_s15 = scalar_lea.vmem %s10420_s12, 32  ;;  %p9755_p4 = scmp.lt.s32.totalorder %s10420_s12, %s10420_s12 }
 0x191   : > { %p9748_p1 = scmp.ne.s32.totalorder %s10420_s12, %s9747_s15  ;;  %p9756_p7 = scmp.lt.s32.totalorder %s9747_s15, %s9747_s15 }
 0x193   : > { %p9750_p2 = pnand %p9748_p1, %p10230_p0  ;;  %p9757_p8 = por %p9756_p7, %p9755_p4 }
 0x195   : > { %p9751_p3 = pneg %p9750_p2 }
 0x197   : > { %p9758_p11 = pnand %p9757_p8, %p9751_p3 }
 0x199   : > { %9761 = shalt.err (!%p9758_p11)
}
 0x19a   : > { %9097 = dma.hbm_to_vmem [thread:$0]  (!%p10218_p12), %s10122_s29, 32, %s10420_s12, [#allocation21], %s11490_s23, %s11490_s23, %s11489_s2  }
 0x19b   : > { %s9968_s7 = smov [#allocation25]   ;;  %s9969_s11 = smov [#allocation26]  }
 0x19c   : > { %s1040_s27 = sshll.u32 %s9968_s7, 4  ;;  %s1054_s28 = sshll.u32 %s9969_s11, 4  ;;  %s1041_s27 = int_to_ptr.vmem [resolvable:$true] %s1040_s27  ;;  %s10453_s28 = int_to_ptr.vmem [resolvable:$true] %s1054_s28 }
 0x19d   : > { %s9762_s18 = scalar_lea.hbm %s11472_s5, 512 }
 0x19e   : > { %p9763_p13 = scmp.ne.s32.totalorder %s11472_s5, %s9762_s18  ;;  %p9769_p9 = scmp.lt.u32.totalorder %s9762_s18, %s11472_s5 }
 0x1a0   : > { %p9765_p6 = pnand %p9763_p13, %p10230_p0 }
 0x1a2   : > { %p9766_p5 = pneg %p9765_p6 }
 0x1a4   : > { %p9771_p10 = pnand %p9769_p9, %p9766_p5 }
 0x1a6   : > { %9774 = shalt.err (!%p9771_p10)
}
 0x1a7   : > { %s9775_s15 = scalar_lea.vmem %s1041_s27, 512  ;;  %p9783_p4 = scmp.lt.s32.totalorder %s1041_s27, %s1041_s27 }
 0x1a8   : > { %p9776_p1 = scmp.ne.s32.totalorder %s1041_s27, %s9775_s15  ;;  %p9784_p7 = scmp.lt.s32.totalorder %s9775_s15, %s9775_s15 }
 0x1aa   : > { %p9778_p2 = pnand %p9776_p1, %p10230_p0  ;;  %p9785_p8 = por %p9784_p7, %p9783_p4 }
 0x1ac   : > { %p9779_p3 = pneg %p9778_p2 }
 0x1ae   : > { %p9786_p11 = pnand %p9785_p8, %p9779_p3 }
 0x1b0   : > { %9789 = shalt.err (!%p9786_p11)
}
 0x1b1   : > { %s11491_s2 = smov 8   ;;  %s11492_s23 = smov 128  }
 0x1b2   : > { %9103 = dma.hbm_to_vmem [thread:$0]  (!%p10218_p12), %s11472_s5, 512, %s1041_s27, [#allocation24], %s11492_s23, %s11492_s23, %s11491_s2  }
 0x1b3   : > { %s9790_s12 = scalar_lea.hbm %s11469_s9, 16 }
 0x1b4   : > { %p9791_p13 = scmp.ne.s32.totalorder %s11469_s9, %s9790_s12  ;;  %p9797_p9 = scmp.lt.u32.totalorder %s9790_s12, %s11469_s9 }
 0x1b6   : > { %p9793_p6 = pnand %p9791_p13, %p10230_p0 }
 0x1b8   : > { %p9794_p5 = pneg %p9793_p6 }
 0x1ba   : > { %p9799_p10 = pnand %p9797_p9, %p9794_p5 }
 0x1bc   : > { %9802 = shalt.err (!%p9799_p10)
}
 0x1bd   : > { %s9803_s7 = scalar_lea.vmem %s10453_s28, 16  ;;  %s9810_s11 = scalar_lea.vmem %s10453_s28, 32 }
 0x1be   : > { %p9804_p1 = scmp.ne.s32.totalorder %s10453_s28, %s9803_s7  ;;  %p9811_p4 = scmp.lt.s32.totalorder %s10453_s28, %s10453_s28 }
 0x1bf   : > { %p9812_p7 = scmp.lt.s32.totalorder %s9810_s11, %s9803_s7 }
 0x1c0   : > { %p9806_p2 = pnand %p9804_p1, %p10230_p0 }
 0x1c1   : > { %p9813_p8 = por %p9812_p7, %p9811_p4 }
 0x1c2   : > { %p9807_p3 = pneg %p9806_p2 }
 0x1c4   : > { %p9814_p11 = pnand %p9813_p8, %p9807_p3 }
 0x1c6   : > { %9817 = shalt.err (!%p9814_p11)
}
 0x1c7   : > { %9106 = dma.hbm_to_vmem [thread:$0]  (!%p10218_p12), %s11469_s9, 16, %s10453_s28, [#allocation27]  }
 0x1c8   : > { %p11493_p13 = scmp.ne.s32.totalorder %s11486_s26, 0 }
 0x1c9   : > { %p11494_p6 = scmp.eq.s32.totalorder (!%p11493_p13), %s10180_s0, 0 }
 0x1ca   : > { %1093 = sbr.rel (%p11493_p13) target bundleno = 14051 (0x36e3), region = 148 }
 0x1d1   : > { %9863 = dma.done.wait (%p11494_p6), [#allocation3], 1024   ;;  %p11495_p0 = pmov %p11494_p6 }
 0x1d3   : > { %9865 = vsyncadd (%p11495_p0), [#allocation3], 4294966272  ;;  %p11496_p5 = pmov %p11495_p0 }
 0x1d4   : > { %p11497_p9 = pmov %p11495_p0 }
 0x1d5   : > { %9867 = dma.done.wait (%p11496_p5), [#allocation6], 1056  }
 0x1d6   : > { %9869 = vsyncadd (%p11497_p9), [#allocation6], 4294966240  ;;  %p11498_p10 = pmov %p11495_p0 }
 0x1d7   : > { %p11499_p12 = pmov %p11495_p0 }
 0x1d8   : > { %9871 = dma.done.wait (%p11498_p10), [#allocation9], 1056  }
 0x1d9   : > { %9873 = vsyncadd (%p11499_p12), [#allocation9], 4294966240  ;;  %p11500_p1 = pmov %p11495_p0 }
 0x1da   : > { %p11501_p2 = pmov %p11495_p0 }
 0x1db   : > { %9875 = dma.done.wait (%p11500_p1), [#allocation12], 1056  }
 0x1dc   : > { %9877 = vsyncadd (%p11501_p2), [#allocation12], 4294966240  ;;  %p11502_p3 = pmov %p11495_p0 }
 0x1dd   : > { %p11503_p4 = pmov %p11495_p0 }
 0x1de   : > { %9879 = dma.done.wait (%p11502_p3), [#allocation15], 1056  }
 0x1df   : > { %9881 = vsyncadd (%p11503_p4), [#allocation15], 4294966240  ;;  %p11504_p7 = pmov %p11495_p0 }
 0x1e0   : > { %p11505_p8 = pmov %p11495_p0 }
 0x1e1   : > { %9883 = dma.done.wait (%p11504_p7), [#allocation18], 1056  }
 0x1e2   : > { %9885 = vsyncadd (%p11505_p8), [#allocation18], 4294966240  ;;  %p11506_p11 = pmov %p11495_p0 }
 0x1e3   : > { %p11507_p13 = pmov %p11495_p0 }
 0x1e4   : > { %9887 = dma.done.wait (%p11506_p11), [#allocation21], 1056  }
 0x1e5   : > { %9889 = vsyncadd (%p11507_p13), [#allocation21], 4294966240  ;;  %p11508_p6 = pmov %p11495_p0 }
 0x1e7   : > { %9891 = dma.done.wait (%p11508_p6), [#allocation24], 544  }
 0x1e8   : > { %9893 = vsyncadd (%p11495_p0), [#allocation24], 4294966752  ;;  %p11509_p5 = pmov %p11495_p0 }
 0x1e9   : > { %p11510_p9 = pmov %p11495_p0 }
 0x1ea   : > { %9895 = dma.done.wait (%p11509_p5), [#allocation27], 16  }
 0x1eb   : > { %9897 = vsyncadd (%p11510_p9), [#allocation27], 4294967280  ;;  %s11511_s26 = sld [smem:[#allocation40_spill]]  ;;  %s11512_s16 = sld [smem:[#allocation43_spill]]  ;;  %v9970_v0 = vmov 0.0|0.0   ;;  %vm9971_vm0 = vmmov 0   ;;  %v1264_v2 = vlaneseq }
 0x1ec   : > { %p1244_p10 = scmp.lt.s32.totalorder %s10180_s0, 1  ;;  %8830 = vmatprep.subr.bf16.mxu0 %v9970_v0  ;;  %v9972_v1 = vmov 0.0   ;;  %s11513_s28 = sld [smem:[#allocation41_spill]]  ;;  %v9973_v12 = vmov 0   ;;  %vm1294_vm2 = vcmask 261120   ;;  %vm1371_vm3 = vcmask 64512  }
 0x1ed   : > { %8313 = vmatprep.mubr.msk.f32.mxu0 %vm9971_vm0, %v9972_v1  ;;  %8316 = vmatprep.subr.mxu1 %v9972_v1  ;;  %v10535_v3 = vshrl.u32 %v1264_v2, 7  ;;  %s11514_s15 = sld [smem:[#allocation44_spill]]  ;;  %s11393_s23 = smov 64   ;;  %vm2055_vm6 = vcmask 130048   ;;  %vm2057_vm7 = vcmask 195584   ;;  %vm2271_vm8 = vcmask 523264  }
 0x1ee   : > { %8318 = vmatprep.mubr.msk.f32.mxu1 %vm9971_vm0, %v9972_v1  ;;  %s10530_s10 = scalar_select %p1244_p10, %s10180_s0, 1  ;;  %vm7585_vm12 = vcmask 392192  }
 0x1ef   : > { %v1272_v10 = vsub.s32 0, %v10535_v3  ;;  %s11417_s12 = smov 96   ;;  %s11419_s7 = smov 88  }
 0x1f0   : > { %s11392_s18 = sshll.u32 %s10530_s10, 3  ;;  %s11413_s11 = smov 120  }
 0x1f1   : > { %s1249_s27 = scalar_lea.vmem %s11511_s26, %s10530_s10  ;;  %v1278_v4 = vld [vmem:[%s11512_s16] sm:$0xff]  ;;  %v1279_v5 = vld [vmem:[%s11512_s16 + $0x8] sm:$0xff]  ;;  %v1280_v6 = vld [vmem:[%s11512_s16 + $0x10] sm:$0xff]  ;;  %s11403_s26 = smov 80  }
 0x1f2   : > { %v8831_v7 = vpack.c.bf16 %v1279_v5, %v1278_v4  ;;  %v1281_v8 = vld [vmem:[%s11512_s16 + $0x18] sm:$0xff]  ;;  %v1260_v9 = vld [vmem:[%s1249_s27] sm:$0x1]  ;;  %s1253_s2 = scalar_lea.vmem %s11513_s28, %s11392_s18  ;;  %s11515_s27 = sld [smem:[#allocation39_spill]] }
 0x1f3   : > { %vm1261_vm1 = vcmp.ne.s32.totalorder %v1260_v9, 0  ;;  %v8834_v11 = vpack.c.bf16 %v1281_v8, %v1280_v6  ;;  %v10549_v15 = vld [vmem:[%s1253_s2] sm:$0xff]  ;;  %s11395_s2 = smov 72   ;;  %s11401_s18 = smov 56  }
 0x1f4   : > { %8832 = vmatpush3.bf16.msra.mxu0 %v8831_v7  ;;  %v1269_v13 = vsel %vm1261_vm1, 1, %v9973_v12  ;;  %v7916_v16 = vld [vmem:[%s11514_s15] ss:$0 sm:$0xff]  ;;  %s11529_s3 = smov 112   ;;  %s11530_s4 = smov 120  }
 0x1f5   : > { %8833 = vmatprep.subr.bf16.mxu0 %v9970_v0  ;;  %v10547_v14 = vrot.slane %v1269_v13, %v1272_v10  ;;  %s11531_s5 = smov 104   ;;  %s11532_s6 = smov 80  }
 0x1f6   : > { %s11533_s8 = smov 72   ;;  %s11534_s9 = smov 56  }
 0x1f7   : > { %s11535_s14 = smov 64   ;;  %s11538_s17 = smov 8   ;;  %vm1274_vm9 = vcmp.eq.s32.totalorder %v10547_v14, 1 }
 0x1f8   : > { %8835 = vmatpush3.bf16.msra.mxu0 %v8834_v11  ;;  %s1246_s28 = scalar_lea.vmem %s11515_s27, %s10530_s10  ;;  %s11415_s27 = smov 112  }
 0x1f9   : > { %8336 = vmatprep.subr.mxu0 %v9972_v1  ;;  %v1258_v25 = vld [vmem:[%s1246_s28] sm:$0x1]  ;;  %s11405_s28 = smov 104   ;;  %s11539_s19 = smov 16  }
 0x1fa   : > { %vm1259_vm4 = vcmp.ne.s32.totalorder %v1258_v25, 0  ;;  %s11540_s20 = smov 24   ;;  %p11547_p1 = scmp.ne.s32.totalorder %s11483_s22, 0 }
 0x1fb   : > { %8314 = vmatmul.mubr.msk.f32.vlgmr.msra.gmra.mrb[0].mxu0 %vm1294_vm2, %v10549_v15  ;;  %v1447_v26 = vsel %vm1259_vm4, 1, %v9973_v12 }
 0x1fc   : > { %8338 = vmatprep.mubr.msk.f32.mxu0 %vm9971_vm0, %v9972_v1  ;;  %v10580_v27 = vrot.slane %v1447_v26, %v1272_v10 }
 0x1fe   : > { %vm1452_vm5 = vcmp.eq.s32.totalorder %v10580_v27, 1 }
 0x2ce   : > { %v1364_v17 = vpop.f32.mrb[0].mxu0 }
 0x2cf   : > { %v10557_v18 = vadd.f32 %v7916_v16, %v1364_v17  ;;  %v8315_v19 = vpop.f32.mrb[1].mxu0 }
 0x2d1   : > { %1465 = vrot.lane.b32.xlu1 %v10557_v18, %s11393_s23  ;;  %1369 = vrot.lane.b32.xlu0 %v10557_v18, %s11417_s12  ;;  %s11397_s23 = smov 48  }
 0x2d5   : > { %1543 = vrot.lane.b32.xlu1 %v10557_v18, %s11419_s7 }
 0x2d9   : > { %1541 = vrot.lane.b32.xlu1 %v10557_v18, %s11413_s11 }
 0x2dd   : > { %1710 = vrot.lane.b32.xlu1 %v10557_v18, %s11403_s26  ;;  %s11517_s26 = sld [smem:[#allocation46_spill]] }
 0x343   : > { %v1466_v20 = vpop.permute.xlu1 %1465  ;;  %v1370_v21 = vpop.permute.xlu0 %1369 }
 0x344   : > { %8317 = vmatpush3.xpose.msk.msra.mxu1 %vm1371_vm3, %v1370_v21 }
 0x345   : > { %8321 = vmatprep.subr.mxu1 %v9972_v1 }
 0x347   : > { %v1544_v22 = vpop.permute.xlu1 %1543  ;;  %8319 = vmatmul.mubr.msk.f32.vlgmr.msra.gmra.mrb[0].mxu1 %vm1371_vm3, %v10557_v18 }
 0x348   : > { %8322 = vmatpush3.msra.mxu1 %v1466_v20  ;;  %8323 = vmatprep.mubr.msk.f32.mxu1 %vm9971_vm0, %v9972_v1 }
 0x349   : > { %8326 = vmatprep.subr.mxu1 %v9972_v1 }
 0x34b   : > { %v1542_v23 = vpop.permute.xlu1 %1541 }
 0x34f   : > { %v1711_v24 = vpop.permute.xlu1 %1710 }
 0x350   : > { %8337 = vmatpush3.xpose.msk.msra.mxu0 %vm1371_vm3, %v1711_v24 }
 0x351   : > { %8346 = vmatprep.subr.mxu0 %v9972_v1 }
 0x41a   : > { %v1442_v28 = vpop.f32.mrb[0].mxu1 }
 0x41b   : > { %v1446_v29 = vmul.f32 0.35355338, %v1442_v28  ;;  %v8320_v30 = vpop.f32.mrb[1].mxu1 }
 0x41d   : > { %v1453_v31 = vsel %vm1452_vm5, %v1446_v29, -1e+30 }
 0x41e   : > { %v1454_v32 = vsel %vm1371_vm3, %v1453_v31, -inf }
 0x41f   : > { %1455 = vmax.xlane.f32.xlu0 %v1454_v32 }
 0x435   : > { %1877 = vrot.lane.b32.xlu0 %v10557_v18, %s11395_s2  ;;  %s11399_s2 = smov 40  }
 0x4ac   : > { %v1456_v33 = vpop.xlane.xlu0 %1455 }
 0x4ad   : > { %v1457_v34 = vsub.f32 %v1453_v31, %v1456_v33 }
 0x4af   : > { %v1458_v35 = vmul.f32 1.442695, %v1457_v34 }
 0x4b0   : > { %v1878_v40 = vpop.permute.xlu0 %1877 }
 0x4b1   : > { %9246 = vpow2.f32 %v1458_v35 }
 0x4bb   : > { %v9247_v36 = vpop.eup %9246 }
 0x4bc   : > { %v1460_v37 = vsel %vm1371_vm3, %v9247_v36, 0.0 }
 0x4bd   : > { %1461 = vadd.xlane.f32.xlu1 %v1460_v37 }
 0x4ce   : > { %1708 = vrot.lane.b32.xlu1 %v10557_v18, %s11415_s27  ;;  %s11522_s27 = sld [smem:[#allocation49_spill]] }
 0x4d2   : > { %1875 = vrot.lane.b32.xlu1 %v10557_v18, %s11405_s28  ;;  %s11407_s28 = smov 24  }
 0x54a   : > { %v1462_v38 = vpop.xlane.xlu1 %1461 }
 0x54b   : > { %9248 = vrcp.f32 %v1462_v38 }
 0x54e   : > { %v1709_v39 = vpop.permute.xlu1 %1708 }
 0x54f   : > { %8339 = vmatmul.mubr.msk.f32.vlgmr.msra.gmra.mrb[2].mxu0 %vm1371_vm3, %v1709_v39 }
 0x550   : > { %8347 = vmatpush3.xpose.msk.msra.mxu0 %vm1371_vm3, %v1878_v40  ;;  %8348 = vmatprep.mubr.msk.f32.mxu0 %vm9971_vm0, %v9972_v1 }
 0x551   : > { %8836 = vmatprep.subr.bf16.mxu0 %v9970_v0 }
 0x552   : > { %v1876_v41 = vpop.permute.xlu1 %1875 }
 0x553   : > { %8349 = vmatmul.mubr.msk.f32.vlgmr.msra.gmra.mrb[4].mxu0 %vm1371_vm3, %v1876_v41 }
 0x554   : > { %8364 = vmatprep.mubr.msk.f32.mxu0 %vm9971_vm0, %v9972_v1 }
 0x555   : > { %v9249_v42 = vpop.eup %9248 }
 0x556   : > { %v1464_v43 = vmul.f32 %v9249_v42, %v9247_v36 }
 0x558   : > { %8324 = vmatmul.mubr.msk.f32.vlgmr.msra.gmra.mrb[2].mxu1 %vm1371_vm3, %v1464_v43 }
 0x559   : > { %8327 = vmatpush3.xpose.msk.msra.mxu1 %vm1371_vm3, %v1544_v22  ;;  %8328 = vmatprep.mubr.msk.f32.mxu1 %vm9971_vm0, %v9972_v1 }
 0x55a   : > { %8331 = vmatprep.subr.mxu1 %v9972_v1 }
 0x55c   : > { %8329 = vmatmul.mubr.msk.f32.vlgmr.msra.gmra.mrb[4].mxu1 %vm1371_vm3, %v1542_v23 }
 0x55d   : > { %8333 = vmatprep.mubr.msk.f32.mxu1 %vm9971_vm0, %v9972_v1 }
 0x622   : > { %v1782_v44 = vpop.f32.mrb[2].mxu0 }
 0x623   : > { %v1786_v45 = vmul.f32 0.35355338, %v1782_v44  ;;  %v8340_v46 = vpop.f32.mrb[3].mxu0 }
 0x625   : > { %v1787_v47 = vsel %vm1452_vm5, %v1786_v45, -1e+30 }
 0x626   : > { %v1949_v48 = vpop.f32.mrb[4].mxu0  ;;  %v1788_v49 = vsel %vm1371_vm3, %v1787_v47, -inf }
 0x627   : > { %1789 = vmax.xlane.f32.xlu0 %v1788_v49  ;;  %v8350_v50 = vpop.f32.mrb[5].mxu0  ;;  %v1953_v54 = vmul.f32 0.35355338, %v1949_v48  ;;  %v7930_v49 = vld [vmem:[%s11517_s26] ss:$0 sm:$0xff] }
 0x629   : > { %v1954_v59 = vsel %vm1452_vm5, %v1953_v54, -1e+30 }
 0x62a   : > { %v1955_v60 = vsel %vm1371_vm3, %v1954_v59, -inf }
 0x62b   : > { %v10612_v51 = vpop.f32.mrb[2].mxu1 }
 0x62c   : > { %v8325_v52 = vpop.f32.mrb[3].mxu1 }
 0x62f   : > { %v1615_v53 = vpop.f32.mrb[4].mxu1 }
 0x630   : > { %v1619_v55 = vmul.f32 0.35355338, %v1615_v53  ;;  %v8330_v56 = vpop.f32.mrb[5].mxu1 }
 0x632   : > { %v1620_v57 = vsel %vm1452_vm5, %v1619_v55, -1e+30 }
 0x633   : > { %v1621_v58 = vsel %vm1371_vm3, %v1620_v57, -inf }
 0x634   : > { %1622 = vmax.xlane.f32.xlu1 %v1621_v58 }
 0x638   : > { %1956 = vmax.xlane.f32.xlu1 %v1955_v60  ;;  %v2167_v60 = vld [vmem:[#allocation2] sm:$0xff] }
 0x6b4   : > { %v1790_v61 = vpop.xlane.xlu0 %1789 }
 0x6b5   : > { %v1791_v62 = vsub.f32 %v1787_v47, %v1790_v61  ;;  %v2168_v61 = vld [vmem:[#allocation2 + $0x8] sm:$0xff] }
 0x6b7   : > { %v1792_v63 = vmul.f32 1.442695, %v1791_v62  ;;  %v8843_v62 = vpack.c.bf16 %v2168_v61, %v2167_v60 }
 0x6b9   : > { %9250 = vpow2.f32 %v1792_v63  ;;  %v2169_v63 = vld [vmem:[#allocation2 + $0x10] sm:$0xff] }
 0x6c1   : > { %v1623_v4 = vpop.xlane.xlu1 %1622 }
 0x6c2   : > { %v1624_v12 = vsub.f32 %v1620_v57, %v1623_v4  ;;  %v2170_v4 = vld [vmem:[#allocation2 + $0x18] sm:$0xff] }
 0x6c3   : > { %v9251_v5 = vpop.eup %9250 }
 0x6c4   : > { %v1794_v6 = vsel %vm1371_vm3, %v9251_v5, 0.0  ;;  %v1625_v13 = vmul.f32 1.442695, %v1624_v12 }
 0x6c5   : > { %v1957_v7 = vpop.xlane.xlu1 %1956  ;;  %1795 = vadd.xlane.f32.xlu1 %v1794_v6 }
 0x6c6   : > { %v1958_v8 = vsub.f32 %v1954_v59, %v1957_v7 }
 0x6c8   : > { %v1959_v9 = vmul.f32 1.442695, %v1958_v8 }
 0x6ca   : > { %9252 = vpow2.f32 %v1959_v9 }
 0x6cb   : > { %9254 = vpow2.f32 %v1625_v13 }
 0x6d4   : > { %v9253_v10 = vpop.eup %9252 }
 0x6d5   : > { %v1961_v11 = vsel %vm1371_vm3, %v9253_v10, 0.0  ;;  %v9255_v16 = vpop.eup %9254 }
 0x6d6   : > { %1962 = vadd.xlane.f32.xlu0 %v1961_v11  ;;  %1632 = vrot.lane.b32.xlu1 %v10557_v18, %s11401_s18  ;;  %v1627_v17 = vsel %vm1371_vm3, %v9255_v16, 0.0  ;;  %s11409_s18 = smov 16  }
 0x6ec   : > { %1799 = vrot.lane.b32.xlu0 %v10557_v18, %s11397_s23  ;;  %s11516_s23 = sld [smem:[#allocation45_spill]] }
 0x6f2   : > { %v1283_v31 = vld [vmem:[%s11516_s23] sm:$0xff]  ;;  %v1284_v32 = vld [vmem:[%s11516_s23 + $0x8] sm:$0xff]  ;;  %v1285_v34 = vld [vmem:[%s11516_s23 + $0x10] sm:$0xff] }
 0x6f3   : > { %v8837_v33 = vpack.c.bf16 %v1284_v32, %v1283_v31  ;;  %v1286_v35 = vld [vmem:[%s11516_s23 + $0x18] sm:$0xff] }
 0x6f4   : > { %v8840_v36 = vpack.c.bf16 %v1286_v35, %v1285_v34 }
 0x6f5   : > { %8838 = vmatpush3.bf16.msra.mxu0 %v8837_v33 }
 0x6f6   : > { %8839 = vmatprep.subr.bf16.mxu0 %v9970_v0 }
 0x6f9   : > { %8841 = vmatpush3.bf16.msra.mxu0 %v8840_v36 }
 0x6fa   : > { %1628 = vadd.xlane.f32.xlu1 %v1627_v17  ;;  %8848 = vmatprep.subr.bf16.mxu0 %v9970_v0  ;;  %v2257_v17 = vld [vmem:[%s11522_s27 + $0x8] sm:$0xff] }
 0x70b   : > { %1966 = vrot.lane.b32.xlu1 %v10557_v18, %s11399_s2  ;;  %s11411_s2 = smov 8  }
 0x752   : > { %v1796_v19 = vpop.xlane.xlu1 %1795 }
 0x756   : > { %v1633_v20 = vpop.permute.xlu1 %1632 }
 0x757   : > { %8332 = vmatpush3.msra.mxu1 %v1633_v20  ;;  %v2258_v20 = vld [vmem:[%s11522_s27 + $0x10] sm:$0xff] }
 0x758   : > { %8341 = vmatprep.subr.mxu1 %v9972_v1 }
 0x763   : > { %v1963_v22 = vpop.xlane.xlu0 %1962 }
 0x767   : > { %v1800_v26 = vpop.permute.xlu0 %1799 }
 0x787   : > { %v1629_v21 = vpop.xlane.xlu1 %1628 }
 0x788   : > { %9256 = vrcp.f32 %v1629_v21  ;;  %v2259_v21 = vld [vmem:[%s11522_s27 + $0x18] sm:$0xff] }
 0x789   : > { %9258 = vrcp.f32 %v1796_v19 }
 0x78a   : > { %9260 = vrcp.f32 %v1963_v22  ;;  %v8852_v22 = vpack.c.bf16 %v2259_v21, %v2258_v20 }
 0x78b   : > { %v1967_v29 = vpop.permute.xlu1 %1966 }
 0x792   : > { %v9257_v23 = vpop.eup %9256 }
 0x793   : > { %v1631_v24 = vmul.f32 %v9257_v23, %v9255_v16  ;;  %v9259_v25 = vpop.eup %9258  ;;  %v2256_v16 = vld [vmem:[%s11522_s27] sm:$0xff] }
 0x794   : > { %v1798_v18 = vmul.f32 %v9259_v25, %v9251_v5  ;;  %v9261_v28 = vpop.eup %9260  ;;  %v8849_v19 = vpack.c.bf16 %v2257_v17, %v2256_v16  ;;  %v2260_v23 = vld [vmem:[%s11522_s27 + $0x20] sm:$0xff] }
 0x795   : > { %8334 = vmatmul.mubr.msk.f32.vlgmr.msra.gmra.mrb[6].mxu1 %vm1371_vm3, %v1631_v24  ;;  %v1965_v30 = vmul.f32 %v9261_v28, %v9253_v10  ;;  %v2261_v24 = vld [vmem:[%s11522_s27 + $0x28] sm:$0xff] }
 0x796   : > { %8342 = vmatpush3.msra.mxu1 %v1800_v26  ;;  %8343 = vmatprep.mubr.msk.f32.mxu1 %vm9971_vm0, %v9972_v1  ;;  %v8855_v25 = vpack.c.bf16 %v2261_v24, %v2260_v23  ;;  %v2262_v26 = vld [vmem:[%s11522_s27 + $0x30] sm:$0xff] }
 0x797   : > { %8351 = vmatprep.subr.mxu1 %v9972_v1 }
 0x799   : > { %8344 = vmatmul.mubr.msk.f32.vlgmr.msra.gmra.mrb[8].mxu1 %vm1371_vm3, %v1798_v18  ;;  %v2263_v18 = vld [vmem:[%s11522_s27 + $0x38] sm:$0xff] }
 0x79a   : > { %8352 = vmatpush3.msra.mxu1 %v1967_v29  ;;  %8353 = vmatprep.mubr.msk.f32.mxu1 %vm9971_vm0, %v9972_v1  ;;  %v8858_v28 = vpack.c.bf16 %v2263_v18, %v2262_v26 }
 0x79b   : > { %8842 = vmatprep.subr.bf16.mxu1 %v9970_v0 }
 0x79d   : > { %8354 = vmatmul.mubr.msk.f32.vlgmr.msra.gmra.mrb[10].mxu1 %vm1371_vm3, %v1965_v30 }
 0x79e   : > { %8375 = vmatprep.mubr.msk.f32.mxu1 %vm9971_vm0, %v9972_v1  ;;  %8844 = vmatpush3.bf16.msra.mxu1 %v8843_v62  ;;  %v7950_v62 = vld [vmem:[%s11514_s15 + $0x1] ss:$0 sm:$0xff]  ;;  %s11536_s15 = smov 48  }
 0x79f   : > { %8845 = vmatprep.subr.bf16.mxu1 %v9970_v0 }
 0x868   : > { %v1704_v37 = vpop.f32.mrb[6].mxu1 }
 0x869   : > { %2043 = vrot.lane.b32.xlu1 %v1704_v37, %s11411_s2  ;;  %v8335_v38 = vpop.f32.mrb[7].mxu1  ;;  %s11520_s2 = sld [smem:[#allocation52_spill]] }
 0x86c   : > { %v1871_v39 = vpop.f32.mrb[8].mxu1 }
 0x86d   : > { %2047 = vrot.lane.b32.xlu0 %v1871_v39, %s11409_s18  ;;  %v8345_v40 = vpop.f32.mrb[9].mxu1 }
 0x86f   : > { %s11521_s11 = smov %s11520_s2  ;;  %v10667_v11 = vld [vmem:[%s11520_s2] ss:$0 sm:$0xff]  ;;  %s11523_s2 = sld [smem:[#allocation48_spill]] }
 0x870   : > { %v2038_v41 = vpop.f32.mrb[10].mxu1 }
 0x871   : > { %2051 = vrot.lane.b32.xlu1 %v2038_v41, %s11407_s28  ;;  %v8355_v42 = vpop.f32.mrb[11].mxu1  ;;  %s11518_s28 = sld [smem:[#allocation51_spill]] }
 0x875   : > { %s11524_s12 = smov %s11523_s2  ;;  %v7934_v29 = vld [vmem:[%s11523_s2] ss:$0 sm:$0xff]  ;;  %s11527_s2 = smov 88  }
 0x877   : > { %s11519_s18 = smov %s11518_s28  ;;  %v10664_v9 = vld [vmem:[%s11518_s28] ss:$0 sm:$0xff]  ;;  %s11525_s28 = sld [smem:[#allocation50_spill]] }
 0x87d   : > { %s11526_s7 = smov %s11525_s28  ;;  %v7936_v38 = vld [vmem:[%s11525_s28] ss:$0 sm:$0xff]  ;;  %s11528_s28 = smov 96  }
 0x8db   : > { %v2044_v43 = vpop.permute.xlu1 %2043 }
 0x8dc   : > { %v2054_v45 = vsel %vm1371_vm3, %v10612_v51, %v2044_v43 }
 0x8df   : > { %v2048_v44 = vpop.permute.xlu0 %2047 }
 0x8e0   : > { %v2056_v46 = vsel %vm2055_vm6, %v2054_v45, %v2048_v44 }
 0x8e3   : > { %v2052_v47 = vpop.permute.xlu1 %2051 }
 0x8e4   : > { %v2058_v48 = vsel %vm2057_vm7, %v2056_v46, %v2052_v47 }
 0x8e5   : > { %8365 = vmatmul.mubr.msk.f32.vlgmr.msra.gmra.mrb[6].mxu0 %vm1294_vm2, %v2058_v48 }
 0x8e6   : > { %8394 = vmatprep.mubr.msk.f32.mxu0 %vm9971_vm0, %v9972_v1  ;;  %8850 = vmatpush3.bf16.msra.mxu0 %v8849_v19 }
 0x8e7   : > { %8851 = vmatprep.subr.bf16.mxu0 %v9970_v0 }
 0x8ea   : > { %8853 = vmatpush3.bf16.msra.mxu0 %v8852_v22 }
 0x8eb   : > { %8854 = vmatprep.subr.bf16.mxu0 %v9970_v0 }
 0x8ee   : > { %8856 = vmatpush3.bf16.msra.mxu0 %v8855_v25 }
 0x8ef   : > { %8857 = vmatprep.subr.bf16.mxu0 %v9970_v0 }
 0x8f2   : > { %8859 = vmatpush3.bf16.msra.mxu0 %v8858_v28 }
 0x8f3   : > { %8418 = vmatprep.subr.mxu0 %v9972_v1 }
 0x9b8   : > { %v2134_v50 = vpop.f32.mrb[6].mxu0 }
 0x9b9   : > { %v2135_v52 = vadd.f32 %v7930_v49, %v2134_v50  ;;  %v8366_v53 = vpop.f32.mrb[7].mxu0  ;;  %v7940_v49 = vld [vmem:[%s11512_s16 + $0x20] sm:$0xff]  ;;  %v7941_v50 = vld [vmem:[%s11512_s16 + $0x28] sm:$0xff] }
 0x9ba   : > { %v7942_v53 = vld [vmem:[%s11512_s16 + $0x30] sm:$0xff] }
 0x9bb   : > { %v2138_v54 = vadd.f32 %v2135_v52, %v10549_v15  ;;  %v8846_v15 = vpack.c.bf16 %v2170_v4, %v2169_v63  ;;  %v8861_v52 = vpack.c.bf16 %v7941_v50, %v7940_v49 }
 0x9bd   : > { %v2139_v55 = vsel %vm1294_vm2, %v2138_v54, 0.0  ;;  %8847 = vmatpush3.bf16.msra.mxu1 %v8846_v15 }
 0x9be   : > { %2140 = vadd.xlane.f32.xlu0 %v2139_v55  ;;  %8860 = vmatprep.subr.bf16.mxu1 %v9970_v0 }
 0xa4b   : > { %v2141_v51 = vpop.xlane.xlu0 %2140 }
 0xa4c   : > { %v2143_v56 = vmul.f32 0.03125, %v2141_v51 }
 0xa4e   : > { %v2144_v57 = vsub.f32 %v2138_v54, %v2143_v56  ;;  %v7943_v54 = vld [vmem:[%s11512_s16 + $0x38] sm:$0xff]  ;;  %s11537_s16 = smov 40  }
 0xa4f   : > { %v8864_v55 = vpack.c.bf16 %v7943_v54, %v7942_v53 }
 0xa50   : > { %v2145_v58 = vmul.f32 %v2144_v57, %v2144_v57 }
 0xa52   : > { %v2146_v59 = vsel %vm1294_vm2, %v2145_v58, 0.0 }
 0xa53   : > { %2147 = vadd.xlane.f32.xlu1 %v2146_v59 }
 0xae0   : > { %v2148_v5 = vpop.xlane.xlu1 %2147 }
 0xae1   : > { %v2149_v6 = vmul.f32 0.03125, %v2148_v5 }
 0xae3   : > { %v2150_v7 = vadd.f32 1e-05, %v2149_v6 }
 0xae5   : > { %9262 = vrsqrt.f32 %v2150_v7 }
 0xaef   : > { %v9263_v8 = vpop.eup %9262 }
 0xaf0   : > { %v2152_v10 = vmul.f32 %v9263_v8, %v2144_v57 }
 0xaf2   : > { %v2159_v12 = vmul.f32 %v10664_v9, %v2152_v10 }
 0xaf4   : > { %v2166_v13 = vadd.f32 %v10667_v11, %v2159_v12 }
 0xaf6   : > { %8376 = vmatmul.mubr.msk.f32.vlgmr.msra.gmra.mrb[12].mxu1 %vm1294_vm2, %v2166_v13 }
 0xaf7   : > { %8405 = vmatprep.mubr.msk.f32.mxu1 %vm9971_vm0, %v9972_v1  ;;  %8862 = vmatpush3.bf16.msra.mxu1 %v8861_v52 }
 0xaf8   : > { %8863 = vmatprep.subr.bf16.mxu1 %v9970_v0 }
 0xafb   : > { %8865 = vmatpush3.bf16.msra.mxu1 %v8864_v55 }
 0xafc   : > { %8408 = vmatprep.subr.mxu1 %v9972_v1 }
 0xbc9   : > { %v2247_v30 = vpop.f32.mrb[12].mxu1 }
 0xbca   : > { %v2248_v31 = vadd.f32 %v7934_v29, %v2247_v30  ;;  %v8377_v32 = vpop.f32.mrb[13].mxu1 }
 0xbcc   : > { %v2252_v33 = vmul.f32 0.70710677, %v2248_v31  ;;  %v2251_v35 = vmul.f32 0.5, %v2248_v31 }
 0xbce   : > { %9264 = verf.f32 %v2252_v33 }
 0xbd8   : > { %v9265_v34 = vpop.eup %9264 }
 0xbd9   : > { %v2254_v36 = vadd.f32 1.0, %v9265_v34 }
 0xbdb   : > { %v2255_v37 = vmul.f32 %v2254_v36, %v2251_v35 }
 0xbdd   : > { %8395 = vmatmul.mubr.msk.f32.vlgmr.msra.gmra.mrb[8].mxu0 %vm2271_vm8, %v2255_v37 }
 0xbde   : > { %8420 = vmatprep.mubr.msk.f32.mxu0 %vm9971_vm0, %v9972_v1 }
 0xcb0   : > { %v2341_v39 = vpop.f32.mrb[8].mxu0 }
 0xcb1   : > { %v2342_v40 = vadd.f32 %v7936_v38, %v2341_v39  ;;  %v8396_v41 = vpop.f32.mrb[9].mxu0 }
 0xcb3   : > { %v2345_v42 = vadd.f32 %v2342_v40, %v2166_v13 }
 0xcb5   : > { %v2346_v43 = vsel %vm1294_vm2, %v2345_v42, 0.0 }
 0xcb6   : > { %2347 = vadd.xlane.f32.xlu0 %v2346_v43 }
 0xd43   : > { %v2348_v44 = vpop.xlane.xlu0 %2347 }
 0xd44   : > { %v2349_v45 = vmul.f32 0.03125, %v2348_v44 }
 0xd46   : > { %v2350_v46 = vsub.f32 %v2345_v42, %v2349_v45 }
 0xd48   : > { %v2351_v47 = vmul.f32 %v2350_v46, %v2350_v46 }
 0xd4a   : > { %v2352_v48 = vsel %vm1294_vm2, %v2351_v47, 0.0 }
 0xd4b   : > { %2353 = vadd.xlane.f32.xlu0 %v2352_v48 }
 0xdd8   : > { %v2354_v51 = vpop.xlane.xlu0 %2353 }
 0xdd9   : > { %v2355_v56 = vmul.f32 0.03125, %v2354_v51 }
 0xddb   : > { %v2356_v57 = vadd.f32 1e-05, %v2355_v56 }
 0xddd   : > { %9266 = vrsqrt.f32 %v2356_v57 }
 0xde7   : > { %v9267_v58 = vpop.eup %9266 }
 0xde8   : > { %v2358_v59 = vmul.f32 %v9267_v58, %v2350_v46 }
 0xdea   : > { %v2359_v60 = vmul.f32 %v10664_v9, %v2358_v59 }
 0xdec   : > { %v10701_v61 = vadd.f32 %v10667_v11, %v2359_v60 }
 0xdee   : > { %8406 = vmatmul.mubr.msk.f32.vlgmr.msra.gmra.mrb[14].mxu1 %vm1294_vm2, %v10701_v61 }
 0xdef   : > { %8410 = vmatprep.mubr.msk.f32.mxu1 %vm9971_vm0, %v9972_v1 }
 0xec1   : > { %v2454_v63 = vpop.f32.mrb[14].mxu1 }
 0xec2   : > { %v10708_v4 = vadd.f32 %v7950_v62, %v2454_v63  ;;  %v8407_v15 = vpop.f32.mrb[15].mxu1 }
 0xec4   : > { %2626 = vrot.lane.b32.xlu0 %v10708_v4, %s11527_s2  ;;  %2459 = vrot.lane.b32.xlu1 %v10708_v4, %s11528_s28 }
 0xec8   : > { %2791 = vrot.lane.b32.xlu0 %v10708_v4, %s11529_s3  ;;  %2624 = vrot.lane.b32.xlu1 %v10708_v4, %s11530_s4 }
 0xecc   : > { %2958 = vrot.lane.b32.xlu0 %v10708_v4, %s11531_s5  ;;  %2793 = vrot.lane.b32.xlu1 %v10708_v4, %s11532_s6 }
 0xed0   : > { %2960 = vrot.lane.b32.xlu1 %v10708_v4, %s11533_s8 }
 0xf36   : > { %v2627_v5 = vpop.permute.xlu0 %2626  ;;  %v2460_v6 = vpop.permute.xlu1 %2459 }
 0xf37   : > { %8409 = vmatpush3.xpose.msk.msra.mxu1 %vm1371_vm3, %v2460_v6  ;;  %8419 = vmatpush3.xpose.msk.msra.mxu0 %vm1371_vm3, %v2627_v5 }
 0xf38   : > { %8428 = vmatprep.subr.mxu0 %v9972_v1  ;;  %8413 = vmatprep.subr.mxu1 %v9972_v1 }
 0xf3a   : > { %8411 = vmatmul.mubr.msk.f32.vlgmr.msra.gmra.mrb[16].mxu1 %vm1371_vm3, %v10708_v4  ;;  %v2625_v7 = vpop.permute.xlu1 %2624  ;;  %v2792_v9 = vpop.permute.xlu0 %2791 }
 0xf3b   : > { %8421 = vmatmul.mubr.msk.f32.vlgmr.msra.gmra.mrb[10].mxu0 %vm1371_vm3, %v2625_v7  ;;  %8415 = vmatprep.mubr.msk.f32.mxu1 %vm9971_vm0, %v9972_v1 }
 0xf3c   : > { %8430 = vmatprep.mubr.msk.f32.mxu0 %vm9971_vm0, %v9972_v1 }
 0xf3e   : > { %v2794_v8 = vpop.permute.xlu1 %2793  ;;  %v2959_v11 = vpop.permute.xlu0 %2958 }
 0xf3f   : > { %8429 = vmatpush3.xpose.msk.msra.mxu0 %vm1371_vm3, %v2794_v8 }
 0xf40   : > { %8438 = vmatprep.subr.mxu0 %v9972_v1 }
 0xf42   : > { %8431 = vmatmul.mubr.msk.f32.vlgmr.msra.gmra.mrb[12].mxu0 %vm1371_vm3, %v2792_v9  ;;  %v2961_v10 = vpop.permute.xlu1 %2960 }
 0xf43   : > { %8439 = vmatpush3.xpose.msk.msra.mxu0 %vm1371_vm3, %v2961_v10  ;;  %8440 = vmatprep.mubr.msk.f32.mxu0 %vm9971_vm0, %v9972_v1 }
 0xf44   : > { %8866 = vmatprep.subr.bf16.mxu0 %v9970_v0 }
 0xf46   : > { %8441 = vmatmul.mubr.msk.f32.vlgmr.msra.gmra.mrb[14].mxu0 %vm1371_vm3, %v2959_v11  ;;  %v7945_v11 = vld [vmem:[%s11516_s23 + $0x20] sm:$0xff] }
 0xf47   : > { %8456 = vmatprep.mubr.msk.f32.mxu0 %vm9971_vm0, %v9972_v1 }
0x100d   : > { %v2531_v12 = vpop.f32.mrb[16].mxu1 }
0x100e   : > { %v2535_v13 = vmul.f32 0.35355338, %v2531_v12  ;;  %v8412_v16 = vpop.f32.mrb[17].mxu1  ;;  %v2698_v17 = vpop.f32.mrb[10].mxu0  ;;  %v7946_v12 = vld [vmem:[%s11516_s23 + $0x28] sm:$0xff] }
0x100f   : > { %v2702_v19 = vmul.f32 0.35355338, %v2698_v17  ;;  %v8422_v20 = vpop.f32.mrb[11].mxu0 }
0x1010   : > { %v2536_v21 = vsel %vm1452_vm5, %v2535_v13, -1e+30  ;;  %v8867_v13 = vpack.c.bf16 %v7946_v12, %v7945_v11  ;;  %v7975_v12 = vld [vmem:[%s11522_s27 + $0x60] sm:$0xff] }
0x1011   : > { %v2537_v22 = vsel %vm1371_vm3, %v2536_v21, -inf  ;;  %v2703_v23 = vsel %vm1452_vm5, %v2702_v19, -1e+30 }
0x1012   : > { %2538 = vmax.xlane.f32.xlu1 %v2537_v22  ;;  %v2704_v24 = vsel %vm1371_vm3, %v2703_v23, -inf  ;;  %8868 = vmatpush3.bf16.msra.mxu0 %v8867_v13  ;;  %v7948_v22 = vld [vmem:[%s11516_s23 + $0x38] sm:$0xff]  ;;  %v7976_v13 = vld [vmem:[%s11522_s27 + $0x68] sm:$0xff] }
0x1013   : > { %2705 = vmax.xlane.f32.xlu0 %v2704_v24  ;;  %8869 = vmatprep.subr.bf16.mxu0 %v9970_v0 }
0x1015   : > { %v2865_v25 = vpop.f32.mrb[12].mxu0 }
0x1016   : > { %v2869_v26 = vmul.f32 0.35355338, %v2865_v25  ;;  %v8432_v18 = vpop.f32.mrb[13].mxu0 }
0x1018   : > { %v2870_v28 = vsel %vm1452_vm5, %v2869_v26, -1e+30 }
0x1019   : > { %v3032_v29 = vpop.f32.mrb[14].mxu0  ;;  %v2871_v30 = vsel %vm1371_vm3, %v2870_v28, -inf }
0x101a   : > { %v3036_v31 = vmul.f32 0.35355338, %v3032_v29  ;;  %2872 = vmax.xlane.f32.xlu0 %v2871_v30  ;;  %v8442_v32 = vpop.f32.mrb[15].mxu0 }
0x101c   : > { %v3037_v33 = vsel %vm1452_vm5, %v3036_v31, -1e+30 }
0x101d   : > { %v3038_v34 = vsel %vm1371_vm3, %v3037_v33, -inf }
0x101e   : > { %3039 = vmax.xlane.f32.xlu1 %v3038_v34  ;;  %v7964_v34 = vld [vmem:[%s11517_s26 + $0x1] ss:$0 sm:$0xff] }
0x102f   : > { %2715 = vrot.lane.b32.xlu1 %v10708_v4, %s11534_s9 }
0x109f   : > { %v2539_v35 = vpop.xlane.xlu1 %2538 }
0x10a0   : > { %v2540_v36 = vsub.f32 %v2536_v21, %v2539_v35  ;;  %v2706_v37 = vpop.xlane.xlu0 %2705  ;;  %v7947_v21 = vld [vmem:[%s11516_s23 + $0x30] sm:$0xff]  ;;  %s11541_s23 = sld [smem:[#allocation42_spill]] }
0x10a1   : > { %v2707_v38 = vsub.f32 %v2703_v23, %v2706_v37  ;;  %v8870_v23 = vpack.c.bf16 %v7948_v22, %v7947_v21  ;;  %v7969_v21 = vld [vmem:[%s11524_s12 + $0x1] ss:$0 sm:$0xff] }
0x10a2   : > { %v2541_v39 = vmul.f32 1.442695, %v2540_v36 }
0x10a3   : > { %v2708_v40 = vmul.f32 1.442695, %v2707_v38  ;;  %8871 = vmatpush3.bf16.msra.mxu0 %v8870_v23 }
0x10a4   : > { %9268 = vpow2.f32 %v2541_v39  ;;  %8878 = vmatprep.subr.bf16.mxu0 %v9970_v0 }
0x10a5   : > { %9270 = vpow2.f32 %v2708_v40 }
0x10a7   : > { %v2873_v50 = vpop.xlane.xlu0 %2872 }
0x10a8   : > { %v2874_v52 = vsub.f32 %v2870_v28, %v2873_v50 }
0x10aa   : > { %v2875_v53 = vmul.f32 1.442695, %v2874_v52 }
0x10ab   : > { %v3040_v41 = vpop.xlane.xlu1 %3039 }
0x10ac   : > { %v3041_v42 = vsub.f32 %v3037_v33, %v3040_v41 }
0x10ae   : > { %v9269_v43 = vpop.eup %9268  ;;  %v3042_v44 = vmul.f32 1.442695, %v3041_v42 }
0x10af   : > { %v9271_v45 = vpop.eup %9270  ;;  %v2543_v46 = vsel %vm1371_vm3, %v9269_v43, 0.0  ;;  %v2716_v51 = vpop.permute.xlu1 %2715 }
0x10b0   : > { %9272 = vpow2.f32 %v3042_v44  ;;  %2544 = vadd.xlane.f32.xlu0 %v2543_v46  ;;  %v2710_v47 = vsel %vm1371_vm3, %v9271_v45, 0.0  ;;  %v3249_v46 = vld [vmem:[#allocation2 + $0x28] sm:$0xff] }
0x10b1   : > { %2711 = vadd.xlane.f32.xlu1 %v2710_v47  ;;  %9274 = vpow2.f32 %v2875_v53 }
0x10ba   : > { %v9273_v48 = vpop.eup %9272 }
0x10bb   : > { %v3044_v49 = vsel %vm1371_vm3, %v9273_v48, 0.0  ;;  %v9275_v54 = vpop.eup %9274 }
0x10bc   : > { %3045 = vadd.xlane.f32.xlu1 %v3044_v49  ;;  %v2877_v55 = vsel %vm1371_vm3, %v9275_v54, 0.0 }
0x10c6   : > { %2548 = vrot.lane.b32.xlu0 %v10708_v4, %s11535_s14 }
0x10cd   : > { %2882 = vrot.lane.b32.xlu1 %v10708_v4, %s11536_s15 }
0x10e5   : > { %2878 = vadd.xlane.f32.xlu0 %v2877_v55  ;;  %v10807_v55 = vld [vmem:[%s11519_s18 + $0x1] ss:$0 sm:$0xff] }
0x10fb   : > { %3049 = vrot.lane.b32.xlu0 %v10708_v4, %s11537_s16 }
0x113d   : > { %v2545_v56 = vpop.xlane.xlu0 %2544 }
0x113e   : > { %9276 = vrcp.f32 %v2545_v56  ;;  %v2712_v57 = vpop.xlane.xlu1 %2711  ;;  %v3446_v56 = vld [vmem:[#allocation5] sm:$0xff] }
0x113f   : > { %9278 = vrcp.f32 %v2712_v57  ;;  %v3447_v57 = vld [vmem:[#allocation5 + $0x8] sm:$0xff] }
0x1141   : > { %v2549_v58 = vpop.permute.xlu0 %2548 }
0x1142   : > { %8414 = vmatpush3.msra.mxu1 %v2549_v58  ;;  %v10810_v58 = vld [vmem:[%s11521_s11 + $0x1] ss:$0 sm:$0xff]  ;;  %s11542_s11 = sshll.u32 %s10530_s10, 3  ;;  %s11545_s10 = sld [smem:[#allocation63_spill]] }
0x1143   : > { %8423 = vmatprep.subr.mxu1 %v9972_v1  ;;  %s1257_s18 = scalar_lea.vmem %s11541_s23, %s11542_s11 }
0x1148   : > { %v9277_v59 = vpop.eup %9276 }
0x1149   : > { %v3046_v60 = vpop.xlane.xlu1 %3045  ;;  %v2547_v62 = vmul.f32 %v9277_v59, %v9269_v43  ;;  %v9279_v63 = vpop.eup %9278 }
0x114a   : > { %v2714_v15 = vmul.f32 %v9279_v63, %v9271_v45  ;;  %v3248_v45 = vld [vmem:[#allocation2 + $0x20] sm:$0xff]  ;;  %v3448_v63 = vld [vmem:[#allocation5 + $0x10] sm:$0xff] }
0x114b   : > { %8416 = vmatmul.mubr.msk.f32.vlgmr.msra.gmra.mrb[18].mxu1 %vm1371_vm3, %v2547_v62  ;;  %v8873_v47 = vpack.c.bf16 %v3249_v46, %v3248_v45 }
0x114c   : > { %8424 = vmatpush3.msra.mxu1 %v2716_v51  ;;  %8425 = vmatprep.mubr.msk.f32.mxu1 %vm9971_vm0, %v9972_v1 }
0x114d   : > { %v2883_v4 = vpop.permute.xlu1 %2882  ;;  %8433 = vmatprep.subr.mxu1 %v9972_v1 }
0x114f   : > { %8426 = vmatmul.mubr.msk.f32.vlgmr.msra.gmra.mrb[20].mxu1 %vm1371_vm3, %v2714_v15 }
0x1150   : > { %8434 = vmatpush3.msra.mxu1 %v2883_v4  ;;  %8435 = vmatprep.mubr.msk.f32.mxu1 %vm9971_vm0, %v9972_v1  ;;  %v3449_v4 = vld [vmem:[#allocation5 + $0x18] sm:$0xff] }
0x1151   : > { %8443 = vmatprep.subr.mxu1 %v9972_v1  ;;  %v8894_v15 = vpack.c.bf16 %v3449_v4, %v3448_v63 }
0x1172   : > { %v2879_v5 = vpop.xlane.xlu0 %2878 }
0x1173   : > { %9280 = vrcp.f32 %v2879_v5  ;;  %v10824_v5 = vld [vmem:[%s1257_s18] sm:$0xff]  ;;  %s11546_s18 = sld [smem:[#allocation62_spill]] }
0x1174   : > { %9282 = vrcp.f32 %v3046_v60  ;;  %v8891_v60 = vpack.c.bf16 %v3447_v57, %v3446_v56 }
0x1176   : > { %v3050_v9 = vpop.permute.xlu0 %3049 }
0x117d   : > { %v9281_v6 = vpop.eup %9280 }
0x117e   : > { %v2881_v7 = vmul.f32 %v9281_v6, %v9275_v54  ;;  %v9283_v8 = vpop.eup %9282  ;;  %v7971_v6 = vld [vmem:[%s11522_s27 + $0x40] sm:$0xff] }
0x117f   : > { %v3048_v10 = vmul.f32 %v9283_v8, %v9273_v48  ;;  %v3250_v48 = vld [vmem:[#allocation2 + $0x30] sm:$0xff] }
0x1180   : > { %8436 = vmatmul.mubr.msk.f32.vlgmr.msra.gmra.mrb[22].mxu1 %vm1371_vm3, %v2881_v7  ;;  %v7972_v7 = vld [vmem:[%s11522_s27 + $0x48] sm:$0xff] }
0x1181   : > { %8444 = vmatpush3.msra.mxu1 %v3050_v9  ;;  %8445 = vmatprep.mubr.msk.f32.mxu1 %vm9971_vm0, %v9972_v1  ;;  %v8879_v8 = vpack.c.bf16 %v7972_v7, %v7971_v6  ;;  %v7973_v9 = vld [vmem:[%s11522_s27 + $0x50] sm:$0xff] }
0x1182   : > { %8872 = vmatprep.subr.bf16.mxu1 %v9970_v0 }
0x1184   : > { %8446 = vmatmul.mubr.msk.f32.vlgmr.msra.gmra.mrb[24].mxu1 %vm1371_vm3, %v3048_v10  ;;  %v7974_v10 = vld [vmem:[%s11522_s27 + $0x58] sm:$0xff] }
0x1185   : > { %8467 = vmatprep.mubr.msk.f32.mxu1 %vm9971_vm0, %v9972_v1  ;;  %8874 = vmatpush3.bf16.msra.mxu1 %v8873_v47  ;;  %v8882_v11 = vpack.c.bf16 %v7974_v10, %v7973_v9 }
0x1186   : > { %8875 = vmatprep.subr.bf16.mxu1 %v9970_v0 }
0x121e   : > { %v2620_v16 = vpop.f32.mrb[18].mxu1 }
0x121f   : > { %v8417_v17 = vpop.f32.mrb[19].mxu1 }
0x1220   : > { %v7977_v17 = vld [vmem:[%s11522_s27 + $0x70] sm:$0xff] }
0x1222   : > { %v2787_v19 = vpop.f32.mrb[20].mxu1 }
0x1223   : > { %3126 = vrot.lane.b32.xlu1 %v2787_v19, %s11538_s17  ;;  %v8427_v20 = vpop.f32.mrb[21].mxu1  ;;  %v7978_v19 = vld [vmem:[%s11522_s27 + $0x78] sm:$0xff] }
0x1224   : > { %v8888_v20 = vpack.c.bf16 %v7978_v19, %v7977_v17 }
0x1253   : > { %v2954_v24 = vpop.f32.mrb[22].mxu1 }
0x1254   : > { %3130 = vrot.lane.b32.xlu0 %v2954_v24, %s11539_s19  ;;  %v8437_v25 = vpop.f32.mrb[23].mxu1 }
0x1257   : > { %v3121_v26 = vpop.f32.mrb[24].mxu1 }
0x1258   : > { %3134 = vrot.lane.b32.xlu1 %v3121_v26, %s11540_s20  ;;  %v8447_v18 = vpop.f32.mrb[25].mxu1  ;;  %v7982_v26 = vld [vmem:[#allocation7] ss:$0 sm:$0xff] }
0x1295   : > { %v3127_v28 = vpop.permute.xlu1 %3126 }
0x1296   : > { %v3137_v30 = vsel %vm1371_vm3, %v2620_v16, %v3127_v28  ;;  %v8885_v16 = vpack.c.bf16 %v7976_v13, %v7975_v12 }
0x12c6   : > { %v3131_v29 = vpop.permute.xlu0 %3130 }
0x12c7   : > { %v3138_v31 = vsel %vm2055_vm6, %v3137_v30, %v3131_v29 }
0x12ca   : > { %v3135_v32 = vpop.permute.xlu1 %3134 }
0x12cb   : > { %v3139_v33 = vsel %vm2057_vm7, %v3138_v31, %v3135_v32 }
0x12cc   : > { %8457 = vmatmul.mubr.msk.f32.vlgmr.msra.gmra.mrb[16].mxu0 %vm1294_vm2, %v3139_v33 }
0x12cd   : > { %8486 = vmatprep.mubr.msk.f32.mxu0 %vm9971_vm0, %v9972_v1  ;;  %8880 = vmatpush3.bf16.msra.mxu0 %v8879_v8 }
0x12ce   : > { %8881 = vmatprep.subr.bf16.mxu0 %v9970_v0 }
0x12d1   : > { %8883 = vmatpush3.bf16.msra.mxu0 %v8882_v11 }
0x12d2   : > { %8884 = vmatprep.subr.bf16.mxu0 %v9970_v0 }
0x12d5   : > { %8886 = vmatpush3.bf16.msra.mxu0 %v8885_v16 }
0x12d6   : > { %8887 = vmatprep.subr.bf16.mxu0 %v9970_v0 }
0x12d9   : > { %8889 = vmatpush3.bf16.msra.mxu0 %v8888_v20 }
0x12da   : > { %8510 = vmatprep.subr.mxu0 %v9972_v1 }
0x139f   : > { %v3215_v35 = vpop.f32.mrb[16].mxu0 }
0x13a0   : > { %v3216_v36 = vadd.f32 %v7964_v34, %v3215_v35  ;;  %v8458_v37 = vpop.f32.mrb[17].mxu0 }
0x13a2   : > { %v3219_v38 = vadd.f32 %v3216_v36, %v10701_v61  ;;  %v3251_v61 = vld [vmem:[#allocation2 + $0x38] sm:$0xff] }
0x13a3   : > { %v8876_v49 = vpack.c.bf16 %v3251_v61, %v3250_v48 }
0x13a4   : > { %v3220_v39 = vsel %vm1294_vm2, %v3219_v38, 0.0 }
0x13a5   : > { %3221 = vadd.xlane.f32.xlu0 %v3220_v39  ;;  %8877 = vmatpush3.bf16.msra.mxu1 %v8876_v49 }
0x13a6   : > { %8890 = vmatprep.subr.bf16.mxu1 %v9970_v0 }
0x1432   : > { %v3222_v40 = vpop.xlane.xlu0 %3221 }
0x1433   : > { %v3223_v41 = vmul.f32 0.03125, %v3222_v40 }
0x1435   : > { %v3224_v42 = vsub.f32 %v3219_v38, %v3223_v41 }
0x1437   : > { %v3225_v43 = vmul.f32 %v3224_v42, %v3224_v42 }
0x1439   : > { %v3226_v44 = vsel %vm1294_vm2, %v3225_v43, 0.0  ;;  %v1267_v43 = vand.u32 127, %v1264_v2 }
0x143a   : > { %3227 = vadd.xlane.f32.xlu1 %v3226_v44 }
0x143b   : > { %vm1268_vm10 = vcmp.ge.s32.totalorder %v10535_v3, %v1267_v43 }
0x143c   : > { %vm10889_vm11 = vmand %vm1268_vm10, %vm1274_vm9 }
0x14c7   : > { %v3228_v50 = vpop.xlane.xlu1 %3227 }
0x14c8   : > { %v3229_v52 = vmul.f32 0.03125, %v3228_v50 }
0x14ca   : > { %v3230_v53 = vadd.f32 1e-05, %v3229_v52 }
0x14cc   : > { %9284 = vrsqrt.f32 %v3230_v53 }
0x14d6   : > { %v9285_v54 = vpop.eup %9284 }
0x14d7   : > { %v3232_v51 = vmul.f32 %v9285_v54, %v3224_v42 }
0x14d9   : > { %v3239_v59 = vmul.f32 %v10807_v55, %v3232_v51 }
0x14db   : > { %v10814_v62 = vadd.f32 %v10810_v58, %v3239_v59 }
0x14dd   : > { %8468 = vmatmul.mubr.msk.f32.vlgmr.msra.gmra.mrb[26].mxu1 %vm1294_vm2, %v10814_v62 }
0x14de   : > { %8892 = vmatpush3.bf16.msra.mxu1 %v8891_v60  ;;  %8497 = vmatprep.mubr.msk.f32.mxu1 %vm9971_vm0, %v9972_v1 }
0x14df   : > { %8893 = vmatprep.subr.bf16.mxu1 %v9970_v0 }
0x14e2   : > { %8895 = vmatpush3.bf16.msra.mxu1 %v8894_v15 }
0x14e3   : > { %8500 = vmatprep.subr.mxu1 %v9972_v1 }
0x14e5   : > { %8498 = vmatmul.mubr.msk.f32.vlgmr.msra.gmra.mrb[28].mxu1 %vm1294_vm2, %v10824_v5 }
0x14e6   : > { %8502 = vmatprep.mubr.msk.f32.mxu1 %vm9971_vm0, %v9972_v1 }
0x15b0   : > { %v3329_v22 = vpop.f32.mrb[26].mxu1 }
0x15b1   : > { %v3330_v23 = vadd.f32 %v7969_v21, %v3329_v22  ;;  %v8469_v24 = vpop.f32.mrb[27].mxu1 }
0x15b3   : > { %v3334_v25 = vmul.f32 0.70710677, %v3330_v23  ;;  %v3333_v31 = vmul.f32 0.5, %v3330_v23 }
0x15b5   : > { %9286 = verf.f32 %v3334_v25 }
0x15b8   : > { %v3531_v18 = vpop.f32.mrb[28].mxu1 }
0x15b9   : > { %v10844_v28 = vadd.f32 %v7982_v26, %v3531_v18  ;;  %v8499_v29 = vpop.f32.mrb[29].mxu1 }
0x15bb   : > { %3703 = vrot.lane.b32.xlu1 %v10844_v28, %s11527_s2  ;;  %3536 = vrot.lane.b32.xlu0 %v10844_v28, %s11528_s28 }
0x15bf   : > { %v9287_v30 = vpop.eup %9286  ;;  %3870 = vrot.lane.b32.xlu1 %v10844_v28, %s11532_s6  ;;  %3701 = vrot.lane.b32.xlu0 %v10844_v28, %s11530_s4 }
0x15c0   : > { %v3336_v32 = vadd.f32 1.0, %v9287_v30 }
0x15c2   : > { %v3337_v33 = vmul.f32 %v3336_v32, %v3333_v31 }
0x15c3   : > { %4037 = vrot.lane.b32.xlu1 %v10844_v28, %s11533_s8  ;;  %3868 = vrot.lane.b32.xlu0 %v10844_v28, %s11529_s3 }
0x15c4   : > { %8487 = vmatmul.mubr.msk.f32.vlgmr.msra.gmra.mrb[18].mxu0 %vm2271_vm8, %v3337_v33 }
0x15c5   : > { %8512 = vmatprep.mubr.msk.f32.mxu0 %vm9971_vm0, %v9972_v1 }
0x15c7   : > { %4035 = vrot.lane.b32.xlu0 %v10844_v28, %s11531_s5 }
0x162d   : > { %v3704_v34 = vpop.permute.xlu1 %3703  ;;  %v3537_v35 = vpop.permute.xlu0 %3536 }
0x162e   : > { %8501 = vmatpush3.xpose.msk.msra.mxu1 %vm1371_vm3, %v3537_v35  ;;  %8511 = vmatpush3.xpose.msk.msra.mxu0 %vm1371_vm3, %v3704_v34 }
0x162f   : > { %8520 = vmatprep.subr.mxu0 %v9972_v1  ;;  %8505 = vmatprep.subr.mxu1 %v9972_v1 }
0x1631   : > { %v3871_v36 = vpop.permute.xlu1 %3870  ;;  %8503 = vmatmul.mubr.msk.f32.vlgmr.msra.gmra.mrb[30].mxu1 %vm1371_vm3, %v10844_v28  ;;  %v3702_v37 = vpop.permute.xlu0 %3701 }
0x1632   : > { %8513 = vmatmul.mubr.msk.f32.vlgmr.msra.gmra.mrb[20].mxu0 %vm1371_vm3, %v3702_v37  ;;  %8507 = vmatprep.mubr.msk.f32.mxu1 %vm9971_vm0, %v9972_v1 }
0x1633   : > { %8521 = vmatpush3.xpose.msk.msra.mxu0 %vm1371_vm3, %v3871_v36  ;;  %8522 = vmatprep.mubr.msk.f32.mxu0 %vm9971_vm0, %v9972_v1 }
0x1634   : > { %8530 = vmatprep.subr.mxu0 %v9972_v1 }
0x1635   : > { %v4038_v38 = vpop.permute.xlu1 %4037  ;;  %v3869_v39 = vpop.permute.xlu0 %3868 }
0x1636   : > { %8523 = vmatmul.mubr.msk.f32.vlgmr.msra.gmra.mrb[22].mxu0 %vm1371_vm3, %v3869_v39 }
0x1637   : > { %8531 = vmatpush3.xpose.msk.msra.mxu0 %vm1371_vm3, %v4038_v38  ;;  %8532 = vmatprep.mubr.msk.f32.mxu0 %vm9971_vm0, %v9972_v1 }
0x1638   : > { %8896 = vmatprep.subr.bf16.mxu0 %v9970_v0 }
0x1639   : > { %v4036_v40 = vpop.permute.xlu0 %4035 }
0x163a   : > { %8533 = vmatmul.mubr.msk.f32.vlgmr.msra.gmra.mrb[24].mxu0 %vm1371_vm3, %v4036_v40 }
0x163b   : > { %8548 = vmatprep.mubr.msk.f32.mxu0 %vm9971_vm0, %v9972_v1 }
0x1697   : > { %v10884_v41 = vpop.f32.mrb[18].mxu0 }
0x1698   : > { %v8488_v42 = vpop.f32.mrb[19].mxu0 }
0x1704   : > { %v3608_v44 = vpop.f32.mrb[30].mxu1 }
0x1705   : > { %v3612_v46 = vmul.f32 0.35355338, %v3608_v44  ;;  %v8504_v47 = vpop.f32.mrb[31].mxu1  ;;  %v3775_v48 = vpop.f32.mrb[20].mxu0 }
0x1706   : > { %v3779_v61 = vmul.f32 0.35355338, %v3775_v48  ;;  %v8514_v49 = vpop.f32.mrb[21].mxu0  ;;  %v3452_v47 = vld [vmem:[#allocation8 + $0x8] sm:$0xff] }
0x1707   : > { %v3613_v50 = vsel %vm10889_vm11, %v3612_v46, -1e+30  ;;  %v3451_v46 = vld [vmem:[#allocation8] sm:$0xff] }
0x1708   : > { %v3614_v52 = vsel %vm1371_vm3, %v3613_v50, -inf  ;;  %v3780_v2 = vsel %vm10889_vm11, %v3779_v61, -1e+30  ;;  %v8897_v48 = vpack.c.bf16 %v3452_v47, %v3451_v46 }
0x1709   : > { %v3942_v14 = vpop.f32.mrb[22].mxu0  ;;  %3615 = vmax.xlane.f32.xlu1 %v3614_v52  ;;  %v3781_v3 = vsel %vm1371_vm3, %v3780_v2, -inf }
0x170a   : > { %v3946_v53 = vmul.f32 0.35355338, %v3942_v14  ;;  %3782 = vmax.xlane.f32.xlu0 %v3781_v3  ;;  %v8524_v54 = vpop.f32.mrb[23].mxu0  ;;  %8898 = vmatpush3.bf16.msra.mxu0 %v8897_v48  ;;  %v3454_v14 = vld [vmem:[#allocation8 + $0x18] sm:$0xff] }
0x170b   : > { %8899 = vmatprep.subr.bf16.mxu0 %v9970_v0 }
0x170c   : > { %v3947_v51 = vsel %vm10889_vm11, %v3946_v53, -1e+30 }
0x170d   : > { %v4109_v56 = vpop.f32.mrb[24].mxu0  ;;  %v3948_v57 = vsel %vm1371_vm3, %v3947_v51, -inf }
0x170e   : > { %v4113_v59 = vmul.f32 0.35355338, %v4109_v56  ;;  %3949 = vmax.xlane.f32.xlu0 %v3948_v57  ;;  %v8534_v60 = vpop.f32.mrb[25].mxu0  ;;  %v7980_v57 = vld [vmem:[%s11526_s7 + $0x1] ss:$0 sm:$0xff] }
0x1710   : > { %v4114_v63 = vsel %vm10889_vm11, %v4113_v59, -1e+30  ;;  %v3425_v59 = vadd.f32 %v7980_v57, %v10884_v41 }
0x1711   : > { %v4115_v4 = vsel %vm1371_vm3, %v4114_v63, -inf }
0x1712   : > { %4116 = vmax.xlane.f32.xlu1 %v4115_v4  ;;  %v3428_v60 = vadd.f32 %v3425_v59, %v10814_v62 }
0x1723   : > { %3792 = vrot.lane.b32.xlu1 %v10844_v28, %s11534_s9 }
0x1796   : > { %v3616_v15 = vpop.xlane.xlu1 %3615 }
0x1797   : > { %v3617_v6 = vsub.f32 %v3613_v50, %v3616_v15  ;;  %v3783_v7 = vpop.xlane.xlu0 %3782 }
0x1798   : > { %v3784_v8 = vsub.f32 %v3780_v2, %v3783_v7  ;;  %v3453_v2 = vld [vmem:[#allocation8 + $0x10] sm:$0xff] }
0x1799   : > { %v3618_v9 = vmul.f32 1.442695, %v3617_v6  ;;  %v8900_v3 = vpack.c.bf16 %v3454_v14, %v3453_v2  ;;  %v10971_v2 = vld [vmem:[%s11545_s10] ss:$0 sm:$0xff] }
0x179a   : > { %v3785_v10 = vmul.f32 1.442695, %v3784_v8 }
0x179b   : > { %9288 = vpow2.f32 %v3618_v9  ;;  %v3950_v23 = vpop.xlane.xlu0 %3949  ;;  %8901 = vmatpush3.bf16.msra.mxu0 %v8900_v3  ;;  %v10974_v3 = vld [vmem:[%s10142_s21] ss:$0 sm:$0xff] }
0x179c   : > { %9290 = vpow2.f32 %v3785_v10  ;;  %v3951_v24 = vsub.f32 %v3947_v51, %v3950_v23  ;;  %8908 = vmatprep.subr.bf16.mxu0 %v9970_v0 }
0x179e   : > { %v3952_v25 = vmul.f32 1.442695, %v3951_v24 }
0x179f   : > { %v4117_v11 = vpop.xlane.xlu1 %4116 }
0x17a0   : > { %v4118_v12 = vsub.f32 %v4114_v63, %v4117_v11  ;;  %v3429_v63 = vsel %vm1294_vm2, %v3428_v60, 0.0 }
0x17a2   : > { %v4119_v13 = vmul.f32 1.442695, %v4118_v12 }
0x17a3   : > { %v3793_v29 = vpop.permute.xlu1 %3792 }
0x17a4   : > { %9292 = vpow2.f32 %v4119_v13  ;;  %v4329_v13 = vld [vmem:[#allocation14] sm:$0xff] }
0x17a5   : > { %v9289_v16 = vpop.eup %9288  ;;  %9294 = vpow2.f32 %v3952_v25  ;;  %v7996_v25 = vld [vmem:[#allocation10] ss:$0 sm:$0xff] }
0x17a6   : > { %v9291_v17 = vpop.eup %9290  ;;  %v3620_v19 = vsel %vm1371_vm3, %v9289_v16, 0.0 }
0x17a7   : > { %3621 = vadd.xlane.f32.xlu0 %v3620_v19  ;;  %v3787_v20 = vsel %vm1371_vm3, %v9291_v17, 0.0  ;;  %v4331_v19 = vld [vmem:[#allocation14 + $0x10] sm:$0xff] }
0x17a8   : > { %3788 = vadd.xlane.f32.xlu1 %v3787_v20  ;;  %v4332_v20 = vld [vmem:[#allocation14 + $0x18] sm:$0xff] }
0x17ae   : > { %v9293_v21 = vpop.eup %9292 }
0x17af   : > { %v4121_v22 = vsel %vm1371_vm3, %v9293_v21, 0.0  ;;  %v9295_v26 = vpop.eup %9294 }
0x17b0   : > { %4122 = vadd.xlane.f32.xlu1 %v4121_v22  ;;  %v3954_v18 = vsel %vm1371_vm3, %v9295_v26, 0.0 }
0x17bd   : > { %3625 = vrot.lane.b32.xlu0 %v10844_v28, %s11535_s14 }
0x17c1   : > { %3959 = vrot.lane.b32.xlu1 %v10844_v28, %s11536_s15 }
0x17dc   : > { %3955 = vadd.xlane.f32.xlu0 %v3954_v18 }
0x17f2   : > { %4126 = vrot.lane.b32.xlu0 %v10844_v28, %s11537_s16 }
0x1834   : > { %v3622_v30 = vpop.xlane.xlu0 %3621 }
0x1835   : > { %9296 = vrcp.f32 %v3622_v30  ;;  %v3789_v31 = vpop.xlane.xlu1 %3788 }
0x1836   : > { %9298 = vrcp.f32 %v3789_v31 }
0x1838   : > { %v3626_v32 = vpop.permute.xlu0 %3625 }
0x1839   : > { %8506 = vmatpush3.msra.mxu1 %v3626_v32 }
0x183a   : > { %8515 = vmatprep.subr.mxu1 %v9972_v1 }
0x183d   : > { %v4123_v35 = vpop.xlane.xlu1 %4122 }
0x183f   : > { %v9297_v33 = vpop.eup %9296 }
0x1840   : > { %v3624_v34 = vmul.f32 %v9297_v33, %v9289_v16  ;;  %v9299_v36 = vpop.eup %9298  ;;  %v4330_v16 = vld [vmem:[#allocation14 + $0x8] sm:$0xff] }
0x1841   : > { %v3791_v28 = vmul.f32 %v9299_v36, %v9291_v17  ;;  %v3960_v37 = vpop.permute.xlu1 %3959  ;;  %v8909_v17 = vpack.c.bf16 %v4330_v16, %v4329_v13 }
0x1842   : > { %8508 = vmatmul.mubr.msk.f32.vlgmr.msra.gmra.mrb[32].mxu1 %vm1371_vm3, %v3624_v34 }
0x1843   : > { %8516 = vmatpush3.msra.mxu1 %v3793_v29  ;;  %8517 = vmatprep.mubr.msk.f32.mxu1 %vm9971_vm0, %v9972_v1 }
0x1844   : > { %8525 = vmatprep.subr.mxu1 %v9972_v1 }
0x1846   : > { %8518 = vmatmul.mubr.msk.f32.vlgmr.msra.gmra.mrb[34].mxu1 %vm1371_vm3, %v3791_v28 }
0x1847   : > { %8526 = vmatpush3.msra.mxu1 %v3960_v37  ;;  %8527 = vmatprep.mubr.msk.f32.mxu1 %vm9971_vm0, %v9972_v1 }
0x1848   : > { %8535 = vmatprep.subr.mxu1 %v9972_v1 }
0x1869   : > { %v3956_v38 = vpop.xlane.xlu0 %3955 }
0x186a   : > { %9300 = vrcp.f32 %v3956_v38 }
0x186b   : > { %9302 = vrcp.f32 %v4123_v35 }
0x186d   : > { %v4127_v43 = vpop.permute.xlu0 %4126 }
0x1874   : > { %v9301_v39 = vpop.eup %9300 }
0x1875   : > { %v3958_v40 = vmul.f32 %v9301_v39, %v9295_v26  ;;  %v9303_v42 = vpop.eup %9302  ;;  %v4324_v39 = vld [vmem:[#allocation11] sm:$0xff] }
0x1876   : > { %v4125_v44 = vmul.f32 %v9303_v42, %v9293_v21  ;;  %v8912_v21 = vpack.c.bf16 %v4332_v20, %v4331_v19 }
0x1877   : > { %8528 = vmatmul.mubr.msk.f32.vlgmr.msra.gmra.mrb[36].mxu1 %vm1371_vm3, %v3958_v40  ;;  %v4325_v40 = vld [vmem:[#allocation11 + $0x8] sm:$0xff] }
0x1878   : > { %8536 = vmatpush3.msra.mxu1 %v4127_v43  ;;  %8537 = vmatprep.mubr.msk.f32.mxu1 %vm9971_vm0, %v9972_v1  ;;  %v8903_v42 = vpack.c.bf16 %v4325_v40, %v4324_v39 }
0x1879   : > { %8902 = vmatprep.subr.bf16.mxu1 %v9970_v0 }
0x187b   : > { %8538 = vmatmul.mubr.msk.f32.vlgmr.msra.gmra.mrb[38].mxu1 %vm1371_vm3, %v4125_v44  ;;  %v8002_v44 = vld [vmem:[#allocation16] ss:$0 sm:$0xff] }
0x187c   : > { %8559 = vmatprep.mubr.msk.f32.mxu1 %vm9971_vm0, %v9972_v1  ;;  %8904 = vmatpush3.bf16.msra.mxu1 %v8903_v42 }
0x187d   : > { %8905 = vmatprep.subr.bf16.mxu1 %v9970_v0 }
0x1915   : > { %v3697_v61 = vpop.f32.mrb[32].mxu1 }
0x1916   : > { %v8509_v49 = vpop.f32.mrb[33].mxu1 }
0x1919   : > { %v3864_v50 = vpop.f32.mrb[34].mxu1 }
0x191a   : > { %4203 = vrot.lane.b32.xlu1 %v3864_v50, %s11538_s17  ;;  %v8519_v52 = vpop.f32.mrb[35].mxu1 }
0x194a   : > { %v4031_v53 = vpop.f32.mrb[36].mxu1 }
0x194b   : > { %4207 = vrot.lane.b32.xlu0 %v4031_v53, %s11539_s19  ;;  %v8529_v54 = vpop.f32.mrb[37].mxu1 }
0x194e   : > { %v4198_v51 = vpop.f32.mrb[38].mxu1 }
0x194f   : > { %4211 = vrot.lane.b32.xlu1 %v4198_v51, %s11540_s20  ;;  %v8539_v56 = vpop.f32.mrb[39].mxu1 }
0x1950   : > { %v8000_v56 = vld [vmem:[#allocation13] ss:$0 sm:$0xff] }
0x196a   : > { %3430 = vadd.xlane.f32.xlu0 %v3429_v63 }
0x198c   : > { %v4204_v4 = vpop.permute.xlu1 %4203 }
0x198d   : > { %v4214_v6 = vsel %vm1371_vm3, %v3697_v61, %v4204_v4 }
0x19bd   : > { %v4208_v15 = vpop.permute.xlu0 %4207 }
0x19be   : > { %v4215_v7 = vsel %vm2055_vm6, %v4214_v6, %v4208_v15 }
0x19c1   : > { %v4212_v8 = vpop.permute.xlu1 %4211 }
0x19c2   : > { %v4216_v9 = vsel %vm2057_vm7, %v4215_v7, %v4212_v8 }
0x19c3   : > { %8549 = vmatmul.mubr.msk.f32.vlgmr.msra.gmra.mrb[26].mxu0 %vm1294_vm2, %v4216_v9 }
0x19c4   : > { %8570 = vmatprep.mubr.msk.f32.mxu0 %vm9971_vm0, %v9972_v1  ;;  %8910 = vmatpush3.bf16.msra.mxu0 %v8909_v17 }
0x19c5   : > { %8911 = vmatprep.subr.bf16.mxu0 %v9970_v0 }
0x19c8   : > { %8913 = vmatpush3.bf16.msra.mxu0 %v8912_v21 }
0x19c9   : > { %8583 = vmatprep.subr.mxu0 %v9972_v1 }
0x19f7   : > { %v3431_v41 = vpop.xlane.xlu0 %3430 }
0x19f8   : > { %v3432_v10 = vmul.f32 0.03125, %v3431_v41 }
0x19fa   : > { %v3433_v62 = vsub.f32 %v3428_v60, %v3432_v10 }
0x19fc   : > { %v3434_v11 = vmul.f32 %v3433_v62, %v3433_v62 }
0x19fe   : > { %v3435_v12 = vsel %vm1294_vm2, %v3434_v11, 0.0 }
0x19ff   : > { %3436 = vadd.xlane.f32.xlu0 %v3435_v12 }
0x1a8c   : > { %v3437_v22 = vpop.xlane.xlu0 %3436 }
0x1a8d   : > { %v3438_v23 = vmul.f32 0.03125, %v3437_v22 }
0x1a8f   : > { %v3439_v24 = vadd.f32 1e-05, %v3438_v23 }
0x1a91   : > { %9304 = vrsqrt.f32 %v3439_v24 }
0x1a96   : > { %v4292_v26 = vpop.f32.mrb[26].mxu0 }
0x1a97   : > { %v4293_v18 = vadd.f32 %v7996_v25, %v4292_v26  ;;  %v8550_v29 = vpop.f32.mrb[27].mxu0 }
0x1a99   : > { %v4296_v30 = vadd.f32 %v4293_v18, %v10824_v5 }
0x1a9b   : > { %v9305_v31 = vpop.eup %9304  ;;  %v4297_v32 = vsel %vm1294_vm2, %v4296_v30, 0.0 }
0x1a9c   : > { %v3441_v33 = vmul.f32 %v9305_v31, %v3433_v62  ;;  %4298 = vadd.xlane.f32.xlu1 %v4297_v32 }
0x1a9e   : > { %v3442_v34 = vmul.f32 %v10807_v55, %v3441_v33  ;;  %v4326_v55 = vld [vmem:[#allocation11 + $0x10] sm:$0xff] }
0x1aa0   : > { %v10955_v35 = vadd.f32 %v10810_v58, %v3442_v34  ;;  %v4327_v58 = vld [vmem:[#allocation11 + $0x18] sm:$0xff] }
0x1aa1   : > { %v8906_v43 = vpack.c.bf16 %v4327_v58, %v4326_v55 }
0x1aa2   : > { %8571 = vmatmul.mubr.msk.f32.vlgmr.msra.gmra.mrb[28].mxu0 %vm1294_vm2, %v10955_v35 }
0x1aa3   : > { %8585 = vmatprep.mubr.msk.f32.mxu0 %vm9971_vm0, %v9972_v1  ;;  %8907 = vmatpush3.bf16.msra.mxu1 %v8906_v43 }
0x1aa4   : > { %8573 = vmatprep.subr.mxu1 %v9972_v1 }
0x1b29   : > { %v4299_v36 = vpop.xlane.xlu1 %4298 }
0x1b2a   : > { %v4300_v28 = vmul.f32 0.03125, %v4299_v36 }
0x1b2c   : > { %v4301_v37 = vsub.f32 %v4296_v30, %v4300_v28 }
0x1b2e   : > { %v4302_v5 = vmul.f32 %v4301_v37, %v4301_v37 }
0x1b30   : > { %v4303_v38 = vsel %vm1294_vm2, %v4302_v5, 0.0 }
0x1b31   : > { %4304 = vadd.xlane.f32.xlu0 %v4303_v38 }
0x1b75   : > { %v4493_v46 = vpop.f32.mrb[28].mxu0 }
0x1b76   : > { %v10964_v47 = vadd.f32 %v8002_v44, %v4493_v46  ;;  %v8572_v48 = vpop.f32.mrb[29].mxu0 }
0x1b78   : > { %4664 = vrot.lane.b32.xlu1 %v10964_v47, %s11530_s4 }
0x1b7c   : > { %4831 = vrot.lane.b32.xlu1 %v10964_v47, %s11529_s3 }
0x1bbe   : > { %v4305_v61 = vpop.xlane.xlu0 %4304 }
0x1bbf   : > { %v4306_v49 = vmul.f32 0.03125, %v4305_v61 }
0x1bc1   : > { %v4307_v50 = vadd.f32 1e-05, %v4306_v49 }
0x1bc3   : > { %9306 = vrsqrt.f32 %v4307_v50 }
0x1bcd   : > { %v9307_v52 = vpop.eup %9306 }
0x1bce   : > { %v4309_v14 = vmul.f32 %v9307_v52, %v4301_v37 }
0x1bd0   : > { %v4316_v53 = vmul.f32 %v10971_v2, %v4309_v14 }
0x1bd2   : > { %v10978_v54 = vadd.f32 %v10974_v3, %v4316_v53 }
0x1bd4   : > { %8560 = vmatmul.mubr.msk.f32.vlgmr.msra.gmra.mrb[40].mxu1 %vm1294_vm2, %v10978_v54 }
0x1bd5   : > { %8574 = vmatpush3.xpose.msk.msra.mxu1 %vm1371_vm3, %v10964_v47  ;;  %8575 = vmatprep.mubr.msk.f32.mxu1 %vm9971_vm0, %v9972_v1 }
0x1bd6   : > { %8578 = vmatprep.subr.mxu1 %v9972_v1 }
0x1bea   : > { %v4665_v51 = vpop.permute.xlu1 %4664 }
0x1beb   : > { %8584 = vmatpush3.xpose.msk.msra.mxu0 %vm1371_vm3, %v4665_v51 }
0x1bec   : > { %8593 = vmatprep.subr.mxu0 %v9972_v1 }
0x1bee   : > { %v4832_v63 = vpop.permute.xlu1 %4831 }
0x1ca7   : > { %v4414_v57 = vpop.f32.mrb[40].mxu1 }
0x1ca8   : > { %v4415_v59 = vadd.f32 %v8000_v56, %v4414_v57  ;;  %v8561_v60 = vpop.f32.mrb[41].mxu1 }
0x1caa   : > { %4829 = vrot.lane.b32.xlu1 %v4415_v59, %s11529_s3  ;;  %4662 = vrot.lane.b32.xlu0 %v4415_v59, %s11530_s4 }
0x1cab   : > { %8576 = vmatmul.mubr.msk.f32.vlgmr.msra.gmra.mrb[42].mxu1 %vm1371_vm3, %v4415_v59 }
0x1cac   : > { %8580 = vmatprep.mubr.msk.f32.mxu1 %vm9971_vm0, %v9972_v1 }
0x1cae   : > { %4996 = vrot.lane.b32.xlu1 %v4415_v59, %s11531_s5  ;;  %4998 = vrot.lane.b32.xlu0 %v10964_v47, %s11531_s5 }
0x1d1c   : > { %v4663_v4 = vpop.permute.xlu0 %4662  ;;  %v4830_v15 = vpop.permute.xlu1 %4829 }
0x1d1d   : > { %8586 = vmatmul.mubr.msk.f32.vlgmr.msra.gmra.mrb[30].mxu0 %vm1371_vm3, %v4663_v4 }
0x1d1e   : > { %8594 = vmatpush3.xpose.msk.msra.mxu0 %vm1371_vm3, %v4832_v63  ;;  %8595 = vmatprep.mubr.msk.f32.mxu0 %vm9971_vm0, %v9972_v1 }
0x1d1f   : > { %8603 = vmatprep.subr.mxu0 %v9972_v1 }
0x1d20   : > { %v4999_v6 = vpop.permute.xlu0 %4998  ;;  %v4997_v7 = vpop.permute.xlu1 %4996 }
0x1d21   : > { %8596 = vmatmul.mubr.msk.f32.vlgmr.msra.gmra.mrb[32].mxu0 %vm1371_vm3, %v4830_v15 }
0x1d22   : > { %8604 = vmatpush3.xpose.msk.msra.mxu0 %vm1371_vm3, %v4999_v6  ;;  %8605 = vmatprep.mubr.msk.f32.mxu0 %vm9971_vm0, %v9972_v1 }
0x1d23   : > { %8914 = vmatprep.subr.bf16.mxu0 %v9970_v0 }
0x1d25   : > { %8606 = vmatmul.mubr.msk.f32.vlgmr.msra.gmra.mrb[34].mxu0 %vm1371_vm3, %v4997_v7 }
0x1d26   : > { %8621 = vmatprep.mubr.msk.f32.mxu0 %vm9971_vm0, %v9972_v1 }
0x1d7e   : > { %v4569_v8 = vpop.f32.mrb[42].mxu1 }
0x1d7f   : > { %v4573_v9 = vmul.f32 0.35355338, %v4569_v8  ;;  %v8577_v41 = vpop.f32.mrb[43].mxu1 }
0x1d80   : > { %v4334_v41 = vld [vmem:[#allocation17] sm:$0xff] }
0x1d81   : > { %v4574_v10 = vsel %vm1452_vm5, %v4573_v9, -1e+30 }
0x1d82   : > { %v4575_v62 = vsel %vm1371_vm3, %v4574_v10, -inf }
0x1d83   : > { %4576 = vmax.xlane.f32.xlu0 %v4575_v62 }
0x1df0   : > { %v4736_v11 = vpop.f32.mrb[30].mxu0 }
0x1df1   : > { %v4740_v12 = vmul.f32 0.35355338, %v4736_v11  ;;  %v8587_v13 = vpop.f32.mrb[31].mxu0  ;;  %v4336_v11 = vld [vmem:[#allocation17 + $0x10] sm:$0xff] }
0x1df3   : > { %v4741_v16 = vsel %vm1452_vm5, %v4740_v12, -1e+30  ;;  %v4337_v12 = vld [vmem:[#allocation17 + $0x18] sm:$0xff] }
0x1df4   : > { %v4903_v17 = vpop.f32.mrb[32].mxu0  ;;  %v4742_v19 = vsel %vm1371_vm3, %v4741_v16, -inf  ;;  %v8918_v13 = vpack.c.bf16 %v4337_v12, %v4336_v11 }
0x1df5   : > { %v4907_v20 = vmul.f32 0.35355338, %v4903_v17  ;;  %4743 = vmax.xlane.f32.xlu1 %v4742_v19  ;;  %v8597_v21 = vpop.f32.mrb[33].mxu0 }
0x1df7   : > { %v4908_v22 = vsel %vm1452_vm5, %v4907_v20, -1e+30 }
0x1df8   : > { %v5070_v23 = vpop.f32.mrb[34].mxu0  ;;  %v4909_v24 = vsel %vm1371_vm3, %v4908_v22, -inf }
0x1df9   : > { %v5074_v25 = vmul.f32 0.35355338, %v5070_v23  ;;  %v8607_v26 = vpop.f32.mrb[35].mxu0  ;;  %4910 = vmax.xlane.f32.xlu0 %v4909_v24 }
0x1dfb   : > { %v5075_v18 = vsel %vm1452_vm5, %v5074_v25, -1e+30 }
0x1dfc   : > { %v5076_v29 = vsel %vm1371_vm3, %v5075_v18, -inf }
0x1dfd   : > { %5077 = vmax.xlane.f32.xlu0 %v5076_v29 }
0x1e06   : > { %4586 = vrot.lane.b32.xlu1 %v10964_v47, %s11528_s28 }
0x1e10   : > { %v4577_v30 = vpop.xlane.xlu0 %4576 }
0x1e11   : > { %v4578_v31 = vsub.f32 %v4574_v10, %v4577_v30  ;;  %v4335_v10 = vld [vmem:[#allocation17 + $0x8] sm:$0xff]  ;;  %v8016_v30 = vld [vmem:[#allocation19] ss:$0 sm:$0xff] }
0x1e12   : > { %v8915_v62 = vpack.c.bf16 %v4335_v10, %v4334_v41 }
0x1e13   : > { %v4579_v32 = vmul.f32 1.442695, %v4578_v31 }
0x1e14   : > { %8916 = vmatpush3.bf16.msra.mxu0 %v8915_v62 }
0x1e15   : > { %9308 = vpow2.f32 %v4579_v32  ;;  %8917 = vmatprep.subr.bf16.mxu0 %v9970_v0 }
0x1e18   : > { %8919 = vmatpush3.bf16.msra.mxu0 %v8918_v13 }
0x1e19   : > { %8926 = vmatprep.subr.bf16.mxu0 %v9970_v0 }
0x1e1f   : > { %v9309_v33 = vpop.eup %9308 }
0x1e20   : > { %v4581_v34 = vsel %vm1371_vm3, %v9309_v33, 0.0 }
0x1e2a   : > { %4582 = vadd.xlane.f32.xlu1 %v4581_v34 }
0x1e82   : > { %v4744_v36 = vpop.xlane.xlu1 %4743 }
0x1e83   : > { %v4745_v28 = vsub.f32 %v4741_v16, %v4744_v36 }
0x1e85   : > { %v4746_v37 = vmul.f32 1.442695, %v4745_v28 }
0x1e86   : > { %v4587_v5 = vpop.permute.xlu1 %4586  ;;  %v4911_v38 = vpop.xlane.xlu0 %4910 }
0x1e87   : > { %9310 = vpow2.f32 %v4746_v37  ;;  %v4912_v39 = vsub.f32 %v4908_v22, %v4911_v38  ;;  %8579 = vmatpush3.msra.mxu1 %v4587_v5 }
0x1e88   : > { %8588 = vmatprep.subr.mxu1 %v9972_v1 }
0x1e89   : > { %v4913_v40 = vmul.f32 1.442695, %v4912_v39 }
0x1e8a   : > { %v5078_v42 = vpop.xlane.xlu0 %5077 }
0x1e8b   : > { %9312 = vpow2.f32 %v4913_v40  ;;  %v5079_v55 = vsub.f32 %v5075_v18, %v5078_v42  ;;  %v5273_v40 = vld [vmem:[#allocation20] sm:$0xff]  ;;  %v5274_v42 = vld [vmem:[#allocation20 + $0x8] sm:$0xff] }
0x1e8d   : > { %v5080_v58 = vmul.f32 1.442695, %v5079_v55  ;;  %v8921_v55 = vpack.c.bf16 %v5274_v42, %v5273_v40  ;;  %v8024_v42 = vld [vmem:[#allocation7 + $0x1] ss:$0 sm:$0xff] }
0x1e8f   : > { %9314 = vpow2.f32 %v5080_v58  ;;  %v5275_v58 = vld [vmem:[#allocation20 + $0x10] sm:$0xff] }
0x1e91   : > { %v9311_v43 = vpop.eup %9310 }
0x1e92   : > { %v4748_v44 = vsel %vm1371_vm3, %v9311_v43, 0.0 }
0x1e93   : > { %4749 = vadd.xlane.f32.xlu0 %v4748_v44 }
0x1e95   : > { %v9313_v46 = vpop.eup %9312 }
0x1e96   : > { %v4915_v48 = vsel %vm1371_vm3, %v9313_v46, 0.0 }
0x1e97   : > { %4916 = vadd.xlane.f32.xlu1 %v4915_v48 }
0x1e99   : > { %v9315_v61 = vpop.eup %9314 }
0x1e9a   : > { %v5082_v49 = vsel %vm1371_vm3, %v9315_v61, 0.0 }
0x1e9b   : > { %5083 = vadd.xlane.f32.xlu0 %v5082_v49 }
0x1ea8   : > { %4920 = vrot.lane.b32.xlu1 %v10964_v47, %s11532_s6 }
0x1eac   : > { %5087 = vrot.lane.b32.xlu1 %v10964_v47, %s11533_s8 }
0x1eb1   : > { %4753 = vrot.lane.b32.xlu0 %v10964_v47, %s11527_s2 }
0x1eb7   : > { %v4583_v50 = vpop.xlane.xlu1 %4582 }
0x1eb8   : > { %9316 = vrcp.f32 %v4583_v50 }
0x1ec2   : > { %v9317_v52 = vpop.eup %9316 }
0x1ec3   : > { %v4585_v14 = vmul.f32 %v9317_v52, %v9309_v33 }
0x1ec5   : > { %8581 = vmatmul.mubr.msk.f32.vlgmr.msra.gmra.mrb[44].mxu1 %vm1371_vm3, %v4585_v14  ;;  %v5362_v14 = vld [vmem:[%s11546_s18] sm:$0xff] }
0x1ec6   : > { %8590 = vmatprep.mubr.msk.f32.mxu1 %vm9971_vm0, %v9972_v1 }
0x1f20   : > { %v4750_v53 = vpop.xlane.xlu0 %4749 }
0x1f21   : > { %9318 = vrcp.f32 %v4750_v53  ;;  %v5363_v53 = vld [vmem:[%s11546_s18 + $0x8] sm:$0xff] }
0x1f24   : > { %v4917_v51 = vpop.xlane.xlu1 %4916 }
0x1f25   : > { %9320 = vrcp.f32 %v4917_v51  ;;  %v8927_v51 = vpack.c.bf16 %v5363_v53, %v5362_v14 }
0x1f28   : > { %v5084_v56 = vpop.xlane.xlu0 %5083  ;;  %v4921_v60 = vpop.permute.xlu1 %4920 }
0x1f29   : > { %9322 = vrcp.f32 %v5084_v56  ;;  %v5364_v56 = vld [vmem:[%s11546_s18 + $0x10] sm:$0xff] }
0x1f2b   : > { %v9319_v57 = vpop.eup %9318 }
0x1f2c   : > { %v4752_v59 = vmul.f32 %v9319_v57, %v9311_v43  ;;  %v4754_v63 = vpop.permute.xlu0 %4753  ;;  %v5088_v15 = vpop.permute.xlu1 %5087  ;;  %v5276_v43 = vld [vmem:[#allocation20 + $0x18] sm:$0xff]  ;;  %v5365_v57 = vld [vmem:[%s11546_s18 + $0x18] sm:$0xff] }
0x1f2d   : > { %8589 = vmatpush3.msra.mxu1 %v4754_v63  ;;  %v5367_v63 = vld [vmem:[%s11546_s18 + $0x28] sm:$0xff] }
0x1f2e   : > { %8591 = vmatmul.mubr.msk.f32.vlgmr.msra.gmra.mrb[46].mxu1 %vm1371_vm3, %v4752_v59  ;;  %8598 = vmatprep.subr.mxu1 %v9972_v1  ;;  %v8930_v59 = vpack.c.bf16 %v5365_v57, %v5364_v56 }
0x1f2f   : > { %v9321_v47 = vpop.eup %9320  ;;  %8599 = vmatpush3.msra.mxu1 %v4921_v60  ;;  %8600 = vmatprep.mubr.msk.f32.mxu1 %vm9971_vm0, %v9972_v1  ;;  %v5366_v60 = vld [vmem:[%s11546_s18 + $0x20] sm:$0xff] }
0x1f30   : > { %v4919_v4 = vmul.f32 %v9321_v47, %v9313_v46  ;;  %8608 = vmatprep.subr.mxu1 %v9972_v1  ;;  %v8933_v47 = vpack.c.bf16 %v5367_v63, %v5366_v60 }
0x1f32   : > { %8601 = vmatmul.mubr.msk.f32.vlgmr.msra.gmra.mrb[48].mxu1 %vm1371_vm3, %v4919_v4  ;;  %v5368_v4 = vld [vmem:[%s11546_s18 + $0x30] sm:$0xff] }
0x1f33   : > { %v9323_v6 = vpop.eup %9322  ;;  %8609 = vmatpush3.msra.mxu1 %v5088_v15  ;;  %8610 = vmatprep.mubr.msk.f32.mxu1 %vm9971_vm0, %v9972_v1  ;;  %v5369_v15 = vld [vmem:[%s11546_s18 + $0x38] sm:$0xff] }
0x1f34   : > { %v5086_v7 = vmul.f32 %v9323_v6, %v9315_v61  ;;  %8920 = vmatprep.subr.bf16.mxu1 %v9970_v0  ;;  %v8936_v6 = vpack.c.bf16 %v5369_v15, %v5368_v4 }
0x1f36   : > { %8611 = vmatmul.mubr.msk.f32.vlgmr.msra.gmra.mrb[50].mxu1 %vm1371_vm3, %v5086_v7  ;;  %v8018_v7 = vld [vmem:[#allocation22] ss:$0 sm:$0xff] }
0x1f37   : > { %8632 = vmatprep.mubr.msk.f32.mxu1 %vm9971_vm0, %v9972_v1  ;;  %8922 = vmatpush3.bf16.msra.mxu1 %v8921_v55 }
0x1f38   : > { %8923 = vmatprep.subr.bf16.mxu1 %v9970_v0 }
0x1f98   : > { %v4658_v8 = vpop.f32.mrb[44].mxu1 }
0x1f99   : > { %v8582_v9 = vpop.f32.mrb[45].mxu1 }
0x2001   : > { %v4825_v16 = vpop.f32.mrb[46].mxu1 }
0x2002   : > { %5164 = vrot.lane.b32.xlu0 %v4825_v16, %s11538_s17  ;;  %v8592_v17 = vpop.f32.mrb[47].mxu1  ;;  %v8020_v16 = vld [vmem:[#allocation23] ss:$0 sm:$0xff] }
0x2005   : > { %v4992_v19 = vpop.f32.mrb[48].mxu1 }
0x2006   : > { %5168 = vrot.lane.b32.xlu1 %v4992_v19, %s11539_s19  ;;  %v8602_v20 = vpop.f32.mrb[49].mxu1 }
0x2009   : > { %v5159_v21 = vpop.f32.mrb[50].mxu1 }
0x200a   : > { %5172 = vrot.lane.b32.xlu0 %v5159_v21, %s11540_s20  ;;  %v8612_v22 = vpop.f32.mrb[51].mxu1 }
0x2074   : > { %v5165_v23 = vpop.permute.xlu0 %5164 }
0x2075   : > { %v5175_v25 = vsel %vm1371_vm3, %v4658_v8, %v5165_v23 }
0x2078   : > { %v5169_v24 = vpop.permute.xlu1 %5168 }
0x2079   : > { %v5176_v26 = vsel %vm2055_vm6, %v5175_v25, %v5169_v24 }
0x207c   : > { %v5173_v18 = vpop.permute.xlu0 %5172 }
0x207d   : > { %v5177_v29 = vsel %vm2057_vm7, %v5176_v26, %v5173_v18 }
0x207e   : > { %8622 = vmatmul.mubr.msk.f32.vlgmr.msra.gmra.mrb[36].mxu0 %vm1294_vm2, %v5177_v29  ;;  %v5471_v29 = vld [vmem:[#allocation5 + $0x20] sm:$0xff] }
0x207f   : > { %8651 = vmatprep.mubr.msk.f32.mxu0 %vm9971_vm0, %v9972_v1  ;;  %8928 = vmatpush3.bf16.msra.mxu0 %v8927_v51 }
0x2080   : > { %8929 = vmatprep.subr.bf16.mxu0 %v9970_v0 }
0x2083   : > { %8931 = vmatpush3.bf16.msra.mxu0 %v8930_v59 }
0x2084   : > { %8932 = vmatprep.subr.bf16.mxu0 %v9970_v0 }
0x2087   : > { %8934 = vmatpush3.bf16.msra.mxu0 %v8933_v47 }
0x2088   : > { %8935 = vmatprep.subr.bf16.mxu0 %v9970_v0 }
0x208b   : > { %8937 = vmatpush3.bf16.msra.mxu0 %v8936_v6 }
0x208c   : > { %8675 = vmatprep.subr.mxu0 %v9972_v1 }
0x2151   : > { %v5253_v31 = vpop.f32.mrb[36].mxu0 }
0x2152   : > { %v5254_v32 = vadd.f32 %v8016_v30, %v5253_v31  ;;  %v8623_v33 = vpop.f32.mrb[37].mxu0  ;;  %v5472_v30 = vld [vmem:[#allocation5 + $0x28] sm:$0xff] }
0x2153   : > { %v8939_v31 = vpack.c.bf16 %v5472_v30, %v5471_v29  ;;  %v5474_v33 = vld [vmem:[#allocation5 + $0x38] sm:$0xff] }
0x2154   : > { %v5257_v34 = vadd.f32 %v5254_v32, %v10978_v54  ;;  %v8924_v54 = vpack.c.bf16 %v5276_v43, %v5275_v58  ;;  %v5473_v32 = vld [vmem:[#allocation5 + $0x30] sm:$0xff] }
0x2156   : > { %v5258_v36 = vsel %vm1294_vm2, %v5257_v34, 0.0  ;;  %8925 = vmatpush3.bf16.msra.mxu1 %v8924_v54 }
0x2157   : > { %5259 = vadd.xlane.f32.xlu1 %v5258_v36  ;;  %8938 = vmatprep.subr.bf16.mxu1 %v9970_v0 }
0x21e4   : > { %v5260_v28 = vpop.xlane.xlu1 %5259 }
0x21e5   : > { %v5261_v37 = vmul.f32 0.03125, %v5260_v28 }
0x21e7   : > { %v5262_v5 = vsub.f32 %v5257_v34, %v5261_v37  ;;  %v8942_v34 = vpack.c.bf16 %v5474_v33, %v5473_v32 }
0x21e9   : > { %v5263_v38 = vmul.f32 %v5262_v5, %v5262_v5 }
0x21eb   : > { %v5264_v39 = vsel %vm1294_vm2, %v5263_v38, 0.0 }
0x21ec   : > { %5265 = vadd.xlane.f32.xlu0 %v5264_v39 }
0x2279   : > { %v5266_v44 = vpop.xlane.xlu0 %5265 }
0x227a   : > { %v5267_v46 = vmul.f32 0.03125, %v5266_v44 }
0x227c   : > { %v5268_v48 = vadd.f32 1e-05, %v5267_v46 }
0x227e   : > { %9324 = vrsqrt.f32 %v5268_v48 }
0x2288   : > { %v9325_v61 = vpop.eup %9324 }
0x2289   : > { %v5270_v49 = vmul.f32 %v9325_v61, %v5262_v5 }
0x228b   : > { %v5271_v50 = vmul.f32 %v10971_v2, %v5270_v49 }
0x228d   : > { %v5272_v52 = vadd.f32 %v10974_v3, %v5271_v50 }
0x228f   : > { %8633 = vmatmul.mubr.msk.f32.vlgmr.msra.gmra.mrb[52].mxu1 %vm1294_vm2, %v5272_v52 }
0x2290   : > { %8662 = vmatprep.mubr.msk.f32.mxu1 %vm9971_vm0, %v9972_v1  ;;  %8940 = vmatpush3.bf16.msra.mxu1 %v8939_v31 }
0x2291   : > { %8941 = vmatprep.subr.bf16.mxu1 %v9970_v0 }
0x2294   : > { %8943 = vmatpush3.bf16.msra.mxu1 %v8942_v34 }
0x2295   : > { %8665 = vmatprep.subr.mxu1 %v9972_v1 }
0x2362   : > { %v5353_v8 = vpop.f32.mrb[52].mxu1 }
0x2363   : > { %v5354_v9 = vadd.f32 %v8018_v7, %v5353_v8  ;;  %v8634_v41 = vpop.f32.mrb[53].mxu1 }
0x2365   : > { %v5358_v10 = vmul.f32 0.70710677, %v5354_v9  ;;  %v5357_v11 = vmul.f32 0.5, %v5354_v9 }
0x2367   : > { %9326 = verf.f32 %v5358_v10 }
0x2371   : > { %v9327_v62 = vpop.eup %9326 }
0x2372   : > { %v5360_v12 = vadd.f32 1.0, %v9327_v62 }
0x2374   : > { %v5361_v13 = vmul.f32 %v5360_v12, %v5357_v11 }
0x2376   : > { %8652 = vmatmul.mubr.msk.f32.vlgmr.msra.gmra.mrb[38].mxu0 %vm2271_vm8, %v5361_v13 }
0x2377   : > { %8677 = vmatprep.mubr.msk.f32.mxu0 %vm9971_vm0, %v9972_v1 }
0x2449   : > { %v5446_v17 = vpop.f32.mrb[38].mxu0 }
0x244a   : > { %v5447_v19 = vadd.f32 %v8020_v16, %v5446_v17  ;;  %v8653_v20 = vpop.f32.mrb[39].mxu0 }
0x244c   : > { %v5450_v21 = vadd.f32 %v5447_v19, %v5272_v52 }
0x244e   : > { %v5451_v22 = vsel %vm1294_vm2, %v5450_v21, 0.0 }
0x244f   : > { %5452 = vadd.xlane.f32.xlu0 %v5451_v22 }
0x24dc   : > { %v5453_v23 = vpop.xlane.xlu0 %5452 }
0x24dd   : > { %v5454_v24 = vmul.f32 0.03125, %v5453_v23 }
0x24df   : > { %v5455_v25 = vsub.f32 %v5450_v21, %v5454_v24 }
0x24e1   : > { %v5456_v26 = vmul.f32 %v5455_v25, %v5455_v25 }
0x24e3   : > { %v5457_v18 = vsel %vm1294_vm2, %v5456_v26, 0.0 }
0x24e4   : > { %5458 = vadd.xlane.f32.xlu1 %v5457_v18 }
0x2571   : > { %v5459_v36 = vpop.xlane.xlu1 %5458 }
0x2572   : > { %v5460_v28 = vmul.f32 0.03125, %v5459_v36 }
0x2574   : > { %v5461_v37 = vadd.f32 1e-05, %v5460_v28 }
0x2576   : > { %9328 = vrsqrt.f32 %v5461_v37 }
0x2580   : > { %v9329_v5 = vpop.eup %9328 }
0x2581   : > { %v5463_v38 = vmul.f32 %v9329_v5, %v5455_v25 }
0x2583   : > { %v5464_v39 = vmul.f32 %v10971_v2, %v5463_v38 }
0x2585   : > { %v11092_v40 = vadd.f32 %v10974_v3, %v5464_v39 }
0x2587   : > { %8663 = vmatmul.mubr.msk.f32.vlgmr.msra.gmra.mrb[54].mxu1 %vm1294_vm2, %v11092_v40 }
0x2588   : > { %8667 = vmatprep.mubr.msk.f32.mxu1 %vm9971_vm0, %v9972_v1 }
0x265a   : > { %v5559_v55 = vpop.f32.mrb[54].mxu1 }
0x265b   : > { %v11098_v58 = vadd.f32 %v8024_v42, %v5559_v55  ;;  %v8664_v43 = vpop.f32.mrb[55].mxu1 }
0x265d   : > { %5731 = vrot.lane.b32.xlu1 %v11098_v58, %s11527_s2  ;;  %5564 = vrot.lane.b32.xlu0 %v11098_v58, %s11528_s28 }
0x2661   : > { %5729 = vrot.lane.b32.xlu1 %v11098_v58, %s11530_s4  ;;  %5898 = vrot.lane.b32.xlu0 %v11098_v58, %s11532_s6 }
0x2665   : > { %5896 = vrot.lane.b32.xlu1 %v11098_v58, %s11529_s3  ;;  %6065 = vrot.lane.b32.xlu0 %v11098_v58, %s11533_s8 }
0x2669   : > { %6063 = vrot.lane.b32.xlu1 %v11098_v58, %s11531_s5 }
0x26cf   : > { %v5732_v2 = vpop.permute.xlu1 %5731  ;;  %v5565_v3 = vpop.permute.xlu0 %5564 }
0x26d0   : > { %8666 = vmatpush3.xpose.msk.msra.mxu1 %vm1371_vm3, %v5565_v3  ;;  %8676 = vmatpush3.xpose.msk.msra.mxu0 %vm1371_vm3, %v5732_v2 }
0x26d1   : > { %8685 = vmatprep.subr.mxu0 %v9972_v1  ;;  %8670 = vmatprep.subr.mxu1 %v9972_v1 }
0x26d3   : > { %v5730_v54 = vpop.permute.xlu1 %5729  ;;  %8668 = vmatmul.mubr.msk.f32.vlgmr.msra.gmra.mrb[56].mxu1 %vm1371_vm3, %v11098_v58  ;;  %v5899_v44 = vpop.permute.xlu0 %5898 }
0x26d4   : > { %8678 = vmatmul.mubr.msk.f32.vlgmr.msra.gmra.mrb[40].mxu0 %vm1371_vm3, %v5730_v54  ;;  %8672 = vmatprep.mubr.msk.f32.mxu1 %vm9971_vm0, %v9972_v1 }
0x26d5   : > { %8686 = vmatpush3.xpose.msk.msra.mxu0 %vm1371_vm3, %v5899_v44  ;;  %8687 = vmatprep.mubr.msk.f32.mxu0 %vm9971_vm0, %v9972_v1 }
0x26d6   : > { %8695 = vmatprep.subr.mxu0 %v9972_v1 }
0x26d7   : > { %v5897_v46 = vpop.permute.xlu1 %5896  ;;  %v6066_v48 = vpop.permute.xlu0 %6065 }
0x26d8   : > { %8688 = vmatmul.mubr.msk.f32.vlgmr.msra.gmra.mrb[42].mxu0 %vm1371_vm3, %v5897_v46  ;;  %v5478_v46 = vld [vmem:[#allocation8 + $0x20] sm:$0xff] }
0x26d9   : > { %8696 = vmatpush3.xpose.msk.msra.mxu0 %vm1371_vm3, %v6066_v48  ;;  %8697 = vmatprep.mubr.msk.f32.mxu0 %vm9971_vm0, %v9972_v1  ;;  %v5479_v48 = vld [vmem:[#allocation8 + $0x28] sm:$0xff] }
0x26da   : > { %8944 = vmatprep.subr.bf16.mxu0 %v9970_v0 }
0x26db   : > { %v6064_v61 = vpop.permute.xlu1 %6063 }
0x26dc   : > { %8698 = vmatmul.mubr.msk.f32.vlgmr.msra.gmra.mrb[44].mxu0 %vm1371_vm3, %v6064_v61  ;;  %v8945_v61 = vpack.c.bf16 %v5479_v48, %v5478_v46 }
0x26dd   : > { %8713 = vmatprep.mubr.msk.f32.mxu0 %vm9971_vm0, %v9972_v1 }
0x26de   : > { %8946 = vmatpush3.bf16.msra.mxu0 %v8945_v61 }
0x26df   : > { %8947 = vmatprep.subr.bf16.mxu0 %v9970_v0 }
0x27a6   : > { %v5636_v49 = vpop.f32.mrb[56].mxu1 }
0x27a7   : > { %v5640_v50 = vmul.f32 0.35355338, %v5636_v49  ;;  %v8669_v52 = vpop.f32.mrb[57].mxu1  ;;  %v5803_v14 = vpop.f32.mrb[40].mxu0  ;;  %v5480_v49 = vld [vmem:[#allocation8 + $0x30] sm:$0xff] }
0x27a8   : > { %v5807_v53 = vmul.f32 0.35355338, %v5803_v14  ;;  %v8679_v51 = vpop.f32.mrb[41].mxu0 }
0x27a9   : > { %v5641_v56 = vsel %vm10889_vm11, %v5640_v50, -1e+30  ;;  %v5481_v50 = vld [vmem:[#allocation8 + $0x38] sm:$0xff] }
0x27aa   : > { %v5808_v57 = vsel %vm10889_vm11, %v5807_v53, -1e+30  ;;  %v5642_v59 = vsel %vm1371_vm3, %v5641_v56, -inf  ;;  %v8948_v52 = vpack.c.bf16 %v5481_v50, %v5480_v49 }
0x27ab   : > { %v5970_v60 = vpop.f32.mrb[42].mxu0  ;;  %5643 = vmax.xlane.f32.xlu0 %v5642_v59  ;;  %v5809_v63 = vsel %vm1371_vm3, %v5808_v57, -inf }
0x27ac   : > { %v5974_v47 = vmul.f32 0.35355338, %v5970_v60  ;;  %5810 = vmax.xlane.f32.xlu1 %v5809_v63  ;;  %v8689_v4 = vpop.f32.mrb[43].mxu0  ;;  %8949 = vmatpush3.bf16.msra.mxu0 %v8948_v52 }
0x27ad   : > { %8956 = vmatprep.subr.bf16.mxu0 %v9970_v0  ;;  %v6360_v4 = vld [vmem:[#allocation14 + $0x20] sm:$0xff] }
0x27ae   : > { %v5975_v15 = vsel %vm10889_vm11, %v5974_v47, -1e+30 }
0x27af   : > { %v6137_v6 = vpop.f32.mrb[44].mxu0  ;;  %v5976_v7 = vsel %vm1371_vm3, %v5975_v15, -inf }
0x27b0   : > { %v6141_v8 = vmul.f32 0.35355338, %v6137_v6  ;;  %v8699_v9 = vpop.f32.mrb[45].mxu0  ;;  %5977 = vmax.xlane.f32.xlu0 %v5976_v7 }
0x27b2   : > { %v6142_v41 = vsel %vm10889_vm11, %v6141_v8, -1e+30 }
0x27b3   : > { %v6143_v10 = vsel %vm1371_vm3, %v6142_v41, -inf }
0x27b4   : > { %6144 = vmax.xlane.f32.xlu0 %v6143_v10  ;;  %v6362_v10 = vld [vmem:[#allocation14 + $0x30] sm:$0xff] }
0x27bd   : > { %5653 = vrot.lane.b32.xlu1 %v11098_v58, %s11535_s14 }
0x2838   : > { %v5644_v62 = vpop.xlane.xlu0 %5643 }
0x2839   : > { %v5645_v11 = vsub.f32 %v5641_v56, %v5644_v62  ;;  %v5811_v12 = vpop.xlane.xlu1 %5810  ;;  %v6363_v62 = vld [vmem:[#allocation14 + $0x38] sm:$0xff] }
0x283a   : > { %v5812_v13 = vsub.f32 %v5808_v57, %v5811_v12  ;;  %v8960_v12 = vpack.c.bf16 %v6363_v62, %v6362_v10 }
0x283b   : > { %v5646_v16 = vmul.f32 1.442695, %v5645_v11 }
0x283c   : > { %v5813_v17 = vmul.f32 1.442695, %v5812_v13  ;;  %v8038_v13 = vld [vmem:[#allocation10 + $0x1] ss:$0 sm:$0xff] }
0x283d   : > { %9330 = vpow2.f32 %v5646_v16  ;;  %v5654_v19 = vpop.permute.xlu1 %5653  ;;  %v5978_v20 = vpop.xlane.xlu0 %5977 }
0x283e   : > { %9332 = vpow2.f32 %v5813_v17  ;;  %v5979_v21 = vsub.f32 %v5975_v15, %v5978_v20  ;;  %8671 = vmatpush3.msra.mxu1 %v5654_v19  ;;  %v6361_v15 = vld [vmem:[#allocation14 + $0x28] sm:$0xff] }
0x283f   : > { %8680 = vmatprep.subr.mxu1 %v9972_v1  ;;  %v8957_v8 = vpack.c.bf16 %v6361_v15, %v6360_v4 }
0x2840   : > { %v5980_v45 = vmul.f32 1.442695, %v5979_v21 }
0x2841   : > { %v6145_v22 = vpop.xlane.xlu0 %6144 }
0x2842   : > { %9334 = vpow2.f32 %v5980_v45  ;;  %v6146_v23 = vsub.f32 %v6142_v41, %v6145_v22 }
0x2844   : > { %v6147_v24 = vmul.f32 1.442695, %v6146_v23 }
0x2846   : > { %9336 = vpow2.f32 %v6147_v24 }
0x2847   : > { %v9331_v25 = vpop.eup %9330 }
0x2848   : > { %v9333_v26 = vpop.eup %9332  ;;  %v5648_v18 = vsel %vm1371_vm3, %v9331_v25, 0.0 }
0x2849   : > { %5649 = vadd.xlane.f32.xlu1 %v5648_v18  ;;  %v5815_v29 = vsel %vm1371_vm3, %v9333_v26, 0.0  ;;  %v8044_v18 = vld [vmem:[#allocation16 + $0x1] ss:$0 sm:$0xff] }
0x284a   : > { %5816 = vadd.xlane.f32.xlu0 %v5815_v29 }
0x284c   : > { %v9335_v30 = vpop.eup %9334 }
0x284d   : > { %v5982_v31 = vsel %vm1371_vm3, %v9335_v30, 0.0 }
0x284e   : > { %5983 = vadd.xlane.f32.xlu1 %v5982_v31  ;;  %v6354_v31 = vld [vmem:[#allocation11 + $0x28] sm:$0xff] }
0x2850   : > { %v9337_v32 = vpop.eup %9336 }
0x2851   : > { %v6149_v33 = vsel %vm1371_vm3, %v9337_v32, 0.0 }
0x2852   : > { %6150 = vadd.xlane.f32.xlu0 %v6149_v33  ;;  %v6356_v33 = vld [vmem:[#allocation11 + $0x38] sm:$0xff] }
0x285f   : > { %5987 = vrot.lane.b32.xlu1 %v11098_v58, %s11536_s15 }
0x2863   : > { %6154 = vrot.lane.b32.xlu1 %v11098_v58, %s11537_s16 }
0x2868   : > { %5820 = vrot.lane.b32.xlu0 %v11098_v58, %s11534_s9 }
0x28d6   : > { %v5650_v34 = vpop.xlane.xlu1 %5649 }
0x28d7   : > { %9338 = vrcp.f32 %v5650_v34  ;;  %v5817_v36 = vpop.xlane.xlu0 %5816 }
0x28d8   : > { %9340 = vrcp.f32 %v5817_v36 }
0x28db   : > { %v5984_v28 = vpop.xlane.xlu1 %5983 }
0x28dc   : > { %9342 = vrcp.f32 %v5984_v28 }
0x28df   : > { %v6151_v37 = vpop.xlane.xlu0 %6150  ;;  %v5988_v58 = vpop.permute.xlu1 %5987 }
0x28e0   : > { %9344 = vrcp.f32 %v6151_v37 }
0x28e1   : > { %v9339_v5 = vpop.eup %9338 }
0x28e2   : > { %v5652_v38 = vmul.f32 %v9339_v5, %v9331_v25  ;;  %v9341_v39 = vpop.eup %9340 }
0x28e3   : > { %v5821_v42 = vpop.permute.xlu0 %5820  ;;  %v5819_v55 = vmul.f32 %v9341_v39, %v9333_v26  ;;  %v6155_v54 = vpop.permute.xlu1 %6154  ;;  %v11204_v39 = vld [vmem:[%s11545_s10 + $0x1] ss:$0 sm:$0xff] }
0x28e4   : > { %8673 = vmatmul.mubr.msk.f32.vlgmr.msra.gmra.mrb[58].mxu1 %vm1371_vm3, %v5652_v38 }
0x28e5   : > { %8681 = vmatpush3.msra.mxu1 %v5821_v42  ;;  %8682 = vmatprep.mubr.msk.f32.mxu1 %vm9971_vm0, %v9972_v1 }
0x28e6   : > { %8690 = vmatprep.subr.mxu1 %v9972_v1  ;;  %v9343_v43 = vpop.eup %9342 }
0x28e7   : > { %v5986_v2 = vmul.f32 %v9343_v43, %v9335_v30  ;;  %v6353_v30 = vld [vmem:[#allocation11 + $0x20] sm:$0xff] }
0x28e8   : > { %8683 = vmatmul.mubr.msk.f32.vlgmr.msra.gmra.mrb[60].mxu1 %vm1371_vm3, %v5819_v55  ;;  %v11207_v55 = vld [vmem:[%s10142_s21 + $0x1] ss:$0 sm:$0xff] }
0x28e9   : > { %8691 = vmatpush3.msra.mxu1 %v5988_v58  ;;  %8692 = vmatprep.mubr.msk.f32.mxu1 %vm9971_vm0, %v9972_v1 }
0x28ea   : > { %8700 = vmatprep.subr.mxu1 %v9972_v1  ;;  %v9345_v3 = vpop.eup %9344 }
0x28eb   : > { %v6153_v44 = vmul.f32 %v9345_v3, %v9337_v32  ;;  %v8951_v32 = vpack.c.bf16 %v6354_v31, %v6353_v30 }
0x28ec   : > { %8693 = vmatmul.mubr.msk.f32.vlgmr.msra.gmra.mrb[62].mxu1 %vm1371_vm3, %v5986_v2  ;;  %v8042_v2 = vld [vmem:[#allocation13 + $0x1] ss:$0 sm:$0xff] }
0x28ed   : > { %8701 = vmatpush3.msra.mxu1 %v6155_v54  ;;  %8702 = vmatprep.mubr.msk.f32.mxu1 %vm9971_vm0, %v9972_v1 }
0x28ee   : > { %8950 = vmatprep.subr.bf16.mxu1 %v9970_v0 }
0x28f0   : > { %8703 = vmatmul.mubr.msk.f32.vlgmr.msra.gmra.mrb[64].mxu1 %vm1371_vm3, %v6153_v44 }
0x28f1   : > { %8724 = vmatprep.mubr.msk.f32.mxu1 %vm9971_vm0, %v9972_v1  ;;  %8952 = vmatpush3.bf16.msra.mxu1 %v8951_v32 }
0x28f2   : > { %8953 = vmatprep.subr.bf16.mxu1 %v9970_v0 }
0x29b7   : > { %v5725_v14 = vpop.f32.mrb[58].mxu1 }
0x29b8   : > { %v8674_v53 = vpop.f32.mrb[59].mxu1 }
0x29bb   : > { %v5892_v51 = vpop.f32.mrb[60].mxu1 }
0x29bc   : > { %6231 = vrot.lane.b32.xlu0 %v5892_v51, %s11538_s17  ;;  %v8684_v56 = vpop.f32.mrb[61].mxu1 }
0x29bf   : > { %v6059_v57 = vpop.f32.mrb[62].mxu1 }
0x29c0   : > { %6235 = vrot.lane.b32.xlu1 %v6059_v57, %s11539_s19  ;;  %v8694_v59 = vpop.f32.mrb[63].mxu1 }
0x29c3   : > { %v6226_v60 = vpop.f32.mrb[64].mxu1 }
0x29c4   : > { %6239 = vrot.lane.b32.xlu0 %v6226_v60, %s11540_s20  ;;  %v8704_v63 = vpop.f32.mrb[65].mxu1 }
0x2a2e   : > { %v6232_v47 = vpop.permute.xlu0 %6231 }
0x2a2f   : > { %v6242_v7 = vsel %vm1371_vm3, %v5725_v14, %v6232_v47 }
0x2a32   : > { %v6236_v6 = vpop.permute.xlu1 %6235 }
0x2a33   : > { %v6243_v9 = vsel %vm2055_vm6, %v6242_v7, %v6236_v6 }
0x2a36   : > { %v6240_v41 = vpop.permute.xlu0 %6239 }
0x2a37   : > { %v6244_v11 = vsel %vm2057_vm7, %v6243_v9, %v6240_v41 }
0x2a38   : > { %8714 = vmatmul.mubr.msk.f32.vlgmr.msra.gmra.mrb[46].mxu0 %vm1294_vm2, %v6244_v11 }
0x2a39   : > { %8958 = vmatpush3.bf16.msra.mxu0 %v8957_v8  ;;  %8735 = vmatprep.mubr.msk.f32.mxu0 %vm9971_vm0, %v9972_v1 }
0x2a3a   : > { %8959 = vmatprep.subr.bf16.mxu0 %v9970_v0 }
0x2a3d   : > { %8961 = vmatpush3.bf16.msra.mxu0 %v8960_v12 }
0x2a3e   : > { %8748 = vmatprep.subr.mxu0 %v9972_v1 }
0x2a40   : > { %8736 = vmatmul.mubr.msk.f32.vlgmr.msra.gmra.mrb[48].mxu0 %vm1294_vm2, %v10955_v35 }
0x2a41   : > { %8750 = vmatprep.mubr.msk.f32.mxu0 %vm9971_vm0, %v9972_v1 }
0x2b0b   : > { %v6320_v16 = vpop.f32.mrb[46].mxu0 }
0x2b0c   : > { %v6321_v17 = vadd.f32 %v8038_v13, %v6320_v16  ;;  %v8715_v19 = vpop.f32.mrb[47].mxu0 }
0x2b0e   : > { %v6324_v20 = vadd.f32 %v6321_v17, %v11092_v40  ;;  %v6355_v40 = vld [vmem:[#allocation11 + $0x30] sm:$0xff] }
0x2b0f   : > { %v8954_v34 = vpack.c.bf16 %v6356_v33, %v6355_v40 }
0x2b10   : > { %v6325_v21 = vsel %vm1294_vm2, %v6324_v20, 0.0 }
0x2b11   : > { %6326 = vadd.xlane.f32.xlu1 %v6325_v21  ;;  %8955 = vmatpush3.bf16.msra.mxu1 %v8954_v34 }
0x2b12   : > { %8738 = vmatprep.subr.mxu1 %v9972_v1 }
0x2b13   : > { %v6524_v45 = vpop.f32.mrb[48].mxu0 }
0x2b14   : > { %v8737_v22 = vpop.f32.mrb[49].mxu0  ;;  %v11195_v29 = vadd.f32 %v8044_v18, %v6524_v45 }
0x2b9e   : > { %v6327_v23 = vpop.xlane.xlu1 %6326 }
0x2b9f   : > { %v6328_v24 = vmul.f32 0.03125, %v6327_v23 }
0x2ba1   : > { %v6329_v25 = vsub.f32 %v6324_v20, %v6328_v24 }
0x2ba3   : > { %v6330_v26 = vmul.f32 %v6329_v25, %v6329_v25 }
0x2ba5   : > { %v6331_v35 = vsel %vm1294_vm2, %v6330_v26, 0.0 }
0x2ba6   : > { %6332 = vadd.xlane.f32.xlu0 %v6331_v35 }
0x2bbc   : > { %6695 = vrot.lane.b32.xlu0 %v11195_v29, %s11530_s4 }
0x2c33   : > { %v6333_v36 = vpop.xlane.xlu0 %6332 }
0x2c34   : > { %v6334_v28 = vmul.f32 0.03125, %v6333_v36 }
0x2c36   : > { %v6335_v37 = vadd.f32 1e-05, %v6334_v28 }
0x2c37   : > { %v6696_v5 = vpop.permute.xlu0 %6695 }
0x2c38   : > { %9346 = vrsqrt.f32 %v6335_v37  ;;  %8749 = vmatpush3.xpose.msk.msra.mxu0 %vm1371_vm3, %v6696_v5 }
0x2c39   : > { %8758 = vmatprep.subr.mxu0 %v9972_v1 }
0x2c42   : > { %v9347_v38 = vpop.eup %9346 }
0x2c43   : > { %v6337_v42 = vmul.f32 %v9347_v38, %v6329_v25 }
0x2c45   : > { %v6344_v58 = vmul.f32 %v11204_v39, %v6337_v42 }
0x2c47   : > { %v11211_v43 = vadd.f32 %v11207_v55, %v6344_v58 }
0x2c49   : > { %8725 = vmatmul.mubr.msk.f32.vlgmr.msra.gmra.mrb[66].mxu1 %vm1294_vm2, %v11211_v43 }
0x2c4a   : > { %8739 = vmatpush3.xpose.msk.msra.mxu1 %vm1371_vm3, %v11195_v29  ;;  %8740 = vmatprep.mubr.msk.f32.mxu1 %vm9971_vm0, %v9972_v1 }
0x2c4b   : > { %8743 = vmatprep.subr.mxu1 %v9972_v1 }
0x2d1c   : > { %v6448_v3 = vpop.f32.mrb[66].mxu1 }
0x2d1d   : > { %v6449_v54 = vadd.f32 %v8042_v2, %v6448_v3  ;;  %v8726_v44 = vpop.f32.mrb[67].mxu1 }
0x2d1f   : > { %6860 = vrot.lane.b32.xlu0 %v6449_v54, %s11529_s3  ;;  %6693 = vrot.lane.b32.xlu1 %v6449_v54, %s11530_s4 }
0x2d20   : > { %8741 = vmatmul.mubr.msk.f32.vlgmr.msra.gmra.mrb[68].mxu1 %vm1371_vm3, %v6449_v54 }
0x2d21   : > { %8745 = vmatprep.mubr.msk.f32.mxu1 %vm9971_vm0, %v9972_v1 }
0x2d23   : > { %7027 = vrot.lane.b32.xlu0 %v6449_v54, %s11531_s5  ;;  %6862 = vrot.lane.b32.xlu1 %v11195_v29, %s11529_s3 }
0x2d27   : > { %7029 = vrot.lane.b32.xlu1 %v11195_v29, %s11531_s5  ;;  %s1241_s5 = sand.u32 1, %s9908_s1  }
0x2d28   : > { %s7913_s9 = sshll.u32 %s1241_s5, 3 }
0x2d29   : > { %s1243_s3 = scalar_lea.vmem [#allocation28], %s7913_s9 }
0x2d91   : > { %v6694_v46 = vpop.permute.xlu1 %6693  ;;  %v6861_v61 = vpop.permute.xlu0 %6860 }
0x2d92   : > { %8751 = vmatmul.mubr.msk.f32.vlgmr.msra.gmra.mrb[50].mxu0 %vm1371_vm3, %v6694_v46 }
0x2d93   : > { %8760 = vmatprep.mubr.msk.f32.mxu0 %vm9971_vm0, %v9972_v1 }
0x2d95   : > { %v6863_v48 = vpop.permute.xlu1 %6862  ;;  %v7028_v50 = vpop.permute.xlu0 %7027 }
0x2d96   : > { %8759 = vmatpush3.xpose.msk.msra.mxu0 %vm1371_vm3, %v6863_v48 }
0x2d97   : > { %8768 = vmatprep.subr.mxu0 %v9972_v1 }
0x2d99   : > { %8761 = vmatmul.mubr.msk.f32.vlgmr.msra.gmra.mrb[52].mxu0 %vm1371_vm3, %v6861_v61  ;;  %v7030_v49 = vpop.permute.xlu1 %7029 }
0x2d9a   : > { %8769 = vmatpush3.xpose.msk.msra.mxu0 %vm1371_vm3, %v7030_v49  ;;  %8770 = vmatprep.mubr.msk.f32.mxu0 %vm9971_vm0, %v9972_v1 }
0x2d9b   : > { %8962 = vmatprep.subr.bf16.mxu0 %v9970_v0 }
0x2d9d   : > { %8771 = vmatmul.mubr.msk.f32.vlgmr.msra.gmra.mrb[54].mxu0 %vm1371_vm3, %v7028_v50  ;;  %v6367_v50 = vld [vmem:[#allocation17 + $0x20] sm:$0xff] }
0x2d9e   : > { %8786 = vmatprep.mubr.msk.f32.mxu0 %vm9971_vm0, %v9972_v1 }
0x2df3   : > { %v6600_v52 = vpop.f32.mrb[68].mxu1 }
0x2df4   : > { %v6604_v14 = vmul.f32 0.35355338, %v6600_v52  ;;  %v8742_v53 = vpop.f32.mrb[69].mxu1  ;;  %v6368_v52 = vld [vmem:[#allocation17 + $0x28] sm:$0xff] }
0x2df5   : > { %v6369_v53 = vld [vmem:[#allocation17 + $0x30] sm:$0xff] }
0x2df6   : > { %v6605_v51 = vsel %vm1452_vm5, %v6604_v14, -1e+30  ;;  %v8963_v14 = vpack.c.bf16 %v6368_v52, %v6367_v50 }
0x2df7   : > { %v6606_v56 = vsel %vm1371_vm3, %v6605_v51, -inf }
0x2df8   : > { %6607 = vmax.xlane.f32.xlu1 %v6606_v56  ;;  %8964 = vmatpush3.bf16.msra.mxu0 %v8963_v14  ;;  %v8070_v14 = vld [vmem:[#allocation23 + $0x1] ss:$0 sm:$0xff] }
0x2df9   : > { %8965 = vmatprep.subr.bf16.mxu0 %v9970_v0 }
0x2e65   : > { %v6767_v57 = vpop.f32.mrb[50].mxu0 }
0x2e66   : > { %v6771_v59 = vmul.f32 0.35355338, %v6767_v57  ;;  %v8752_v60 = vpop.f32.mrb[51].mxu0 }
0x2e68   : > { %v6772_v63 = vsel %vm1452_vm5, %v6771_v59, -1e+30 }
0x2e69   : > { %v6773_v47 = vsel %vm1371_vm3, %v6772_v63, -inf }
0x2e6a   : > { %6774 = vmax.xlane.f32.xlu0 %v6773_v47 }
0x2e6c   : > { %v6934_v4 = vpop.f32.mrb[52].mxu0 }
0x2e6d   : > { %v6938_v15 = vmul.f32 0.35355338, %v6934_v4  ;;  %v8762_v6 = vpop.f32.mrb[53].mxu0 }
0x2e6f   : > { %v6939_v7 = vsel %vm1452_vm5, %v6938_v15, -1e+30 }
0x2e70   : > { %v7101_v8 = vpop.f32.mrb[54].mxu0  ;;  %v6940_v9 = vsel %vm1371_vm3, %v6939_v7, -inf }
0x2e71   : > { %v7105_v41 = vmul.f32 0.35355338, %v7101_v8  ;;  %6941 = vmax.xlane.f32.xlu0 %v6940_v9  ;;  %v8772_v10 = vpop.f32.mrb[55].mxu0 }
0x2e72   : > { %v8058_v10 = vld [vmem:[#allocation19 + $0x1] ss:$0 sm:$0xff] }
0x2e73   : > { %v7106_v62 = vsel %vm1452_vm5, %v7105_v41, -1e+30 }
0x2e74   : > { %v7107_v11 = vsel %vm1371_vm3, %v7106_v62, -inf }
0x2e75   : > { %7108 = vmax.xlane.f32.xlu1 %v7107_v11 }
0x2e85   : > { %v6608_v12 = vpop.xlane.xlu1 %6607 }
0x2e86   : > { %v6609_v13 = vsub.f32 %v6605_v51, %v6608_v12  ;;  %6784 = vrot.lane.b32.xlu1 %v11195_v29, %s11527_s2  ;;  %v6370_v51 = vld [vmem:[#allocation17 + $0x38] sm:$0xff] }
0x2e87   : > { %v8966_v56 = vpack.c.bf16 %v6370_v51, %v6369_v53 }
0x2e88   : > { %v6610_v16 = vmul.f32 1.442695, %v6609_v13 }
0x2e89   : > { %8967 = vmatpush3.bf16.msra.mxu0 %v8966_v56 }
0x2e8a   : > { %9348 = vpow2.f32 %v6610_v16  ;;  %8974 = vmatprep.subr.bf16.mxu0 %v9970_v0 }
0x2e94   : > { %v9349_v17 = vpop.eup %9348 }
0x2e95   : > { %v6612_v19 = vsel %vm1371_vm3, %v9349_v17, 0.0 }
0x2e96   : > { %6613 = vadd.xlane.f32.xlu0 %v6612_v19 }
0x2eac   : > { %6617 = vrot.lane.b32.xlu0 %v11195_v29, %s11528_s28 }
0x2ef7   : > { %v6775_v20 = vpop.xlane.xlu0 %6774 }
0x2ef8   : > { %v6776_v27 = vsub.f32 %v6772_v63, %v6775_v20 }
0x2efa   : > { %v6777_v21 = vmul.f32 1.442695, %v6776_v27 }
0x2efc   : > { %9350 = vpow2.f32 %v6777_v21 }
0x2efe   : > { %v6942_v45 = vpop.xlane.xlu0 %6941 }
0x2eff   : > { %v6943_v22 = vsub.f32 %v6939_v7, %v6942_v45  ;;  %v7305_v45 = vld [vmem:[#allocation20 + $0x20] sm:$0xff] }
0x2f01   : > { %v6944_v23 = vmul.f32 1.442695, %v6943_v22  ;;  %v7306_v22 = vld [vmem:[#allocation20 + $0x28] sm:$0xff] }
0x2f02   : > { %v7109_v24 = vpop.xlane.xlu1 %7108 }
0x2f03   : > { %9352 = vpow2.f32 %v6944_v23  ;;  %v7110_v25 = vsub.f32 %v7106_v62, %v7109_v24  ;;  %v8969_v23 = vpack.c.bf16 %v7306_v22, %v7305_v45  ;;  %v7307_v24 = vld [vmem:[#allocation20 + $0x30] sm:$0xff] }
0x2f05   : > { %v7111_v26 = vmul.f32 1.442695, %v7110_v25 }
0x2f06   : > { %v9351_v35 = vpop.eup %9350  ;;  %v6785_v37 = vpop.permute.xlu1 %6784 }
0x2f07   : > { %9354 = vpow2.f32 %v7111_v26  ;;  %v6779_v18 = vsel %vm1371_vm3, %v9351_v35, 0.0 }
0x2f08   : > { %6780 = vadd.xlane.f32.xlu1 %v6779_v18 }
0x2f0d   : > { %v9353_v30 = vpop.eup %9352 }
0x2f0e   : > { %v6946_v31 = vsel %vm1371_vm3, %v9353_v30, 0.0 }
0x2f0f   : > { %6947 = vadd.xlane.f32.xlu0 %v6946_v31 }
0x2f11   : > { %v9355_v32 = vpop.eup %9354 }
0x2f12   : > { %v7113_v40 = vsel %vm1371_vm3, %v9355_v32, 0.0 }
0x2f13   : > { %7114 = vadd.xlane.f32.xlu1 %v7113_v40 }
0x2f23   : > { %v6614_v33 = vpop.xlane.xlu0 %6613 }
0x2f24   : > { %9356 = vrcp.f32 %v6614_v33  ;;  %6951 = vrot.lane.b32.xlu1 %v11195_v29, %s11532_s6  ;;  %v8062_v33 = vld [vmem:[%s11546_s18 + $0x40] sm:$0xff] }
0x2f25   : > { %7118 = vrot.lane.b32.xlu0 %v11195_v29, %s11533_s8  ;;  %s7601_s8 = sshll.u32 %s1243_s3, 4  ;;  %s11327_s8 = int_to_ptr.vmem [resolvable:$true] %s7601_s8 }
0x2f26   : > { %s9818_s6 = scalar_lea.vmem %s11327_s8, 128 }
0x2f27   : > { %v6618_v34 = vpop.permute.xlu0 %6617  ;;  %p9819_p12 = scmp.ne.s32.totalorder %s11327_s8, %s9818_s6 }
0x2f28   : > { %8744 = vmatpush3.msra.mxu1 %v6618_v34  ;;  %v8063_v34 = vld [vmem:[%s11546_s18 + $0x48] sm:$0xff] }
0x2f29   : > { %8753 = vmatprep.subr.mxu1 %v9972_v1  ;;  %p9820_p2 = pnand %p9819_p12, %p11547_p1 }
0x2f2b   : > { %p9821_p3 = pneg %p9820_p2 }
0x2f2e   : > { %v9357_v36 = vpop.eup %9356 }
0x2f2f   : > { %v6616_v28 = vmul.f32 %v9357_v36, %v9349_v17  ;;  %v8975_v36 = vpack.c.bf16 %v8063_v34, %v8062_v33 }
0x2f31   : > { %8746 = vmatmul.mubr.msk.f32.vlgmr.msra.gmra.mrb[70].mxu1 %vm1371_vm3, %v6616_v28  ;;  %v8064_v28 = vld [vmem:[%s11546_s18 + $0x50] sm:$0xff] }
0x2f32   : > { %8754 = vmatpush3.msra.mxu1 %v6785_v37  ;;  %8755 = vmatprep.mubr.msk.f32.mxu1 %vm9971_vm0, %v9972_v1  ;;  %v8065_v37 = vld [vmem:[%s11546_s18 + $0x58] sm:$0xff] }
0x2f33   : > { %8763 = vmatprep.subr.mxu1 %v9972_v1 }
0x2f95   : > { %v6781_v5 = vpop.xlane.xlu1 %6780 }
0x2f96   : > { %9358 = vrcp.f32 %v6781_v5  ;;  %v8978_v5 = vpack.c.bf16 %v8065_v37, %v8064_v28 }
0x2f9c   : > { %v6948_v38 = vpop.xlane.xlu0 %6947 }
0x2f9d   : > { %9360 = vrcp.f32 %v6948_v38  ;;  %v8066_v38 = vld [vmem:[%s11546_s18 + $0x60] sm:$0xff] }
0x2fa0   : > { %v9359_v29 = vpop.eup %9358  ;;  %v7115_v42 = vpop.xlane.xlu1 %7114 }
0x2fa1   : > { %v6783_v58 = vmul.f32 %v9359_v29, %v9351_v35  ;;  %9362 = vrcp.f32 %v7115_v42  ;;  %v7119_v44 = vpop.permute.xlu0 %7118  ;;  %v8067_v29 = vld [vmem:[%s11546_s18 + $0x68] sm:$0xff] }
0x2fa2   : > { %v8981_v42 = vpack.c.bf16 %v8067_v29, %v8066_v38 }
0x2fa3   : > { %8756 = vmatmul.mubr.msk.f32.vlgmr.msra.gmra.mrb[72].mxu1 %vm1371_vm3, %v6783_v58  ;;  %v8069_v58 = vld [vmem:[%s11546_s18 + $0x78] sm:$0xff] }
0x2fa4   : > { %v6952_v2 = vpop.permute.xlu1 %6951  ;;  %8765 = vmatprep.mubr.msk.f32.mxu1 %vm9971_vm0, %v9972_v1 }
0x2fa5   : > { %8764 = vmatpush3.msra.mxu1 %v6952_v2 }
0x2fa6   : > { %8773 = vmatprep.subr.mxu1 %v9972_v1 }
0x2fa7   : > { %v9361_v3 = vpop.eup %9360 }
0x2fa8   : > { %v6950_v54 = vmul.f32 %v9361_v3, %v9353_v30  ;;  %v8060_v3 = vld [vmem:[#allocation22 + $0x1] ss:$0 sm:$0xff] }
0x2faa   : > { %8766 = vmatmul.mubr.msk.f32.vlgmr.msra.gmra.mrb[74].mxu1 %vm1371_vm3, %v6950_v54 }
0x2fab   : > { %v9363_v46 = vpop.eup %9362  ;;  %8774 = vmatpush3.msra.mxu1 %v7119_v44  ;;  %8775 = vmatprep.mubr.msk.f32.mxu1 %vm9971_vm0, %v9972_v1 }
0x2fac   : > { %v7117_v48 = vmul.f32 %v9363_v46, %v9355_v32  ;;  %8968 = vmatprep.subr.bf16.mxu1 %v9970_v0 }
0x2fae   : > { %8776 = vmatmul.mubr.msk.f32.vlgmr.msra.gmra.mrb[76].mxu1 %vm1371_vm3, %v7117_v48 }
0x2faf   : > { %8797 = vmatprep.mubr.msk.f32.mxu1 %vm9971_vm0, %v9972_v1  ;;  %8970 = vmatpush3.bf16.msra.mxu1 %v8969_v23 }
0x2fb0   : > { %8971 = vmatprep.subr.bf16.mxu1 %v9970_v0 }
0x3004   : > { %v6689_v61 = vpop.f32.mrb[70].mxu1 }
0x3005   : > { %v8747_v49 = vpop.f32.mrb[71].mxu1 }
0x3076   : > { %v6856_v57 = vpop.f32.mrb[72].mxu1 }
0x3077   : > { %7195 = vrot.lane.b32.xlu1 %v6856_v57, %s11538_s17  ;;  %v8757_v59 = vpop.f32.mrb[73].mxu1  ;;  %s8075_s17 = sshll.u32 %s10180_s0, 7 }
0x3078   : > { %s11325_s14 = scalar_lea.hbm %s10157_s13, %s8075_s17 }
0x307d   : > { %v7023_v60 = vpop.f32.mrb[74].mxu1 }
0x307e   : > { %7199 = vrot.lane.b32.xlu0 %v7023_v60, %s11539_s19  ;;  %v8767_v63 = vpop.f32.mrb[75].mxu1  ;;  %s7588_s19 = scalar_lea.sflag [#allocation4], %s1241_s5 }
0x3081   : > { %v7190_v47 = vpop.f32.mrb[76].mxu1 }
0x3082   : > { %7203 = vrot.lane.b32.xlu1 %v7190_v47, %s11540_s20  ;;  %v8777_v4 = vpop.f32.mrb[77].mxu1  ;;  %s9988_s20 = smov [#allocation28]  }
0x3083   : > { %s9822_s4 = sshll.u32 %s9988_s20, 4  ;;  %s9823_s4 = int_to_ptr.vmem [resolvable:$false] %s9822_s4 }
0x3084   : > { %s9824_s0 = scalar_lea.vmem %s9823_s4, 256  ;;  %p9825_p4 = scmp.lt.s32.totalorder %s11327_s8, %s9823_s4 }
0x3085   : > { %p9826_p7 = scmp.lt.s32.totalorder %s9824_s0, %s9818_s6 }
0x3087   : > { %p9827_p8 = por %p9826_p7, %p9825_p4 }
0x3089   : > { %p9828_p11 = pnand %p9827_p8, %p9821_p3 }
0x30e9   : > { %v7196_v15 = vpop.permute.xlu1 %7195 }
0x30ea   : > { %v7206_v7 = vsel %vm1371_vm3, %v6689_v61, %v7196_v15 }
0x30f0   : > { %v7200_v6 = vpop.permute.xlu0 %7199 }
0x30f1   : > { %v7207_v8 = vsel %vm2055_vm6, %v7206_v7, %v7200_v6  ;;  %v7501_v6 = vld [vmem:[#allocation25] sm:$0xff]  ;;  %v7502_v7 = vld [vmem:[#allocation25 + $0x8] sm:$0xff] }
0x30f4   : > { %v7204_v9 = vpop.permute.xlu1 %7203 }
0x30f5   : > { %v7208_v41 = vsel %vm2057_vm7, %v7207_v8, %v7204_v9  ;;  %v8987_v8 = vpack.c.bf16 %v7502_v7, %v7501_v6  ;;  %v7503_v9 = vld [vmem:[#allocation25 + $0x10] sm:$0xff] }
0x30f6   : > { %8787 = vmatmul.mubr.msk.f32.vlgmr.msra.gmra.mrb[56].mxu0 %vm1294_vm2, %v7208_v41  ;;  %v7504_v41 = vld [vmem:[#allocation25 + $0x18] sm:$0xff] }
0x30f7   : > { %8816 = vmatprep.mubr.msk.f32.mxu0 %vm9971_vm0, %v9972_v1  ;;  %8976 = vmatpush3.bf16.msra.mxu0 %v8975_v36 }
0x30f8   : > { %8977 = vmatprep.subr.bf16.mxu0 %v9970_v0 }
0x30fb   : > { %8979 = vmatpush3.bf16.msra.mxu0 %v8978_v5 }
0x30fc   : > { %8980 = vmatprep.subr.bf16.mxu0 %v9970_v0 }
0x30ff   : > { %8982 = vmatpush3.bf16.msra.mxu0 %v8981_v42 }
0x3100   : > { %8983 = vmatprep.subr.bf16.mxu0 %v9970_v0 }
0x31c9   : > { %v7284_v62 = vpop.f32.mrb[56].mxu0 }
0x31ca   : > { %v7285_v11 = vadd.f32 %v8058_v10, %v7284_v62  ;;  %v8788_v12 = vpop.f32.mrb[57].mxu0  ;;  %v8990_v10 = vpack.c.bf16 %v7504_v41, %v7503_v9 }
0x31cc   : > { %v7288_v13 = vadd.f32 %v7285_v11, %v11211_v43  ;;  %v7308_v43 = vld [vmem:[#allocation20 + $0x38] sm:$0xff] }
0x31cd   : > { %v8972_v25 = vpack.c.bf16 %v7308_v43, %v7307_v24 }
0x31ce   : > { %v7289_v16 = vsel %vm1294_vm2, %v7288_v13, 0.0 }
0x31cf   : > { %7290 = vadd.xlane.f32.xlu0 %v7289_v16  ;;  %8973 = vmatpush3.bf16.msra.mxu1 %v8972_v25 }
0x31d0   : > { %8986 = vmatprep.subr.bf16.mxu1 %v9970_v0 }
0x325c   : > { %v7291_v17 = vpop.xlane.xlu0 %7290 }
0x325d   : > { %v7292_v19 = vmul.f32 0.03125, %v7291_v17 }
0x325f   : > { %v7293_v20 = vsub.f32 %v7288_v13, %v7292_v19 }
0x3261   : > { %v7294_v27 = vmul.f32 %v7293_v20, %v7293_v20 }
0x3263   : > { %v7295_v21 = vsel %vm1294_vm2, %v7294_v27, 0.0 }
0x3264   : > { %7296 = vadd.xlane.f32.xlu1 %v7295_v21 }
0x32f1   : > { %v7297_v26 = vpop.xlane.xlu1 %7296 }
0x32f2   : > { %v7298_v35 = vmul.f32 0.03125, %v7297_v26 }
0x32f4   : > { %v7299_v18 = vadd.f32 1e-05, %v7298_v35 }
0x32f6   : > { %9364 = vrsqrt.f32 %v7299_v18 }
0x3300   : > { %v9365_v30 = vpop.eup %9364 }
0x3301   : > { %v7301_v31 = vmul.f32 %v9365_v30, %v7293_v20 }
0x3303   : > { %v7302_v32 = vmul.f32 %v11204_v39, %v7301_v31 }
0x3305   : > { %v7303_v40 = vadd.f32 %v11207_v55, %v7302_v32 }
0x3307   : > { %8798 = vmatmul.mubr.msk.f32.vlgmr.msra.gmra.mrb[78].mxu1 %vm1294_vm2, %v7303_v40 }
0x3308   : > { %8827 = vmatprep.mubr.msk.f32.mxu1 %vm9971_vm0, %v9972_v1  ;;  %v8068_v1 = vld [vmem:[%s11546_s18 + $0x70] sm:$0xff]  ;;  %8988 = vmatpush3.bf16.msra.mxu1 %v8987_v8 }
0x3309   : > { %v8984_v2 = vpack.c.bf16 %v8069_v58, %v8068_v1  ;;  %8989 = vmatprep.subr.bf16.mxu1 %v9970_v0  ;;  %v8072_v0 = vld [vmem:[#allocation26] ss:$0 sm:$0xff] }
0x330b   : > { %8985 = vmatpush3.bf16.msra.mxu0 %v8984_v2 }
0x330c   : > { %8991 = vmatpush3.bf16.msra.mxu1 %v8990_v10 }
0x33da   : > { %v7386_v54 = vpop.f32.mrb[78].mxu1 }
0x33db   : > { %v7387_v44 = vadd.f32 %v8060_v3, %v7386_v54  ;;  %v8799_v46 = vpop.f32.mrb[79].mxu1 }
0x33dd   : > { %v7391_v48 = vmul.f32 0.70710677, %v7387_v44  ;;  %v7390_v49 = vmul.f32 0.5, %v7387_v44 }
0x33df   : > { %9366 = verf.f32 %v7391_v48 }
0x33e9   : > { %v9367_v61 = vpop.eup %9366 }
0x33ea   : > { %v7393_v50 = vadd.f32 1.0, %v9367_v61 }
0x33ec   : > { %v7394_v52 = vmul.f32 %v7393_v50, %v7390_v49 }
0x33ee   : > { %8817 = vmatmul.mubr.msk.f32.vlgmr.msra.gmra.mrb[58].mxu0 %vm2271_vm8, %v7394_v52 }
0x34c1   : > { %v7481_v53 = vpop.f32.mrb[58].mxu0 }
0x34c2   : > { %v7482_v51 = vadd.f32 %v8070_v14, %v7481_v53  ;;  %v8818_v56 = vpop.f32.mrb[59].mxu0 }
0x34c4   : > { %v7485_v57 = vadd.f32 %v7482_v51, %v7303_v40 }
0x34c6   : > { %v7486_v59 = vsel %vm1294_vm2, %v7485_v57, 0.0 }
0x34c7   : > { %7487 = vadd.xlane.f32.xlu0 %v7486_v59 }
0x3554   : > { %v7488_v60 = vpop.xlane.xlu0 %7487 }
0x3555   : > { %v7489_v63 = vmul.f32 0.03125, %v7488_v60 }
0x3557   : > { %v7490_v47 = vsub.f32 %v7485_v57, %v7489_v63 }
0x3559   : > { %v7491_v4 = vmul.f32 %v7490_v47, %v7490_v47 }
0x355b   : > { %v7492_v15 = vsel %vm1294_vm2, %v7491_v4, 0.0 }
0x355c   : > { %7493 = vadd.xlane.f32.xlu0 %v7492_v15 }
0x35e9   : > { %v7494_v62 = vpop.xlane.xlu0 %7493 }
0x35ea   : > { %v7495_v11 = vmul.f32 0.03125, %v7494_v62 }
0x35ec   : > { %v7496_v12 = vadd.f32 1e-05, %v7495_v11 }
0x35ee   : > { %9368 = vrsqrt.f32 %v7496_v12 }
0x35f8   : > { %v9369_v13 = vpop.eup %9368 }
0x35f9   : > { %v7498_v16 = vmul.f32 %v9369_v13, %v7490_v47 }
0x35fb   : > { %v7499_v17 = vmul.f32 %v11204_v39, %v7498_v16 }
0x35fd   : > { %v7500_v19 = vadd.f32 %v11207_v55, %v7499_v17 }
0x35ff   : > { %8828 = vmatmul.mubr.msk.f32.vlgmr.msra.gmra.mrb[80].mxu1 %vm1294_vm2, %v7500_v19 }
0x36d2   : > { %v7581_v20 = vpop.f32.mrb[80].mxu1 }
0x36d3   : > { %v7582_v27 = vadd.f32 %v8072_v0, %v7581_v20  ;;  %v8829_v21 = vpop.f32.mrb[81].mxu1 }
0x36d5   : > { %7586 = vst.msk [vmem:[%s1243_s3] sm:$0xff] %vm7585_vm12, %v7582_v27 }
0x36d6   : > { %9831 = shalt.err (!%p9828_p11)
}
0x36d7   : > { %s9832_s16 = scalar_lea.hbm %s11325_s14, 128  ;;  %s9836_s15 = scalar_lea.hbm %s10157_s13, 256 }
0x36d8   : > { %p9833_p13 = scmp.ne.s32.totalorder %s11325_s14, %s9832_s16  ;;  %p9837_p5 = scmp.lt.u32.totalorder %s11325_s14, %s10157_s13 }
0x36d9   : > { %p9838_p9 = scmp.lt.u32.totalorder %s9836_s15, %s9832_s16  ;;  %p9840_p12 = scmp.lt.u32.totalorder %s9832_s16, %s11325_s14 }
0x36da   : > { %p9834_p6 = pnand %p9833_p13, %p11547_p1 }
0x36db   : > { %p9839_p10 = por %p9838_p9, %p9837_p5 }
0x36dc   : > { %p9835_p0 = pneg %p9834_p6 }
0x36dd   : > { %p9841_p2 = por %p9840_p12, %p9839_p10 }
0x36df   : > { %p9842_p3 = pnand %p9841_p2, %p9835_p0 }
0x36e1   : > { %9845 = shalt.err (!%p9842_p3)
}
0x36e2   : > { %9056 = dma.vmem_to_hbm [thread:$0]  (%p11547_p1), %s11327_s8, 128, %s11325_s14, %s7588_s19  }
0x36e3 PF: > { %s11548_s23 = sld [smem:[#allocation68_spill]]  ;;  %s11549_s11 = sld [smem:[#allocation66_spill]] }
0x36e4   : > { %s11550_s2 = sld [smem:[#allocation71_spill]] }
0x36e9   : > { %p9143_p4 = scmp.ge.s32.totalorder %s11548_s23, 2  ;;  %s7613_s28 = sand.u32 1, %s11549_s11  }
0x36ea   : > { %p11551_p7 = scmp.ne.s32.totalorder %s11550_s2, 0  ;;  %s7614_s5 = scalar_lea.sflag [#allocation4], %s7613_s28 }
0x36ec   : > { %p9108_p8 = pnand %p9143_p4, %p11551_p7 }
0x36ee   : > { %9899 = dma.done.wait (!%p9108_p8), %s7614_s5, 128  }
0x36ef   : > { %9901 = vsyncadd (!%p9108_p8), %s7614_s5, 4294967168  ;;  %s11552_s9 = sld [smem:[#allocation69_spill]]  ;;  %s11553_s17 = sld [smem:[#allocation67_spill]] }
0x36f0   : > { %s11554_s2 = sld [smem:[#allocation70_spill]]  ;;  %s11555_s28 = smov %s9908_s1 }
0x36f5   : > { %p84_p11 = scmp.ge.s32.totalorder %s11552_s9, 4   ;;  %s11556_s1 = smov %s11553_s17 }
0x36f6   : > { %11557 = sst [smem:[#allocation66_spill]] %s11552_s9 }
0x36f7   :  { %86 = sbr.rel (!%p84_p11) target bundleno = 76 (0x4c), region = 315 }
0x36fe   :  { %7619 = vsyncpa [#allocation3], 1 }
0x36ff   :  { %7621 = vsyncpa [#allocation3 + $0x1], 1 }
0x3700   :  { %7622 = vsyncpa [#allocation6], 1 }
0x3701   :  { %7623 = vsyncpa [#allocation9], 1 }
0x3702   :  { %7624 = vsyncpa [#allocation12], 1 }
0x3703   :  { %7625 = vsyncpa [#allocation15], 1 }
0x3704   :  { %7626 = vsyncpa [#allocation18], 1 }
0x3705   :  { %7627 = vsyncpa [#allocation21], 1 }
0x3706   :  { %7628 = vsyncpa [#allocation24], 1 }
0x3707   :  { %7629 = vsyncpa [#allocation27], 1 }
0x3708   :  { %7630 = vsyncpa [#allocation4], 1 }
0x3709   :  { %7632 = vsyncpa [#allocation4 + $0x1], 1 }

</bundles_post_ra>
